<compile_context>
chip_gen: v6e
topology: v6e:2x2x1
jax: 0.10.0
libtpu: 0.0.40
codegen_flags: <defaults>
</compile_context>

<pallas_src>
import jax
import jax.numpy as jnp
from jax import lax
from jax.experimental import pallas as pl
from jax.experimental.pallas import tpu as pltpu

# ------------------------- sizes (small but shape-consistent) -------------------------
BS = 2
C, H, W = 4, 16, 16              # image NCHW
SEQ, V_DIM = 8, 4                # trajectory
TRAJ_DIM = 32                    # h_dim of trajectory encoder
CONT_DIM = 32                    # context encoder output
D = TRAJ_DIM + CONT_DIM          # gen input width (64)
NUM_MODES = 3
FUTURE_LEN = 8
NUM_PREDS = 2 * FUTURE_LEN * NUM_MODES   # 48
HEAD_PAD = 128                   # lane-dense padded width of the fused output
CONT_LANE0 = 64                  # cont_vector lives in output lanes [64, 96)
BN_EPS = 1e-5

# ------------------------- f32 parameter slab layout (rows) -------------------------
ROW_WIH = 0                      # rows 0:4    lstm w_ih         (V_DIM, 4*TRAJ_DIM)
ROW_LSTMB = 4                    # row  4      lstm bias          (1, 128)
ROW_GB = 5                       # row  5      [bn_gamma(64) | bn_beta(64)]
ROW_CONTB = 6                    # row  6      [cont_b(32) | zeros]
ROW_B12 = 7                      # row  7      folded head bias   (1, 128)
ROW_WHH = 8                      # rows 8:40   lstm w_hh          (32, 128)
ROW_W12H = 40                    # rows 40:72  folded head weight, h-feature rows
ROW_W12C = 72                    # rows 72:104 folded head weight, cont-feature rows
SLAB_ROWS = 104

_HI = lax.Precision.HIGHEST


# ------------------------------------ fused kernel ------------------------------------
def generator_kernel(traj_ref, img_ref, slab_ref, cont_w_ref, out_ref):
    f32 = jnp.float32
    bs = traj_ref.shape[0]
    seq = traj_ref.shape[1]
    hd = TRAJ_DIM

    # ---- static views into the packed f32 slab (one DMA for all small params) ----
    wih = slab_ref[ROW_WIH:ROW_WIH + V_DIM, :]                 # (4, 128)
    lstm_b = slab_ref[ROW_LSTMB:ROW_LSTMB + 1, :]              # (1, 128)
    gb_row = slab_ref[ROW_GB:ROW_GB + 1, :]                    # (1, 128)
    cont_b = slab_ref[ROW_CONTB:ROW_CONTB + 1, 0:CONT_DIM]     # (1, 32)
    b12 = slab_ref[ROW_B12:ROW_B12 + 1, :]                     # (1, 128)
    whh = slab_ref[ROW_WHH:ROW_WHH + hd, :]                    # (32, 128)
    w12_h = slab_ref[ROW_W12H:ROW_W12H + hd, :]                # (32, 128)
    w12_c = slab_ref[ROW_W12C:ROW_W12C + CONT_DIM, :]          # (32, 128)

    # ---- Context encoder: Linear(bf16 x bf16 -> f32 acc) + ReLU ----
    cont = jnp.dot(img_ref[...], cont_w_ref[...],
                   preferred_element_type=f32) + cont_b
    cont = jnp.maximum(cont, 0.0)                              # (bs, 32)

    # ---- Trajectory encoder: single-layer LSTM with fused 128-wide gates ----
    # Input projections hoisted off the recurrence (independent of h).
    xp = [jnp.dot(traj_ref[:, t, :], wih, precision=_HI,
                  preferred_element_type=f32) + lstm_b for t in range(seq)]
    h = jnp.zeros((bs, hd), f32)
    c = jnp.zeros((bs, hd), f32)
    for t in range(seq):                                       # static unroll
        gates = xp[t] + jnp.dot(h, whh, precision=_HI,
                                preferred_element_type=f32)    # (bs, 128) = [i|f|g|o]
        sg = jax.nn.sigmoid(gates)     # one full-vreg pass covers i, f, o lanes
        tg = jnp.tanh(gates)           # one full-vreg pass covers g lanes
        i_g = sg[:, 0 * hd:1 * hd]
        f_g = sg[:, 1 * hd:2 * hd]
        g_g = tg[:, 2 * hd:3 * hd]
        o_g = sg[:, 3 * hd:4 * hd]
        c = f_g * c + i_g * g_g
        h = o_g * jnp.tanh(c)

    # ---- BatchNorm1d (batch stats), split per 32-feature half (no lane concat) ----
    gamma_h = gb_row[:, 0:TRAJ_DIM]
    gamma_c = gb_row[:, TRAJ_DIM:D]
    beta_h = gb_row[:, D:D + TRAJ_DIM]
    beta_c = gb_row[:, D + TRAJ_DIM:2 * D]

    def bn(x, gamma, beta):
        mean = jnp.mean(x, axis=0, keepdims=True)
        var = jnp.mean((x - mean) ** 2, axis=0, keepdims=True)
        return (x - mean) * lax.rsqrt(var + BN_EPS) * gamma + beta

    xn_h = bn(h, gamma_h, beta_h)
    xn_c = bn(cont, gamma_c, beta_c)

    # ---- folded head: (Linear o Linear) == single affine (no activation between) ----
    head = (jnp.dot(xn_h, w12_h, precision=_HI, preferred_element_type=f32)
            + jnp.dot(xn_c, w12_c, precision=_HI, preferred_element_type=f32)
            + b12)                                             # (bs, 128); lanes>=51 are 0

    # ---- softmax over confidence lanes via lane mask, exact normalization ----
    col = lax.broadcasted_iota(jnp.int32, head.shape, 1)
    conf_mask = (col >= NUM_PREDS) & (col < NUM_PREDS + NUM_MODES)
    logits = jnp.where(conf_mask, head, jnp.float32(-1e30))
    m = jnp.max(logits, axis=1, keepdims=True)
    e = jnp.exp(logits - m)                                    # 0 outside conf lanes
    conf = e / jnp.sum(e, axis=1, keepdims=True)
    out = jnp.where(conf_mask, conf, head)

    # ---- single lane-dense output: [pred | conf | pad | cont | pad] ----
    out_ref[...] = out
    out_ref[:, CONT_LANE0:CONT_LANE0 + CONT_DIM] = cont


def fused_generator_call(traj, img_flat_bf16, packed):
    bs = traj.shape[0]
    vmem = pl.BlockSpec(memory_space=pltpu.MemorySpace.VMEM)
    return pl.pallas_call(
        generator_kernel,
        out_shape=jax.ShapeDtypeStruct((bs, HEAD_PAD), jnp.float32),
        in_specs=[vmem, vmem, vmem, vmem],
        out_specs=vmem,
    )(traj, img_flat_bf16, packed["slab"], packed["cont_w"])


# --------------------------------------- forward ---------------------------------------
def generator_forward(image, traj, packed):
    bs = image.shape[0]
    img_flat = image.reshape(bs, -1).astype(jnp.bfloat16)       # NCHW flatten + bf16 cast
    out = fused_generator_call(traj, img_flat, packed)
    pred = out[:, :NUM_PREDS].reshape(bs, NUM_MODES, FUTURE_LEN, 2)
    confidences = out[:, NUM_PREDS:NUM_PREDS + NUM_MODES]
    cont_vector = out[:, CONT_LANE0:CONT_LANE0 + CONT_DIM]
    return pred, confidences, cont_vector


# ------------------------------- pure-JAX reference -------------------------------
def _dot(a, b):
    return jnp.dot(a, b, precision=lax.Precision.HIGHEST)


def generator_reference(image, traj, p):
    bs = image.shape[0]
    img_flat = image.reshape(bs, -1).astype(jnp.bfloat16).astype(jnp.float32)
    cont = jnp.maximum(_dot(img_flat, p["cont_w"].astype(jnp.float32)) + p["cont_b"], 0.0)

    hd = TRAJ_DIM
    h = jnp.zeros((bs, hd), jnp.float32)
    c = jnp.zeros((bs, hd), jnp.float32)
    for t in range(SEQ):
        g = _dot(traj[:, t, :], p["lstm_wih"]) + _dot(h, p["lstm_whh"]) + p["lstm_b"]
        i_g = jax.nn.sigmoid(g[:, :hd])
        f_g = jax.nn.sigmoid(g[:, hd:2 * hd])
        g_g = jnp.tanh(g[:, 2 * hd:3 * hd])
        o_g = jax.nn.sigmoid(g[:, 3 * hd:])
        c = f_g * c + i_g * g_g
        h = o_g * jnp.tanh(c)

    x = jnp.concatenate([h, cont], axis=1)
    mean = jnp.mean(x, axis=0, keepdims=True)
    var = jnp.mean((x - mean) ** 2, axis=0, keepdims=True)
    xn = (x - mean) / jnp.sqrt(var + BN_EPS) * p["bn_gamma"] + p["bn_beta"]
    h1 = _dot(xn, p["w1"]) + p["b1"]
    y = _dot(h1, p["w2"]) + p["b2"]
    pred = y[:, :NUM_PREDS].reshape(bs, NUM_MODES, FUTURE_LEN, 2)
    conf = jax.nn.softmax(y[:, NUM_PREDS:], axis=1)
    return pred, conf, cont


# ------------------------------- param construction -------------------------------
def make_params(key):
    ks = jax.random.split(key, 11)
    gh = 4 * TRAJ_DIM                       # 128: fused gate width, order [i | f | g | o]
    nw = NUM_PREDS + NUM_MODES              # 51
    return {
        "lstm_wih": 0.1 * jax.random.normal(ks[0], (V_DIM, gh), jnp.float32),
        "lstm_whh": 0.1 * jax.random.normal(ks[1], (TRAJ_DIM, gh), jnp.float32),
        "lstm_b":   0.1 * jax.random.normal(ks[2], (1, gh), jnp.float32),
        # bf16 for the only sizable weight (1024x32) -> halves its DMA; MXU accumulates f32.
        "cont_w":   (0.02 * jax.random.normal(ks[3], (C * H * W, CONT_DIM),
                                              jnp.float32)).astype(jnp.bfloat16),
        "cont_b":   0.02 * jax.random.normal(ks[4], (1, CONT_DIM), jnp.float32),
        "bn_gamma": 1.0 + 0.01 * jax.random.normal(ks[5], (1, D), jnp.float32),
        "bn_beta":  0.01 * jax.random.normal(ks[6], (1, D), jnp.float32),
        "w1":       0.05 * jax.random.normal(ks[7], (D, D), jnp.float32),
        "b1":       0.05 * jax.random.normal(ks[8], (1, D), jnp.float32),
        "w2":       0.05 * jax.random.normal(ks[9], (D, nw), jnp.float32),
        "b2":       0.05 * jax.random.normal(ks[10], (1, nw), jnp.float32),
    }


def pack_params(p):
    """Fold head Linears and pack all small f32 params into one (104,128) slab."""
    nw = NUM_PREDS + NUM_MODES
    pad = HEAD_PAD - nw
    w12 = jnp.pad(_dot(p["w1"], p["w2"]), ((0, 0), (0, pad)))             # (64, 128)
    b12 = jnp.pad(_dot(p["b1"], p["w2"]) + p["b2"], ((0, 0), (0, pad)))   # (1, 128)

    slab = jnp.zeros((SLAB_ROWS, HEAD_PAD), jnp.float32)
    slab = slab.at[ROW_WIH:ROW_WIH + V_DIM, :].set(p["lstm_wih"])
    slab = slab.at[ROW_LSTMB, :].set(p["lstm_b"][0])
    slab = slab.at[ROW_GB, 0:D].set(p["bn_gamma"][0])
    slab = slab.at[ROW_GB, D:2 * D].set(p["bn_beta"][0])
    slab = slab.at[ROW_CONTB, 0:CONT_DIM].set(p["cont_b"][0])
    slab = slab.at[ROW_B12, :].set(b12[0])
    slab = slab.at[ROW_WHH:ROW_WHH + TRAJ_DIM, :].set(p["lstm_whh"])
    slab = slab.at[ROW_W12H:ROW_W12H + TRAJ_DIM, :].set(w12[:TRAJ_DIM, :])
    slab = slab.at[ROW_W12C:ROW_W12C + CONT_DIM, :].set(w12[TRAJ_DIM:, :])
    return {"slab": slab, "cont_w": p["cont_w"]}


if __name__ == "__main__":
    key = jax.random.PRNGKey(0)
    k_img, k_traj, k_par = jax.random.split(key, 3)
    image = jax.random.normal(k_img, (BS, C, H, W), jnp.float32)   # NCHW, PyTorch-style
    traj = jax.random.normal(k_traj, (BS, SEQ, V_DIM), jnp.float32)
    params = make_params(k_par)
    packed = pack_params(params)                                   # done once, outside jit

    pred, confidences, cont_vector = jax.jit(generator_forward)(image, traj, packed)
    jax.block_until_ready((pred, confidences, cont_vector))

    assert pred.shape == (BS, NUM_MODES, FUTURE_LEN, 2)
    assert confidences.shape == (BS, NUM_MODES)
    assert cont_vector.shape == (BS, CONT_DIM)
    assert jnp.allclose(jnp.sum(confidences, axis=1), 1.0, atol=1e-3)

    # numerical sanity vs a pure-JAX reference (unfolded head, f32 HIGHEST)
    pred_r, conf_r, cont_r = generator_reference(image, traj, params)
    assert jnp.allclose(pred, pred_r, atol=2e-2, rtol=2e-2)
    assert jnp.allclose(confidences, conf_r, atol=5e-3)
    assert jnp.allclose(cont_vector, cont_r, atol=1e-2, rtol=1e-2)

    print("KERNEL_OK")
</pallas_src>

<mosaic_0001>
module attributes {stable_mosaic.version = 11 : i64} {
  func.func @generator_kernel(%arg0: memref<2x8x4xf32, #tpu.memory_space<vmem>>, %arg1: memref<2x1024xbf16, #tpu.memory_space<vmem>>, %arg2: memref<104x128xf32, #tpu.memory_space<vmem>>, %arg3: memref<1024x32xbf16, #tpu.memory_space<vmem>>, %arg4: memref<2x128xf32, #tpu.memory_space<vmem>>) attributes {dimension_semantics = [], scalar_prefetch = 0 : i64, scratch_operands = 0 : i64, tpu.core_type = #tpu.core_type<tc>} {
    %c0 = arith.constant 0 : index
    %c0_0 = arith.constant 0 : index
    %0 = vector.load %arg2[%c0, %c0_0] : memref<104x128xf32, #tpu.memory_space<vmem>>, vector<4x128xf32>
    %c4 = arith.constant 4 : index
    %c0_1 = arith.constant 0 : index
    %1 = vector.load %arg2[%c4, %c0_1] : memref<104x128xf32, #tpu.memory_space<vmem>>, vector<1x128xf32>
    %c5 = arith.constant 5 : index
    %c0_2 = arith.constant 0 : index
    %2 = vector.load %arg2[%c5, %c0_2] : memref<104x128xf32, #tpu.memory_space<vmem>>, vector<1x128xf32>
    %c6 = arith.constant 6 : index
    %c0_3 = arith.constant 0 : index
    %3 = vector.load %arg2[%c6, %c0_3] : memref<104x128xf32, #tpu.memory_space<vmem>>, vector<1x32xf32>
    %c7 = arith.constant 7 : index
    %c0_4 = arith.constant 0 : index
    %4 = vector.load %arg2[%c7, %c0_4] : memref<104x128xf32, #tpu.memory_space<vmem>>, vector<1x128xf32>
    %c8 = arith.constant 8 : index
    %c0_5 = arith.constant 0 : index
    %5 = vector.load %arg2[%c8, %c0_5] : memref<104x128xf32, #tpu.memory_space<vmem>>, vector<32x128xf32>
    %c40 = arith.constant 40 : index
    %c0_6 = arith.constant 0 : index
    %6 = vector.load %arg2[%c40, %c0_6] : memref<104x128xf32, #tpu.memory_space<vmem>>, vector<32x128xf32>
    %c72 = arith.constant 72 : index
    %c0_7 = arith.constant 0 : index
    %7 = vector.load %arg2[%c72, %c0_7] : memref<104x128xf32, #tpu.memory_space<vmem>>, vector<32x128xf32>
    %c0_8 = arith.constant 0 : index
    %c0_9 = arith.constant 0 : index
    %8 = vector.load %arg1[%c0_8, %c0_9] : memref<2x1024xbf16, #tpu.memory_space<vmem>>, vector<2x1024xbf16>
    %c0_10 = arith.constant 0 : index
    %c0_11 = arith.constant 0 : index
    %9 = vector.load %arg3[%c0_10, %c0_11] : memref<1024x32xbf16, #tpu.memory_space<vmem>>, vector<1024x32xbf16>
    %cst = arith.constant dense<0.000000e+00> : vector<2x32xf32>
    %10 = tpu.matmul %8, %9, %cst {dimension_numbers = #tpu.dot_dimension_numbers<[1], [0], [0], [1], [0, 0, 1, 1], [], []>} : vector<2x1024xbf16>, vector<1024x32xbf16>, vector<2x32xf32> -> vector<2x32xf32>
    %11 = vector.broadcast %3 : vector<1x32xf32> to vector<2x32xf32>
    %12 = arith.addf %10, %11 : vector<2x32xf32>
    %cst_12 = arith.constant 0.000000e+00 : f32
    %13 = vector.broadcast %cst_12 : f32 to vector<2x32xf32>
    %14 = arith.maximumf %12, %13 : vector<2x32xf32>
    %c0_13 = arith.constant 0 : index
    %c0_14 = arith.constant 0 : index
    %c0_15 = arith.constant 0 : index
    %15 = vector.load %arg0[%c0_13, %c0_14, %c0_15] : memref<2x8x4xf32, #tpu.memory_space<vmem>>, vector<2x1x4xf32>
    %16 = vector.shape_cast %15 : vector<2x1x4xf32> to vector<2x4xf32>
    %cst_16 = arith.constant dense<0.000000e+00> : vector<2x128xf32>
    %17 = tpu.matmul %16, %0, %cst_16 {dimension_numbers = #tpu.dot_dimension_numbers<[1], [0], [0], [1], [0, 0, 1, 1], [], []>, precision = #tpu.contract_precision<fp32>} : vector<2x4xf32>, vector<4x128xf32>, vector<2x128xf32> -> vector<2x128xf32>
    %18 = vector.broadcast %1 : vector<1x128xf32> to vector<2x128xf32>
    %19 = arith.addf %17, %18 : vector<2x128xf32>
    %c0_17 = arith.constant 0 : index
    %c1 = arith.constant 1 : index
    %c0_18 = arith.constant 0 : index
    %20 = vector.load %arg0[%c0_17, %c1, %c0_18] : memref<2x8x4xf32, #tpu.memory_space<vmem>>, vector<2x1x4xf32>
    %21 = vector.shape_cast %20 : vector<2x1x4xf32> to vector<2x4xf32>
    %cst_19 = arith.constant dense<0.000000e+00> : vector<2x128xf32>
    %22 = tpu.matmul %21, %0, %cst_19 {dimension_numbers = #tpu.dot_dimension_numbers<[1], [0], [0], [1], [0, 0, 1, 1], [], []>, precision = #tpu.contract_precision<fp32>} : vector<2x4xf32>, vector<4x128xf32>, vector<2x128xf32> -> vector<2x128xf32>
    %23 = vector.broadcast %1 : vector<1x128xf32> to vector<2x128xf32>
    %24 = arith.addf %22, %23 : vector<2x128xf32>
    %c0_20 = arith.constant 0 : index
    %c2 = arith.constant 2 : index
    %c0_21 = arith.constant 0 : index
    %25 = vector.load %arg0[%c0_20, %c2, %c0_21] : memref<2x8x4xf32, #tpu.memory_space<vmem>>, vector<2x1x4xf32>
    %26 = vector.shape_cast %25 : vector<2x1x4xf32> to vector<2x4xf32>
    %cst_22 = arith.constant dense<0.000000e+00> : vector<2x128xf32>
    %27 = tpu.matmul %26, %0, %cst_22 {dimension_numbers = #tpu.dot_dimension_numbers<[1], [0], [0], [1], [0, 0, 1, 1], [], []>, precision = #tpu.contract_precision<fp32>} : vector<2x4xf32>, vector<4x128xf32>, vector<2x128xf32> -> vector<2x128xf32>
    %28 = vector.broadcast %1 : vector<1x128xf32> to vector<2x128xf32>
    %29 = arith.addf %27, %28 : vector<2x128xf32>
    %c0_23 = arith.constant 0 : index
    %c3 = arith.constant 3 : index
    %c0_24 = arith.constant 0 : index
    %30 = vector.load %arg0[%c0_23, %c3, %c0_24] : memref<2x8x4xf32, #tpu.memory_space<vmem>>, vector<2x1x4xf32>
    %31 = vector.shape_cast %30 : vector<2x1x4xf32> to vector<2x4xf32>
    %cst_25 = arith.constant dense<0.000000e+00> : vector<2x128xf32>
    %32 = tpu.matmul %31, %0, %cst_25 {dimension_numbers = #tpu.dot_dimension_numbers<[1], [0], [0], [1], [0, 0, 1, 1], [], []>, precision = #tpu.contract_precision<fp32>} : vector<2x4xf32>, vector<4x128xf32>, vector<2x128xf32> -> vector<2x128xf32>
    %33 = vector.broadcast %1 : vector<1x128xf32> to vector<2x128xf32>
    %34 = arith.addf %32, %33 : vector<2x128xf32>
    %c0_26 = arith.constant 0 : index
    %c4_27 = arith.constant 4 : index
    %c0_28 = arith.constant 0 : index
    %35 = vector.load %arg0[%c0_26, %c4_27, %c0_28] : memref<2x8x4xf32, #tpu.memory_space<vmem>>, vector<2x1x4xf32>
    %36 = vector.shape_cast %35 : vector<2x1x4xf32> to vector<2x4xf32>
    %cst_29 = arith.constant dense<0.000000e+00> : vector<2x128xf32>
    %37 = tpu.matmul %36, %0, %cst_29 {dimension_numbers = #tpu.dot_dimension_numbers<[1], [0], [0], [1], [0, 0, 1, 1], [], []>, precision = #tpu.contract_precision<fp32>} : vector<2x4xf32>, vector<4x128xf32>, vector<2x128xf32> -> vector<2x128xf32>
    %38 = vector.broadcast %1 : vector<1x128xf32> to vector<2x128xf32>
    %39 = arith.addf %37, %38 : vector<2x128xf32>
    %c0_30 = arith.constant 0 : index
    %c5_31 = arith.constant 5 : index
    %c0_32 = arith.constant 0 : index
    %40 = vector.load %arg0[%c0_30, %c5_31, %c0_32] : memref<2x8x4xf32, #tpu.memory_space<vmem>>, vector<2x1x4xf32>
    %41 = vector.shape_cast %40 : vector<2x1x4xf32> to vector<2x4xf32>
    %cst_33 = arith.constant dense<0.000000e+00> : vector<2x128xf32>
    %42 = tpu.matmul %41, %0, %cst_33 {dimension_numbers = #tpu.dot_dimension_numbers<[1], [0], [0], [1], [0, 0, 1, 1], [], []>, precision = #tpu.contract_precision<fp32>} : vector<2x4xf32>, vector<4x128xf32>, vector<2x128xf32> -> vector<2x128xf32>
    %43 = vector.broadcast %1 : vector<1x128xf32> to vector<2x128xf32>
    %44 = arith.addf %42, %43 : vector<2x128xf32>
    %c0_34 = arith.constant 0 : index
    %c6_35 = arith.constant 6 : index
    %c0_36 = arith.constant 0 : index
    %45 = vector.load %arg0[%c0_34, %c6_35, %c0_36] : memref<2x8x4xf32, #tpu.memory_space<vmem>>, vector<2x1x4xf32>
    %46 = vector.shape_cast %45 : vector<2x1x4xf32> to vector<2x4xf32>
    %cst_37 = arith.constant dense<0.000000e+00> : vector<2x128xf32>
    %47 = tpu.matmul %46, %0, %cst_37 {dimension_numbers = #tpu.dot_dimension_numbers<[1], [0], [0], [1], [0, 0, 1, 1], [], []>, precision = #tpu.contract_precision<fp32>} : vector<2x4xf32>, vector<4x128xf32>, vector<2x128xf32> -> vector<2x128xf32>
    %48 = vector.broadcast %1 : vector<1x128xf32> to vector<2x128xf32>
    %49 = arith.addf %47, %48 : vector<2x128xf32>
    %c0_38 = arith.constant 0 : index
    %c7_39 = arith.constant 7 : index
    %c0_40 = arith.constant 0 : index
    %50 = vector.load %arg0[%c0_38, %c7_39, %c0_40] : memref<2x8x4xf32, #tpu.memory_space<vmem>>, vector<2x1x4xf32>
    %51 = vector.shape_cast %50 : vector<2x1x4xf32> to vector<2x4xf32>
    %cst_41 = arith.constant dense<0.000000e+00> : vector<2x128xf32>
    %52 = tpu.matmul %51, %0, %cst_41 {dimension_numbers = #tpu.dot_dimension_numbers<[1], [0], [0], [1], [0, 0, 1, 1], [], []>, precision = #tpu.contract_precision<fp32>} : vector<2x4xf32>, vector<4x128xf32>, vector<2x128xf32> -> vector<2x128xf32>
    %53 = vector.broadcast %1 : vector<1x128xf32> to vector<2x128xf32>
    %54 = arith.addf %52, %53 : vector<2x128xf32>
    %cst_42 = arith.constant 0.000000e+00 : f32
    %55 = vector.broadcast %cst_42 : f32 to vector<2x32xf32>
    %cst_43 = arith.constant 0.000000e+00 : f32
    %56 = vector.broadcast %cst_43 : f32 to vector<2x32xf32>
    %cst_44 = arith.constant dense<0.000000e+00> : vector<2x128xf32>
    %57 = tpu.matmul %55, %5, %cst_44 {dimension_numbers = #tpu.dot_dimension_numbers<[1], [0], [0], [1], [0, 0, 1, 1], [], []>, precision = #tpu.contract_precision<fp32>} : vector<2x32xf32>, vector<32x128xf32>, vector<2x128xf32> -> vector<2x128xf32>
    %58 = arith.addf %19, %57 : vector<2x128xf32>
    %59 = arith.negf %58 : vector<2x128xf32>
    %60 = math.exp %59 : vector<2x128xf32>
    %cst_45 = arith.constant 1.000000e+00 : f32
    %61 = vector.broadcast %cst_45 : f32 to vector<2x128xf32>
    %62 = arith.addf %61, %60 : vector<2x128xf32>
    %63 = arith.divf %61, %62 : vector<2x128xf32>
    %64 = math.tanh %58 : vector<2x128xf32>
    %65 = vector.extract_strided_slice %63 {offsets = [0, 0], sizes = [2, 32], strides = [1, 1]} : vector<2x128xf32> to vector<2x32xf32>
    %66 = vector.extract_strided_slice %63 {offsets = [0, 32], sizes = [2, 32], strides = [1, 1]} : vector<2x128xf32> to vector<2x32xf32>
    %67 = vector.extract_strided_slice %64 {offsets = [0, 64], sizes = [2, 32], strides = [1, 1]} : vector<2x128xf32> to vector<2x32xf32>
    %68 = vector.extract_strided_slice %63 {offsets = [0, 96], sizes = [2, 32], strides = [1, 1]} : vector<2x128xf32> to vector<2x32xf32>
    %69 = arith.mulf %66, %56 : vector<2x32xf32>
    %70 = arith.mulf %65, %67 : vector<2x32xf32>
    %71 = arith.addf %69, %70 : vector<2x32xf32>
    %72 = math.tanh %71 : vector<2x32xf32>
    %73 = arith.mulf %68, %72 : vector<2x32xf32>
    %cst_46 = arith.constant dense<0.000000e+00> : vector<2x128xf32>
    %74 = tpu.matmul %73, %5, %cst_46 {dimension_numbers = #tpu.dot_dimension_numbers<[1], [0], [0], [1], [0, 0, 1, 1], [], []>, precision = #tpu.contract_precision<fp32>} : vector<2x32xf32>, vector<32x128xf32>, vector<2x128xf32> -> vector<2x128xf32>
    %75 = arith.addf %24, %74 : vector<2x128xf32>
    %76 = arith.negf %75 : vector<2x128xf32>
    %77 = math.exp %76 : vector<2x128xf32>
    %cst_47 = arith.constant 1.000000e+00 : f32
    %78 = vector.broadcast %cst_47 : f32 to vector<2x128xf32>
    %79 = arith.addf %78, %77 : vector<2x128xf32>
    %80 = arith.divf %78, %79 : vector<2x128xf32>
    %81 = math.tanh %75 : vector<2x128xf32>
    %82 = vector.extract_strided_slice %80 {offsets = [0, 0], sizes = [2, 32], strides = [1, 1]} : vector<2x128xf32> to vector<2x32xf32>
    %83 = vector.extract_strided_slice %80 {offsets = [0, 32], sizes = [2, 32], strides = [1, 1]} : vector<2x128xf32> to vector<2x32xf32>
    %84 = vector.extract_strided_slice %81 {offsets = [0, 64], sizes = [2, 32], strides = [1, 1]} : vector<2x128xf32> to vector<2x32xf32>
    %85 = vector.extract_strided_slice %80 {offsets = [0, 96], sizes = [2, 32], strides = [1, 1]} : vector<2x128xf32> to vector<2x32xf32>
    %86 = arith.mulf %83, %71 : vector<2x32xf32>
    %87 = arith.mulf %82, %84 : vector<2x32xf32>
    %88 = arith.addf %86, %87 : vector<2x32xf32>
    %89 = math.tanh %88 : vector<2x32xf32>
    %90 = arith.mulf %85, %89 : vector<2x32xf32>
    %cst_48 = arith.constant dense<0.000000e+00> : vector<2x128xf32>
    %91 = tpu.matmul %90, %5, %cst_48 {dimension_numbers = #tpu.dot_dimension_numbers<[1], [0], [0], [1], [0, 0, 1, 1], [], []>, precision = #tpu.contract_precision<fp32>} : vector<2x32xf32>, vector<32x128xf32>, vector<2x128xf32> -> vector<2x128xf32>
    %92 = arith.addf %29, %91 : vector<2x128xf32>
    %93 = arith.negf %92 : vector<2x128xf32>
    %94 = math.exp %93 : vector<2x128xf32>
    %cst_49 = arith.constant 1.000000e+00 : f32
    %95 = vector.broadcast %cst_49 : f32 to vector<2x128xf32>
    %96 = arith.addf %95, %94 : vector<2x128xf32>
    %97 = arith.divf %95, %96 : vector<2x128xf32>
    %98 = math.tanh %92 : vector<2x128xf32>
    %99 = vector.extract_strided_slice %97 {offsets = [0, 0], sizes = [2, 32], strides = [1, 1]} : vector<2x128xf32> to vector<2x32xf32>
    %100 = vector.extract_strided_slice %97 {offsets = [0, 32], sizes = [2, 32], strides = [1, 1]} : vector<2x128xf32> to vector<2x32xf32>
    %101 = vector.extract_strided_slice %98 {offsets = [0, 64], sizes = [2, 32], strides = [1, 1]} : vector<2x128xf32> to vector<2x32xf32>
    %102 = vector.extract_strided_slice %97 {offsets = [0, 96], sizes = [2, 32], strides = [1, 1]} : vector<2x128xf32> to vector<2x32xf32>
    %103 = arith.mulf %100, %88 : vector<2x32xf32>
    %104 = arith.mulf %99, %101 : vector<2x32xf32>
    %105 = arith.addf %103, %104 : vector<2x32xf32>
    %106 = math.tanh %105 : vector<2x32xf32>
    %107 = arith.mulf %102, %106 : vector<2x32xf32>
    %cst_50 = arith.constant dense<0.000000e+00> : vector<2x128xf32>
    %108 = tpu.matmul %107, %5, %cst_50 {dimension_numbers = #tpu.dot_dimension_numbers<[1], [0], [0], [1], [0, 0, 1, 1], [], []>, precision = #tpu.contract_precision<fp32>} : vector<2x32xf32>, vector<32x128xf32>, vector<2x128xf32> -> vector<2x128xf32>
    %109 = arith.addf %34, %108 : vector<2x128xf32>
    %110 = arith.negf %109 : vector<2x128xf32>
    %111 = math.exp %110 : vector<2x128xf32>
    %cst_51 = arith.constant 1.000000e+00 : f32
    %112 = vector.broadcast %cst_51 : f32 to vector<2x128xf32>
    %113 = arith.addf %112, %111 : vector<2x128xf32>
    %114 = arith.divf %112, %113 : vector<2x128xf32>
    %115 = math.tanh %109 : vector<2x128xf32>
    %116 = vector.extract_strided_slice %114 {offsets = [0, 0], sizes = [2, 32], strides = [1, 1]} : vector<2x128xf32> to vector<2x32xf32>
    %117 = vector.extract_strided_slice %114 {offsets = [0, 32], sizes = [2, 32], strides = [1, 1]} : vector<2x128xf32> to vector<2x32xf32>
    %118 = vector.extract_strided_slice %115 {offsets = [0, 64], sizes = [2, 32], strides = [1, 1]} : vector<2x128xf32> to vector<2x32xf32>
    %119 = vector.extract_strided_slice %114 {offsets = [0, 96], sizes = [2, 32], strides = [1, 1]} : vector<2x128xf32> to vector<2x32xf32>
    %120 = arith.mulf %117, %105 : vector<2x32xf32>
    %121 = arith.mulf %116, %118 : vector<2x32xf32>
    %122 = arith.addf %120, %121 : vector<2x32xf32>
    %123 = math.tanh %122 : vector<2x32xf32>
    %124 = arith.mulf %119, %123 : vector<2x32xf32>
    %cst_52 = arith.constant dense<0.000000e+00> : vector<2x128xf32>
    %125 = tpu.matmul %124, %5, %cst_52 {dimension_numbers = #tpu.dot_dimension_numbers<[1], [0], [0], [1], [0, 0, 1, 1], [], []>, precision = #tpu.contract_precision<fp32>} : vector<2x32xf32>, vector<32x128xf32>, vector<2x128xf32> -> vector<2x128xf32>
    %126 = arith.addf %39, %125 : vector<2x128xf32>
    %127 = arith.negf %126 : vector<2x128xf32>
    %128 = math.exp %127 : vector<2x128xf32>
    %cst_53 = arith.constant 1.000000e+00 : f32
    %129 = vector.broadcast %cst_53 : f32 to vector<2x128xf32>
    %130 = arith.addf %129, %128 : vector<2x128xf32>
    %131 = arith.divf %129, %130 : vector<2x128xf32>
    %132 = math.tanh %126 : vector<2x128xf32>
    %133 = vector.extract_strided_slice %131 {offsets = [0, 0], sizes = [2, 32], strides = [1, 1]} : vector<2x128xf32> to vector<2x32xf32>
    %134 = vector.extract_strided_slice %131 {offsets = [0, 32], sizes = [2, 32], strides = [1, 1]} : vector<2x128xf32> to vector<2x32xf32>
    %135 = vector.extract_strided_slice %132 {offsets = [0, 64], sizes = [2, 32], strides = [1, 1]} : vector<2x128xf32> to vector<2x32xf32>
    %136 = vector.extract_strided_slice %131 {offsets = [0, 96], sizes = [2, 32], strides = [1, 1]} : vector<2x128xf32> to vector<2x32xf32>
    %137 = arith.mulf %134, %122 : vector<2x32xf32>
    %138 = arith.mulf %133, %135 : vector<2x32xf32>
    %139 = arith.addf %137, %138 : vector<2x32xf32>
    %140 = math.tanh %139 : vector<2x32xf32>
    %141 = arith.mulf %136, %140 : vector<2x32xf32>
    %cst_54 = arith.constant dense<0.000000e+00> : vector<2x128xf32>
    %142 = tpu.matmul %141, %5, %cst_54 {dimension_numbers = #tpu.dot_dimension_numbers<[1], [0], [0], [1], [0, 0, 1, 1], [], []>, precision = #tpu.contract_precision<fp32>} : vector<2x32xf32>, vector<32x128xf32>, vector<2x128xf32> -> vector<2x128xf32>
    %143 = arith.addf %44, %142 : vector<2x128xf32>
    %144 = arith.negf %143 : vector<2x128xf32>
    %145 = math.exp %144 : vector<2x128xf32>
    %cst_55 = arith.constant 1.000000e+00 : f32
    %146 = vector.broadcast %cst_55 : f32 to vector<2x128xf32>
    %147 = arith.addf %146, %145 : vector<2x128xf32>
    %148 = arith.divf %146, %147 : vector<2x128xf32>
    %149 = math.tanh %143 : vector<2x128xf32>
    %150 = vector.extract_strided_slice %148 {offsets = [0, 0], sizes = [2, 32], strides = [1, 1]} : vector<2x128xf32> to vector<2x32xf32>
    %151 = vector.extract_strided_slice %148 {offsets = [0, 32], sizes = [2, 32], strides = [1, 1]} : vector<2x128xf32> to vector<2x32xf32>
    %152 = vector.extract_strided_slice %149 {offsets = [0, 64], sizes = [2, 32], strides = [1, 1]} : vector<2x128xf32> to vector<2x32xf32>
    %153 = vector.extract_strided_slice %148 {offsets = [0, 96], sizes = [2, 32], strides = [1, 1]} : vector<2x128xf32> to vector<2x32xf32>
    %154 = arith.mulf %151, %139 : vector<2x32xf32>
    %155 = arith.mulf %150, %152 : vector<2x32xf32>
    %156 = arith.addf %154, %155 : vector<2x32xf32>
    %157 = math.tanh %156 : vector<2x32xf32>
    %158 = arith.mulf %153, %157 : vector<2x32xf32>
    %cst_56 = arith.constant dense<0.000000e+00> : vector<2x128xf32>
    %159 = tpu.matmul %158, %5, %cst_56 {dimension_numbers = #tpu.dot_dimension_numbers<[1], [0], [0], [1], [0, 0, 1, 1], [], []>, precision = #tpu.contract_precision<fp32>} : vector<2x32xf32>, vector<32x128xf32>, vector<2x128xf32> -> vector<2x128xf32>
    %160 = arith.addf %49, %159 : vector<2x128xf32>
    %161 = arith.negf %160 : vector<2x128xf32>
    %162 = math.exp %161 : vector<2x128xf32>
    %cst_57 = arith.constant 1.000000e+00 : f32
    %163 = vector.broadcast %cst_57 : f32 to vector<2x128xf32>
    %164 = arith.addf %163, %162 : vector<2x128xf32>
    %165 = arith.divf %163, %164 : vector<2x128xf32>
    %166 = math.tanh %160 : vector<2x128xf32>
    %167 = vector.extract_strided_slice %165 {offsets = [0, 0], sizes = [2, 32], strides = [1, 1]} : vector<2x128xf32> to vector<2x32xf32>
    %168 = vector.extract_strided_slice %165 {offsets = [0, 32], sizes = [2, 32], strides = [1, 1]} : vector<2x128xf32> to vector<2x32xf32>
    %169 = vector.extract_strided_slice %166 {offsets = [0, 64], sizes = [2, 32], strides = [1, 1]} : vector<2x128xf32> to vector<2x32xf32>
    %170 = vector.extract_strided_slice %165 {offsets = [0, 96], sizes = [2, 32], strides = [1, 1]} : vector<2x128xf32> to vector<2x32xf32>
    %171 = arith.mulf %168, %156 : vector<2x32xf32>
    %172 = arith.mulf %167, %169 : vector<2x32xf32>
    %173 = arith.addf %171, %172 : vector<2x32xf32>
    %174 = math.tanh %173 : vector<2x32xf32>
    %175 = arith.mulf %170, %174 : vector<2x32xf32>
    %cst_58 = arith.constant dense<0.000000e+00> : vector<2x128xf32>
    %176 = tpu.matmul %175, %5, %cst_58 {dimension_numbers = #tpu.dot_dimension_numbers<[1], [0], [0], [1], [0, 0, 1, 1], [], []>, precision = #tpu.contract_precision<fp32>} : vector<2x32xf32>, vector<32x128xf32>, vector<2x128xf32> -> vector<2x128xf32>
    %177 = arith.addf %54, %176 : vector<2x128xf32>
    %178 = arith.negf %177 : vector<2x128xf32>
    %179 = math.exp %178 : vector<2x128xf32>
    %cst_59 = arith.constant 1.000000e+00 : f32
    %180 = vector.broadcast %cst_59 : f32 to vector<2x128xf32>
    %181 = arith.addf %180, %179 : vector<2x128xf32>
    %182 = arith.divf %180, %181 : vector<2x128xf32>
    %183 = math.tanh %177 : vector<2x128xf32>
    %184 = vector.extract_strided_slice %182 {offsets = [0, 0], sizes = [2, 32], strides = [1, 1]} : vector<2x128xf32> to vector<2x32xf32>
    %185 = vector.extract_strided_slice %182 {offsets = [0, 32], sizes = [2, 32], strides = [1, 1]} : vector<2x128xf32> to vector<2x32xf32>
    %186 = vector.extract_strided_slice %183 {offsets = [0, 64], sizes = [2, 32], strides = [1, 1]} : vector<2x128xf32> to vector<2x32xf32>
    %187 = vector.extract_strided_slice %182 {offsets = [0, 96], sizes = [2, 32], strides = [1, 1]} : vector<2x128xf32> to vector<2x32xf32>
    %188 = arith.mulf %185, %173 : vector<2x32xf32>
    %189 = arith.mulf %184, %186 : vector<2x32xf32>
    %190 = arith.addf %188, %189 : vector<2x32xf32>
    %191 = math.tanh %190 : vector<2x32xf32>
    %192 = arith.mulf %187, %191 : vector<2x32xf32>
    %193 = vector.extract_strided_slice %2 {offsets = [0, 0], sizes = [1, 32], strides = [1, 1]} : vector<1x128xf32> to vector<1x32xf32>
    %194 = vector.extract_strided_slice %2 {offsets = [0, 32], sizes = [1, 32], strides = [1, 1]} : vector<1x128xf32> to vector<1x32xf32>
    %195 = vector.extract_strided_slice %2 {offsets = [0, 64], sizes = [1, 32], strides = [1, 1]} : vector<1x128xf32> to vector<1x32xf32>
    %196 = vector.extract_strided_slice %2 {offsets = [0, 96], sizes = [1, 32], strides = [1, 1]} : vector<1x128xf32> to vector<1x32xf32>
    %cst_60 = arith.constant dense<0.000000e+00> : vector<32xf32>
    %197 = vector.multi_reduction <add>, %192, %cst_60 [0] : vector<2x32xf32> to vector<32xf32>
    %198 = vector.shape_cast %197 : vector<32xf32> to vector<1x32xf32>
    %cst_61 = arith.constant 2.000000e+00 : f32
    %199 = vector.broadcast %cst_61 : f32 to vector<1x32xf32>
    %200 = arith.divf %198, %199 : vector<1x32xf32>
    %201 = vector.broadcast %200 : vector<1x32xf32> to vector<2x32xf32>
    %202 = arith.subf %192, %201 : vector<2x32xf32>
    %203 = arith.mulf %202, %202 : vector<2x32xf32>
    %cst_62 = arith.constant dense<0.000000e+00> : vector<32xf32>
    %204 = vector.multi_reduction <add>, %203, %cst_62 [0] : vector<2x32xf32> to vector<32xf32>
    %205 = vector.shape_cast %204 : vector<32xf32> to vector<1x32xf32>
    %cst_63 = arith.constant 2.000000e+00 : f32
    %206 = vector.broadcast %cst_63 : f32 to vector<1x32xf32>
    %207 = arith.divf %205, %206 : vector<1x32xf32>
    %208 = vector.broadcast %200 : vector<1x32xf32> to vector<2x32xf32>
    %209 = arith.subf %192, %208 : vector<2x32xf32>
    %cst_64 = arith.constant 9.99999974E-6 : f32
    %210 = vector.broadcast %cst_64 : f32 to vector<1x32xf32>
    %211 = arith.addf %207, %210 : vector<1x32xf32>
    %212 = math.rsqrt %211 : vector<1x32xf32>
    %213 = vector.broadcast %212 : vector<1x32xf32> to vector<2x32xf32>
    %214 = arith.mulf %209, %213 : vector<2x32xf32>
    %215 = vector.broadcast %193 : vector<1x32xf32> to vector<2x32xf32>
    %216 = arith.mulf %214, %215 : vector<2x32xf32>
    %217 = vector.broadcast %195 : vector<1x32xf32> to vector<2x32xf32>
    %218 = arith.addf %216, %217 : vector<2x32xf32>
    %cst_65 = arith.constant dense<0.000000e+00> : vector<32xf32>
    %219 = vector.multi_reduction <add>, %14, %cst_65 [0] : vector<2x32xf32> to vector<32xf32>
    %220 = vector.shape_cast %219 : vector<32xf32> to vector<1x32xf32>
    %cst_66 = arith.constant 2.000000e+00 : f32
    %221 = vector.broadcast %cst_66 : f32 to vector<1x32xf32>
    %222 = arith.divf %220, %221 : vector<1x32xf32>
    %223 = vector.broadcast %222 : vector<1x32xf32> to vector<2x32xf32>
    %224 = arith.subf %14, %223 : vector<2x32xf32>
    %225 = arith.mulf %224, %224 : vector<2x32xf32>
    %cst_67 = arith.constant dense<0.000000e+00> : vector<32xf32>
    %226 = vector.multi_reduction <add>, %225, %cst_67 [0] : vector<2x32xf32> to vector<32xf32>
    %227 = vector.shape_cast %226 : vector<32xf32> to vector<1x32xf32>
    %cst_68 = arith.constant 2.000000e+00 : f32
    %228 = vector.broadcast %cst_68 : f32 to vector<1x32xf32>
    %229 = arith.divf %227, %228 : vector<1x32xf32>
    %230 = vector.broadcast %222 : vector<1x32xf32> to vector<2x32xf32>
    %231 = arith.subf %14, %230 : vector<2x32xf32>
    %cst_69 = arith.constant 9.99999974E-6 : f32
    %232 = vector.broadcast %cst_69 : f32 to vector<1x32xf32>
    %233 = arith.addf %229, %232 : vector<1x32xf32>
    %234 = math.rsqrt %233 : vector<1x32xf32>
    %235 = vector.broadcast %234 : vector<1x32xf32> to vector<2x32xf32>
    %236 = arith.mulf %231, %235 : vector<2x32xf32>
    %237 = vector.broadcast %194 : vector<1x32xf32> to vector<2x32xf32>
    %238 = arith.mulf %236, %237 : vector<2x32xf32>
    %239 = vector.broadcast %196 : vector<1x32xf32> to vector<2x32xf32>
    %240 = arith.addf %238, %239 : vector<2x32xf32>
    %cst_70 = arith.constant dense<0.000000e+00> : vector<2x128xf32>
    %241 = tpu.matmul %218, %6, %cst_70 {dimension_numbers = #tpu.dot_dimension_numbers<[1], [0], [0], [1], [0, 0, 1, 1], [], []>, precision = #tpu.contract_precision<fp32>} : vector<2x32xf32>, vector<32x128xf32>, vector<2x128xf32> -> vector<2x128xf32>
    %cst_71 = arith.constant dense<0.000000e+00> : vector<2x128xf32>
    %242 = tpu.matmul %240, %7, %cst_71 {dimension_numbers = #tpu.dot_dimension_numbers<[1], [0], [0], [1], [0, 0, 1, 1], [], []>, precision = #tpu.contract_precision<fp32>} : vector<2x32xf32>, vector<32x128xf32>, vector<2x128xf32> -> vector<2x128xf32>
    %243 = arith.addf %241, %242 : vector<2x128xf32>
    %244 = vector.broadcast %4 : vector<1x128xf32> to vector<2x128xf32>
    %245 = arith.addf %243, %244 : vector<2x128xf32>
    %246 = tpu.iota {dimensions = array<i32: 1>} : vector<2x128xi32>
    %c48_i32 = arith.constant 48 : i32
    %247 = vector.broadcast %c48_i32 : i32 to vector<2x128xi32>
    %248 = arith.cmpi sge, %246, %247 : vector<2x128xi32>
    %c51_i32 = arith.constant 51 : i32
    %249 = vector.broadcast %c51_i32 : i32 to vector<2x128xi32>
    %250 = arith.cmpi slt, %246, %249 : vector<2x128xi32>
    %251 = arith.andi %248, %250 : vector<2x128xi1>
    %cst_72 = arith.constant -1.000000e+30 : f32
    %252 = vector.broadcast %cst_72 : f32 to vector<2x128xf32>
    %253 = arith.select %251, %245, %252 : vector<2x128xi1>, vector<2x128xf32>
    %cst_73 = arith.constant dense<0xFF800000> : vector<2xf32>
    %254 = vector.multi_reduction <maximumf>, %253, %cst_73 [1] : vector<2x128xf32> to vector<2xf32>
    %255 = vector.shape_cast %254 : vector<2xf32> to vector<2x1xf32>
    %256 = vector.broadcast %255 : vector<2x1xf32> to vector<2x128xf32>
    %257 = arith.subf %253, %256 : vector<2x128xf32>
    %258 = math.exp %257 : vector<2x128xf32>
    %cst_74 = arith.constant dense<0.000000e+00> : vector<2xf32>
    %259 = vector.multi_reduction <add>, %258, %cst_74 [1] : vector<2x128xf32> to vector<2xf32>
    %260 = vector.shape_cast %259 : vector<2xf32> to vector<2x1xf32>
    %261 = vector.broadcast %260 : vector<2x1xf32> to vector<2x128xf32>
    %262 = arith.divf %258, %261 : vector<2x128xf32>
    %263 = arith.select %251, %262, %245 : vector<2x128xi1>, vector<2x128xf32>
    %c0_75 = arith.constant 0 : index
    %c0_76 = arith.constant 0 : index
    %264 = vector.load %arg4[%c0_75, %c0_76] : memref<2x128xf32, #tpu.memory_space<vmem>>, vector<2x128xf32>
    tpu.vector_store %arg4[%c0_75, %c0_76], %263 {strides = array<i32>} : memref<2x128xf32, #tpu.memory_space<vmem>>, vector<2x128xf32>,
    %c0_77 = arith.constant 0 : index
    %c64 = arith.constant 64 : index
    %265 = vector.load %arg4[%c0_77, %c64] : memref<2x128xf32, #tpu.memory_space<vmem>>, vector<2x32xf32>
    tpu.vector_store %arg4[%c0_77, %c64], %14 {strides = array<i32>} : memref<2x128xf32, #tpu.memory_space<vmem>>, vector<2x32xf32>,
    return
  }
}

</mosaic_0001>

<bundles_post_ra>
// kernel: generator_forward.1
= control target key start
LH: loop header
LB: loop body
LE: loop exit
PB: predicated region body
PF: predicated region fallthrough
CT: control target
= control target key end

     0   :  { %v11208_v22 = vmov 1966171168   ;;  %v173_v24 = vlaneseq  ;;  %vm785_vm0 = vcmask 1043456   ;;  %vm780_vm1 = vcmask 1041409   ;;  %s11211_s28 = smov 64   ;;  %s11212_s29 = smov 32   ;;  %s12688_s3 = inlined_call_operand.vmem [shape: bf16[1024,32], index: 3, kind: input, shape index: {}]   ;;  %s12689_s1 = inlined_call_operand.vmem [shape: bf16[2,1024], index: 1, kind: input, shape index: {}]   ;;  %s12690_s2 = inlined_call_operand.vmem [shape: f32[104,128], index: 2, kind: input, shape index: {}]   ;;  %s12691_s0 = inlined_call_operand.vmem [shape: f32[2,8,4], index: 0, kind: input, shape index: {}]   ;;  %s12692_s4 = inlined_call_operand.vmem [shape: f32[2,128], index: 4, kind: output, shape index: {}]  }
   0x1   :  { %v11071_v0 = vld [vmem:[%s12688_s3 + $0x78] sm:$0xff]   ;;  %v11075_v4 = vld [vmem:[%s12688_s3 + $0x70] sm:$0xff]   ;;  %v11079_v8 = vld [vmem:[%s12688_s3 + $0x68] sm:$0xff]   ;;  %v171_v23 = vunpack.c.l.s4 %v11208_v22  ;;  %vm782_vm2 = vcmask 31744   ;;  %vm11210_vm3 = vmmov 0   ;;  %vm4413_vm4 = vcmask 261120  }
   0x2   :  { %v11072_v1 = vld [vmem:[%s12688_s3 + $0xf8] sm:$0xff]   ;;  %9681 = vmatprep.subr.bf16.mxu0 %v11071_v0  ;;  %v11076_v5 = vld [vmem:[%s12688_s3 + $0xf0] sm:$0xff]   ;;  %v11080_v9 = vld [vmem:[%s12688_s3 + $0xe8] sm:$0xff]   ;;  %v174_v30 = vshrl.u32 %v173_v24, 7  ;;  %s11213_s6 = smov 96   ;;  %vm8568_vm5 = vcmask 254976  }
   0x3   :  { %v11073_v2 = vld [vmem:[%s12688_s3 + $0x38] sm:$0xff]   ;;  %9703 = vmatprep.subr.bf16.mxu1 %v11072_v1  ;;  %v11077_v6 = vld [vmem:[%s12688_s3 + $0x30] sm:$0xff]   ;;  %v11081_v10 = vld [vmem:[%s12688_s3 + $0x28] sm:$0xff]   ;;  %v172_v29 = vunpack.c.0.s8 %v171_v23  ;;  %vm8532_vm6 = vcmask 1042176   ;;  %vm9581_vm10 = vcmask 1041408   ;;  %vm9599_vm11 = vcmask 779776  }
   0x4   :  { %v11074_v3 = vld [vmem:[%s12688_s3 + $0xb8] sm:$0xff]   ;;  %9682 = vmatpush3.bf16.msra.mxu0 %v11073_v2  ;;  %v11078_v7 = vld [vmem:[%s12688_s3 + $0xb0] sm:$0xff]   ;;  %v11082_v11 = vld [vmem:[%s12688_s3 + $0xa8] sm:$0xff]  }
   0x5   :  { %9704 = vmatpush3.bf16.msra.mxu1 %v11074_v3  ;;  %9683 = vmatprep.subr.bf16.mxu0 %v11075_v4  ;;  %v11083_v12 = vld [vmem:[%s12688_s3 + $0x60] sm:$0xff]   ;;  %v11087_v16 = vld [vmem:[%s12688_s3 + $0x58] sm:$0xff]   ;;  %v11091_v20 = vld [vmem:[%s12688_s3 + $0x50] sm:$0xff]   ;;  %v11330_v35 = vsub.s32 %v172_v29, %v174_v30 }
   0x6   :  { %9705 = vmatprep.subr.bf16.mxu1 %v11076_v5  ;;  %v11084_v13 = vld [vmem:[%s12688_s3 + $0xe0] sm:$0xff]   ;;  %v11088_v17 = vld [vmem:[%s12688_s3 + $0xd8] sm:$0xff]   ;;  %v11092_v21 = vld [vmem:[%s12688_s3 + $0xd0] sm:$0xff]  }
   0x7   :  { %v11085_v14 = vld [vmem:[%s12688_s3 + $0x20] sm:$0xff]   ;;  %v11089_v18 = vld [vmem:[%s12688_s3 + $0x18] sm:$0xff]   ;;  %v11093_v25 = vld [vmem:[%s12688_s3 + $0x10] sm:$0xff]  }
   0x8   :  { %9684 = vmatpush3.bf16.msra.mxu0 %v11077_v6  ;;  %v11086_v15 = vld [vmem:[%s12688_s3 + $0xa0] sm:$0xff]   ;;  %v11090_v19 = vld [vmem:[%s12688_s3 + $0x98] sm:$0xff]   ;;  %v11094_v26 = vld [vmem:[%s12688_s3 + $0x90] sm:$0xff]  }
   0x9   :  { %9706 = vmatpush3.bf16.msra.mxu1 %v11078_v7  ;;  %9685 = vmatprep.subr.bf16.mxu0 %v11079_v8  ;;  %v11095_v27 = vld [vmem:[%s12688_s3 + $0x48] sm:$0xff]   ;;  %v11099_v33 = vld [vmem:[%s12688_s3 + $0x40] sm:$0xff]   ;;  %v11104_v41 = vld [vmem:[%s12688_s3 + $0x178] sm:$0xff]  }
   0xa   :  { %9707 = vmatprep.subr.bf16.mxu1 %v11080_v9  ;;  %v11096_v28 = vld [vmem:[%s12688_s3 + $0xc8] sm:$0xff]   ;;  %v11100_v34 = vld [vmem:[%s12688_s3 + $0xc0] sm:$0xff]   ;;  %v11105_v42 = vld [vmem:[%s12688_s3 + $0x1f8] sm:$0xff]  }
   0xb   :  { %v11097_v31 = vld [vmem:[%s12688_s3 + $0x8] sm:$0xff]   ;;  %v11101_v36 = vld [vmem:[%s12688_s3] sm:$0xff]   ;;  %v11106_v47 = vld [vmem:[%s12688_s3 + $0x138] sm:$0xff]  }
   0xc   :  { %9686 = vmatpush3.bf16.msra.mxu0 %v11081_v10  ;;  %v11098_v32 = vld [vmem:[%s12688_s3 + $0x88] sm:$0xff]   ;;  %v11102_v37 = vld [vmem:[%s12688_s3 + $0x80] sm:$0xff]   ;;  %v11108_v50 = vld [vmem:[%s12688_s3 + $0x170] sm:$0xff]  }
   0xd   :  { %9708 = vmatpush3.bf16.msra.mxu1 %v11082_v11  ;;  %9687 = vmatprep.subr.bf16.mxu0 %v11083_v12  ;;  %v35_v38 = vld [vmem:[%s12689_s1] sm:$0xff]  ;;  %v11107_v52 = vld [vmem:[%s12688_s3 + $0x1b8] sm:$0xff]   ;;  %v11109_v54 = vld [vmem:[%s12688_s3 + $0x1f0] sm:$0xff]  }
   0xe   :  { %9709 = vmatprep.subr.bf16.mxu1 %v11084_v13  ;;  %v169_v39 = vcombine.high %v35_v38, %v35_v38  ;;  %v176_v40 = vrot.slane %v35_v38, %v11330_v35  ;;  %v11110_v55 = vld [vmem:[%s12688_s3 + $0x130] sm:$0xff]   ;;  %v11112_v57 = vld [vmem:[%s12688_s3 + $0x168] sm:$0xff]   ;;  %v11116_v61 = vld [vmem:[%s12688_s3 + $0x160] sm:$0xff]  }
   0xf   :  { %v11111_v58 = vld [vmem:[%s12688_s3 + $0x1b0] sm:$0xff]   ;;  %v11113_v59 = vld [vmem:[%s12688_s3 + $0x1e8] sm:$0xff]   ;;  %v11117_v63 = vld [vmem:[%s12688_s3 + $0x1e0] sm:$0xff]  }
  0x10   :  { %9688 = vmatpush3.bf16.msra.mxu0 %v11085_v14  ;;  %v184_v43 = vcombine.high %v176_v40, %v176_v40  ;;  %v192_v44 = vrot.slane %v176_v40, %v11330_v35  ;;  %v11350_v45 = vrot.slane %v169_v39, %v11330_v35  ;;  %v11114_v60 = vld [vmem:[%s12688_s3 + $0x128] sm:$0xff]   ;;  %v11118_v0 = vld [vmem:[%s12688_s3 + $0x120] sm:$0xff]   ;;  %v11120_v1 = vld [vmem:[%s12688_s3 + $0x158] sm:$0xff]  }
  0x11   :  { %9710 = vmatpush3.bf16.msra.mxu1 %v11086_v15  ;;  %9689 = vmatprep.subr.bf16.mxu0 %v11087_v16  ;;  %v11115_v62 = vld [vmem:[%s12688_s3 + $0x1a8] sm:$0xff]   ;;  %v11119_v2 = vld [vmem:[%s12688_s3 + $0x1a0] sm:$0xff]   ;;  %v11121_v3 = vld [vmem:[%s12688_s3 + $0x1d8] sm:$0xff]  }
  0x12   :  { %9711 = vmatprep.subr.bf16.mxu1 %v11088_v17  ;;  %v206_v46 = vrot.slane %v184_v43, %v11330_v35  ;;  %v185_v48 = vcombine.high %v11350_v45, %v11350_v45  ;;  %v214_v49 = vcombine.high %v192_v44, %v192_v44  ;;  %v11122_v4 = vld [vmem:[%s12688_s3 + $0x118] sm:$0xff]   ;;  %v11124_v5 = vld [vmem:[%s12688_s3 + $0x150] sm:$0xff]   ;;  %v11128_v9 = vld [vmem:[%s12688_s3 + $0x148] sm:$0xff]  }
  0x13   :  { %v11123_v6 = vld [vmem:[%s12688_s3 + $0x198] sm:$0xff]   ;;  %v11125_v7 = vld [vmem:[%s12688_s3 + $0x1d0] sm:$0xff]   ;;  %v11129_v11 = vld [vmem:[%s12688_s3 + $0x1c8] sm:$0xff]  }
  0x14   :  { %9690 = vmatpush3.bf16.msra.mxu0 %v11089_v18  ;;  %642 = vmatprep.mubr.bf16.mxu0 %v206_v46  ;;  %v216_v51 = vcombine.high %v206_v46, %v206_v46  ;;  %v213_v53 = vrot.slane %v185_v48, %v11330_v35  ;;  %v11126_v8 = vld [vmem:[%s12688_s3 + $0x110] sm:$0xff]   ;;  %v11130_v12 = vld [vmem:[%s12688_s3 + $0x108] sm:$0xff]   ;;  %v11132_v13 = vld [vmem:[%s12688_s3 + $0x140] sm:$0xff]  }
  0x15   :  { %9712 = vmatpush3.bf16.msra.mxu1 %v11090_v19  ;;  %9691 = vmatprep.subr.bf16.mxu0 %v11091_v20  ;;  %v11127_v10 = vld [vmem:[%s12688_s3 + $0x190] sm:$0xff]   ;;  %v11131_v14 = vld [vmem:[%s12688_s3 + $0x188] sm:$0xff]   ;;  %v11133_v15 = vld [vmem:[%s12688_s3 + $0x1c0] sm:$0xff]  }
  0x16   :  { %9713 = vmatprep.subr.bf16.mxu1 %v11092_v21  ;;  %682 = vmatprep.mubr.bf16.mxu1 %v216_v51  ;;  %v217_v56 = vcombine.high %v213_v53, %v213_v53  ;;  %v18_v16 = vld [vmem:[%s12690_s2] sm:$0xf]  ;;  %v772_v20 = vld [vmem:[%s12691_s0 + $0x8] sm:$0x1]  ;;  %v199_v21 = vrot.slane %v11350_v45, %v11330_v35  ;;  %v1690_v38 = vld [vmem:[%s12691_s0 + $0xa] sm:$0x1] }
  0x17   :  { %v11134_v17 = vld [vmem:[%s12688_s3 + $0x100] sm:$0xff]   ;;  %v787_v18 = vsel %vm785_vm0, %v18_v16, 0  ;;  %v779_v23 = vrot.slane %v772_v20, 7  ;;  %v1693_v45 = vrot.slane %v1690_v38, 7  ;;  %v3960_v48 = vld [vmem:[%s12691_s0 + $0xf] sm:$0x1] }
  0x18   :  { %9692 = vmatpush3.bf16.msra.mxu0 %v11093_v25  ;;  %v771_v19 = vld [vmem:[%s12691_s0] sm:$0x1]  ;;  %v11454_v22 = vand.u32 4294901760, %v787_v18  ;;  %v1235_v25 = vld [vmem:[%s12691_s0 + $0x1] sm:$0x1] }
  0x19   :  { %9714 = vmatpush3.bf16.msra.mxu1 %v11094_v26  ;;  %9693 = vmatprep.subr.bf16.mxu0 %v11095_v27  ;;  %v1236_v26 = vld [vmem:[%s12691_s0 + $0x9] sm:$0x1]  ;;  %v11135_v27 = vld [vmem:[%s12688_s3 + $0x180] sm:$0xff]   ;;  %v781_v30 = vsel %vm780_vm1, %v779_v23, %v771_v19 }
  0x1a   :  { %9715 = vmatprep.subr.bf16.mxu1 %v11096_v28  ;;  %v1239_v28 = vrot.slane %v1236_v26, 7  ;;  %v11466_v29 = vsub.f32 %v787_v18, %v11454_v22  ;;  %v1689_v46 = vld [vmem:[%s12691_s0 + $0x2] sm:$0x1]  ;;  %v3052_v18 = vld [vmem:[%s12691_s0 + $0xd] sm:$0x1] }
  0x1b   :  { %v3051_v23 = vld [vmem:[%s12691_s0 + $0x5] sm:$0x1] }
  0x1c   :  { %9694 = vmatpush3.bf16.msra.mxu0 %v11097_v31  ;;  %v783_v31 = vsel %vm782_vm2, %v781_v30, 0  ;;  %v11473_v35 = vand.u32 4294901760, %v11466_v29 }
  0x1d   :  { %9716 = vmatpush3.bf16.msra.mxu1 %v11098_v32  ;;  %9695 = vmatprep.subr.bf16.mxu0 %v11099_v33  ;;  %v1240_v32 = vsel %vm780_vm1, %v1239_v28, %v1235_v25  ;;  %v215_v33 = vcombine.high %v199_v21, %v199_v21 }
  0x1e   :  { %9717 = vmatprep.subr.bf16.mxu1 %v11100_v34  ;;  %v11209_v34 = vmov 0.0   ;;  %v899_v39 = vsub.f32 %v11466_v29, %v11473_v35 }
  0x20   :  { %9696 = vmatpush3.bf16.msra.mxu0 %v11101_v36  ;;  %v11475_v36 = vand.u32 4294901760, %v783_v31  ;;  %v11493_v43 = vand.u32 4294901760, %v899_v39 }
  0x21   :  { %9718 = vmatpush3.bf16.msra.mxu1 %v11102_v37  ;;  %9725 = vmatprep.subr.bf16.mxu0 %v11104_v41  ;;  %v1241_v37 = vsel %vm782_vm2, %v1240_v32, 0 }
  0x22   :  { %9747 = vmatprep.subr.bf16.mxu1 %v11105_v42  ;;  %v856_v40 = vsub.f32 %v783_v31, %v11475_v36  ;;  %v11485_v41 = vand.u32 4294901760, %v1241_v37  ;;  %v3506_v42 = vld [vmem:[%s12691_s0 + $0xe] sm:$0x1] }
  0x23   :  { %643 = vmatmul.mubr.bf16.vlgmr.msra.gmra.mxu0 %v192_v44  ;;  %v3509_v51 = vrot.slane %v3506_v42, 7 }
  0x24   :  { %9726 = vmatpush3.bf16.msra.mxu0 %v11106_v47  ;;  %683 = vmatmul.mubr.bf16.vlgmr.msra.gmra.mxu1 %v214_v49  ;;  %v857_v44 = vand.u32 4294901760, %v856_v40  ;;  %v3505_v47 = vld [vmem:[%s12691_s0 + $0x6] sm:$0x1] }
  0x25   :  { %9727 = vmatprep.subr.bf16.mxu0 %v11108_v50  ;;  %9748 = vmatpush3.bf16.msra.mxu1 %v11107_v52  ;;  %v1310_v50 = vsub.f32 %v1241_v37, %v11485_v41  ;;  %v3959_v52 = vld [vmem:[%s12691_s0 + $0x7] sm:$0x1] }
  0x26   :  { %722 = vmatprep.mubr.bf16.mxu0 %v213_v53  ;;  %9749 = vmatprep.subr.bf16.mxu1 %v11109_v54  ;;  %v858_v49 = vsub.f32 %v856_v40, %v857_v44  ;;  %v1694_v54 = vsel %vm780_vm1, %v1693_v45, %v1689_v46 }
  0x27   :  { %762 = vmatprep.mubr.bf16.mxu1 %v217_v56  ;;  %v3963_v56 = vrot.slane %v3960_v48, 7 }
  0x28   :  { %9728 = vmatpush3.bf16.msra.mxu0 %v11110_v55  ;;  %v859_v53 = vand.u32 4294901760, %v858_v49  ;;  %v3510_v55 = vsel %vm780_vm1, %v3509_v51, %v3505_v47  ;;  %v26_v49 = vld [vmem:[%s12690_s2 + $0x20] sm:$0xff] }
  0x29   :  { %9729 = vmatprep.subr.bf16.mxu0 %v11112_v57  ;;  %9750 = vmatpush3.bf16.msra.mxu1 %v11111_v58  ;;  %v1311_v57 = vand.u32 4294901760, %v1310_v50  ;;  %v11516_v58 = vsel %vm782_vm2, %v3510_v55, 0  ;;  %v11748_v51 = vand.u32 4294901760, %v26_v49  ;;  %v23_v55 = vld [vmem:[%s12690_s2 + $0x8] sm:$0xff] }
  0x2a   :  { %9751 = vmatprep.subr.bf16.mxu1 %v11113_v59  ;;  %v3964_v59 = vsel %vm780_vm1, %v3963_v56, %v3959_v52  ;;  %v11677_v39 = vand.u32 4294901760, %v11516_v58 }
  0x2b   :  { %v11768_v56 = vsub.f32 %v26_v49, %v11748_v51 }
  0x2c   :  { %9730 = vmatpush3.bf16.msra.mxu0 %v11114_v60  ;;  %v1695_v60 = vsel %vm782_vm2, %v1694_v54, 0 }
  0x2d   :  { %9731 = vmatprep.subr.bf16.mxu0 %v11116_v61  ;;  %9752 = vmatpush3.bf16.msra.mxu1 %v11115_v62  ;;  %v11526_v61 = vsel %vm782_vm2, %v3964_v59, 0  ;;  %v2144_v62 = vld [vmem:[%s12691_s0 + $0xb] sm:$0x1] }
  0x2e   :  { %9753 = vmatprep.subr.bf16.mxu1 %v11117_v63  ;;  %v1312_v63 = vsub.f32 %v1310_v50, %v1311_v57  ;;  %v11709_v45 = vand.u32 4294901760, %v11526_v61 }
  0x30   :  { %9732 = vmatpush3.bf16.msra.mxu0 %v11118_v0  ;;  %v11535_v0 = vand.u32 4294901760, %v1695_v60  ;;  %v11722_v47 = vsub.f32 %v11526_v61, %v11709_v45  ;;  %v11788_v61 = vand.u32 4294901760, %v11768_v56 }
  0x31   :  { %9733 = vmatprep.subr.bf16.mxu0 %v11120_v1  ;;  %9754 = vmatpush3.bf16.msra.mxu1 %v11119_v2  ;;  %v2147_v1 = vrot.slane %v2144_v62, 7  ;;  %v2143_v2 = vld [vmem:[%s12691_s0 + $0x3] sm:$0x1] }
  0x32   :  { %9755 = vmatprep.subr.bf16.mxu1 %v11121_v3  ;;  %v1313_v3 = vand.u32 4294901760, %v1312_v63  ;;  %v4035_v48 = vand.u32 4294901760, %v11722_v47 }
  0x34   :  { %9734 = vmatpush3.bf16.msra.mxu0 %v11122_v4  ;;  %v1764_v4 = vsub.f32 %v1695_v60, %v11535_v0  ;;  %v4036_v52 = vsub.f32 %v11722_v47, %v4035_v48  ;;  %v11780_v60 = vand.u32 4294901760, %v23_v55 }
  0x35   :  { %9735 = vmatprep.subr.bf16.mxu0 %v11124_v5  ;;  %9756 = vmatpush3.bf16.msra.mxu1 %v11123_v6  ;;  %v2148_v5 = vsel %vm780_vm1, %v2147_v1, %v2143_v2 }
  0x36   :  { %9757 = vmatprep.subr.bf16.mxu1 %v11125_v7  ;;  %v1765_v6 = vand.u32 4294901760, %v1764_v4  ;;  %v2149_v7 = vsel %vm782_vm2, %v2148_v5, 0 }
  0x38   :  { %9736 = vmatpush3.bf16.msra.mxu0 %v11126_v8  ;;  %v2598_v8 = vld [vmem:[%s12691_s0 + $0xc] sm:$0x1] }
  0x39   :  { %9737 = vmatprep.subr.bf16.mxu0 %v11128_v9  ;;  %9758 = vmatpush3.bf16.msra.mxu1 %v11127_v10  ;;  %v1766_v9 = vsub.f32 %v1764_v4, %v1765_v6  ;;  %v11573_v10 = vand.u32 4294901760, %v2149_v7 }
  0x3a   :  { %9759 = vmatprep.subr.bf16.mxu1 %v11129_v11  ;;  %v2601_v11 = vrot.slane %v2598_v8, 7 }
  0x3c   :  { %9738 = vmatpush3.bf16.msra.mxu0 %v11130_v12  ;;  %v2597_v12 = vld [vmem:[%s12691_s0 + $0x4] sm:$0x1] }
  0x3d   :  { %9739 = vmatprep.subr.bf16.mxu0 %v11132_v13  ;;  %9760 = vmatpush3.bf16.msra.mxu1 %v11131_v14  ;;  %v1767_v13 = vand.u32 4294901760, %v1766_v9  ;;  %v2218_v14 = vsub.f32 %v2149_v7, %v11573_v10  ;;  %v9605_v9 = vld [vmem:[%s12690_s2 + $0x6] ss:$0 sm:$0xff] }
  0x3e   :  { %9761 = vmatprep.subr.bf16.mxu1 %v11133_v15  ;;  %v2602_v15 = vsel %vm780_vm1, %v2601_v11, %v2597_v12 }
  0x3f   :  { %v2219_v16 = vand.u32 4294901760, %v2218_v14 }
  0x40   :  { %9740 = vmatpush3.bf16.msra.mxu0 %v11134_v17  ;;  %v2603_v17 = vsel %vm782_vm2, %v2602_v15, 0 }
  0x41   :  { %10165 = vmatprep.subr.mxu0 %v11209_v34  ;;  %9762 = vmatpush3.bf16.msra.mxu1 %v11135_v27  ;;  %v2220_v19 = vsub.f32 %v2218_v14, %v2219_v16  ;;  %v11611_v20 = vand.u32 4294901760, %v2603_v17 }
  0x42   :  { %10170 = vmatprep.subr.mxu1 %v11209_v34 }
  0x43   :  { %723 = vmatmul.mubr.bf16.vlgmr.msra.gmra.mxu0 %v199_v21  ;;  %v3055_v21 = vrot.slane %v3052_v18, 7  ;;  %v2221_v25 = vand.u32 4294901760, %v2220_v19  ;;  %v2672_v26 = vsub.f32 %v2603_v17, %v11611_v20 }
  0x44   :  { %10166 = vmatpush3.msra.mxu0 %v11454_v22  ;;  %10167 = vmatprep.mubr.msk.f32.mxu0 %vm11210_vm3, %v11209_v34 }
  0x45   :  { %763 = vmatmul.mubr.bf16.vlgmr.msra.gmra.mxu1 %v215_v33  ;;  %10175 = vmatprep.subr.mxu0 %v11209_v34  ;;  %v3056_v27 = vsel %vm780_vm1, %v3055_v21, %v3051_v23  ;;  %v2673_v28 = vand.u32 4294901760, %v2672_v26 }
  0x46   :  { %10172 = vmatprep.mubr.msk.f32.mxu1 %vm11210_vm3, %v11209_v34  ;;  %10171 = vmatpush3.msra.mxu1 %v11493_v43  ;;  %v3057_v30 = vsel %vm782_vm2, %v3056_v27, 0 }
  0x47   :  { %10180 = vmatprep.subr.mxu1 %v11209_v34  ;;  %v2674_v31 = vsub.f32 %v2672_v26, %v2673_v28  ;;  %v11646_v32 = vand.u32 4294901760, %v3057_v30 }
  0x49   :  { %v2675_v33 = vand.u32 4294901760, %v2674_v31 }
  0x4b   :  { %10168 = vmatmul.mubr.f32.vlgmr.msra.gmra.mxu0 %v859_v53  ;;  %v24_v53 = vld [vmem:[%s12690_s2 + $0x10] sm:$0xff] }
  0x4c   :  { %10176 = vmatpush3.msra.mxu0 %v11466_v29  ;;  %10177 = vmatprep.mubr.msk.f32.mxu0 %vm11210_vm3, %v11209_v34 }
  0x4d   :  { %10173 = vmatmul.mubr.f32.vlgmr.msra.gmra.mxu1 %v11475_v36  ;;  %10185 = vmatprep.subr.mxu0 %v11209_v34 }
  0x4e   :  { %10181 = vmatpush3.msra.mxu1 %v11454_v22  ;;  %10182 = vmatprep.mubr.msk.f32.mxu1 %vm11210_vm3, %v11209_v34 }
  0x4f   :  { %10178 = vmatmul.mubr.f32.vlgmr.msra.gmra.mxu0 %v856_v40  ;;  %10190 = vmatprep.subr.mxu1 %v11209_v34 }
  0x50   :  { %10186 = vmatpush3.msra.mxu0 %v11473_v35  ;;  %10187 = vmatprep.mubr.msk.f32.mxu0 %vm11210_vm3, %v11209_v34 }
  0x51   :  { %10183 = vmatmul.mubr.f32.vlgmr.msra.gmra.mxu1 %v857_v44  ;;  %10195 = vmatprep.subr.mxu0 %v11209_v34 }
  0x52   :  { %10191 = vmatpush3.msra.mxu1 %v11454_v22  ;;  %10192 = vmatprep.mubr.msk.f32.mxu1 %vm11210_vm3, %v11209_v34 }
  0x53   :  { %10188 = vmatmul.mubr.f32.vlgmr.msra.gmra.mxu0 %v11475_v36  ;;  %10200 = vmatprep.subr.mxu1 %v11209_v34 }
  0x54   :  { %10196 = vmatpush3.msra.mxu0 %v11454_v22  ;;  %10197 = vmatprep.mubr.msk.f32.mxu0 %vm11210_vm3, %v11209_v34 }
  0x55   :  { %10193 = vmatmul.mubr.f32.vlgmr.msra.gmra.mxu1 %v11475_v36  ;;  %10205 = vmatprep.subr.mxu0 %v11209_v34  ;;  %v3126_v36 = vsub.f32 %v3057_v30, %v11646_v32 }
  0x56   :  { %10201 = vmatpush3.msra.mxu1 %v11493_v43  ;;  %10202 = vmatprep.mubr.msk.f32.mxu1 %vm11210_vm3, %v11209_v34 }
  0x57   :  { %10198 = vmatmul.mubr.f32.vlgmr.msra.gmra.mxu0 %v1313_v3  ;;  %10210 = vmatprep.subr.mxu1 %v11209_v34  ;;  %v3127_v37 = vand.u32 4294901760, %v3126_v36 }
  0x58   :  { %10206 = vmatpush3.msra.mxu0 %v11466_v29  ;;  %10207 = vmatprep.mubr.msk.f32.mxu0 %vm11210_vm3, %v11209_v34 }
  0x59   :  { %10203 = vmatmul.mubr.f32.vlgmr.msra.gmra.mxu1 %v11485_v41  ;;  %10215 = vmatprep.subr.mxu0 %v11209_v34  ;;  %v3128_v38 = vsub.f32 %v3126_v36, %v3127_v37 }
  0x5a   :  { %10211 = vmatpush3.msra.mxu1 %v11454_v22  ;;  %10212 = vmatprep.mubr.msk.f32.mxu1 %vm11210_vm3, %v11209_v34 }
  0x5b   :  { %10208 = vmatmul.mubr.f32.vlgmr.msra.gmra.mxu0 %v1310_v50  ;;  %10220 = vmatprep.subr.mxu1 %v11209_v34  ;;  %v3129_v40 = vand.u32 4294901760, %v3128_v38  ;;  %v25_v50 = vld [vmem:[%s12690_s2 + $0x18] sm:$0xff] }
  0x5c   :  { %10216 = vmatpush3.msra.mxu0 %v11473_v35  ;;  %10217 = vmatprep.mubr.msk.f32.mxu0 %vm11210_vm3, %v11209_v34  ;;  %v11758_v54 = vand.u32 4294901760, %v25_v50 }
  0x5d   :  { %10213 = vmatmul.mubr.f32.vlgmr.msra.gmra.mxu1 %v1311_v57  ;;  %10225 = vmatprep.subr.mxu0 %v11209_v34  ;;  %v11770_v57 = vand.u32 4294901760, %v24_v53 }
  0x5e   :  { %10221 = vmatpush3.msra.mxu1 %v11454_v22  ;;  %10222 = vmatprep.mubr.msk.f32.mxu1 %vm11210_vm3, %v11209_v34  ;;  %v11778_v59 = vsub.f32 %v25_v50, %v11758_v54 }
  0x5f   :  { %10218 = vmatmul.mubr.f32.vlgmr.msra.gmra.mxu0 %v11485_v41  ;;  %10230 = vmatprep.subr.mxu1 %v11209_v34  ;;  %v11791_v62 = vsub.f32 %v24_v53, %v11770_v57 }
  0x60   :  { %10226 = vmatpush3.msra.mxu0 %v11454_v22  ;;  %10227 = vmatprep.mubr.msk.f32.mxu0 %vm11210_vm3, %v11209_v34  ;;  %v11798_v63 = vand.u32 4294901760, %v11778_v59 }
  0x61   :  { %10223 = vmatmul.mubr.f32.vlgmr.msra.gmra.mxu1 %v11485_v41  ;;  %10235 = vmatprep.subr.mxu0 %v11209_v34  ;;  %v3580_v41 = vsub.f32 %v11516_v58, %v11677_v39  ;;  %v4037_v58 = vand.u32 4294901760, %v4036_v52 }
  0x62   :  { %10231 = vmatpush3.msra.mxu1 %v11493_v43  ;;  %10232 = vmatprep.mubr.msk.f32.mxu1 %vm11210_vm3, %v11209_v34  ;;  %v4531_v1 = vsub.f32 %v11778_v59, %v11798_v63 }
  0x63   :  { %10228 = vmatmul.mubr.f32.vlgmr.msra.gmra.mxu0 %v1767_v13  ;;  %10240 = vmatprep.subr.mxu1 %v11209_v34  ;;  %v3581_v42 = vand.u32 4294901760, %v3580_v41 }
  0x64   :  { %10236 = vmatpush3.msra.mxu0 %v11466_v29  ;;  %10237 = vmatprep.mubr.msk.f32.mxu0 %vm11210_vm3, %v11209_v34 }
  0x65   :  { %10233 = vmatmul.mubr.f32.vlgmr.msra.gmra.mxu1 %v11535_v0  ;;  %10245 = vmatprep.subr.mxu0 %v11209_v34  ;;  %v3582_v44 = vsub.f32 %v3580_v41, %v3581_v42 }
  0x66   :  { %10241 = vmatpush3.msra.mxu1 %v11454_v22  ;;  %10242 = vmatprep.mubr.msk.f32.mxu1 %vm11210_vm3, %v11209_v34 }
  0x67   :  { %10238 = vmatmul.mubr.f32.vlgmr.msra.gmra.mxu0 %v1764_v4  ;;  %10250 = vmatprep.subr.mxu1 %v11209_v34  ;;  %v3583_v46 = vand.u32 4294901760, %v3582_v44  ;;  %v11834_v4 = vand.u32 4294901760, %v4531_v1 }
  0x68   :  { %10246 = vmatpush3.msra.mxu0 %v11473_v35  ;;  %10247 = vmatprep.mubr.msk.f32.mxu0 %vm11210_vm3, %v11209_v34 }
  0x69   :  { %10243 = vmatmul.mubr.f32.vlgmr.msra.gmra.mxu1 %v1765_v6  ;;  %10255 = vmatprep.subr.mxu0 %v11209_v34 }
  0x6a   :  { %10251 = vmatpush3.msra.mxu1 %v11454_v22  ;;  %10252 = vmatprep.mubr.msk.f32.mxu1 %vm11210_vm3, %v11209_v34 }
  0x6b   :  { %10248 = vmatmul.mubr.f32.vlgmr.msra.gmra.mxu0 %v11535_v0  ;;  %10260 = vmatprep.subr.mxu1 %v11209_v34 }
  0x6c   :  { %10256 = vmatpush3.msra.mxu0 %v11454_v22  ;;  %10257 = vmatprep.mubr.msk.f32.mxu0 %vm11210_vm3, %v11209_v34 }
  0x6d   :  { %10253 = vmatmul.mubr.f32.vlgmr.msra.gmra.mxu1 %v11535_v0  ;;  %10265 = vmatprep.subr.mxu0 %v11209_v34  ;;  %v11811_v0 = vand.u32 4294901760, %v11791_v62 }
  0x6e   :  { %10261 = vmatpush3.msra.mxu1 %v11493_v43  ;;  %10262 = vmatprep.mubr.msk.f32.mxu1 %vm11210_vm3, %v11209_v34 }
  0x6f   :  { %10258 = vmatmul.mubr.f32.vlgmr.msra.gmra.mxu0 %v2221_v25  ;;  %10270 = vmatprep.subr.mxu1 %v11209_v34 }
  0x70   :  { %10266 = vmatpush3.msra.mxu0 %v11466_v29  ;;  %10267 = vmatprep.mubr.msk.f32.mxu0 %vm11210_vm3, %v11209_v34 }
  0x71   :  { %10263 = vmatmul.mubr.f32.vlgmr.msra.gmra.mxu1 %v11573_v10  ;;  %10275 = vmatprep.subr.mxu0 %v11209_v34 }
  0x72   :  { %10271 = vmatpush3.msra.mxu1 %v11454_v22  ;;  %10272 = vmatprep.mubr.msk.f32.mxu1 %vm11210_vm3, %v11209_v34 }
  0x73   :  { %10268 = vmatmul.mubr.f32.vlgmr.msra.gmra.mxu0 %v2218_v14  ;;  %10280 = vmatprep.subr.mxu1 %v11209_v34 }
  0x74   :  { %10276 = vmatpush3.msra.mxu0 %v11473_v35  ;;  %10277 = vmatprep.mubr.msk.f32.mxu0 %vm11210_vm3, %v11209_v34 }
  0x75   :  { %10273 = vmatmul.mubr.f32.vlgmr.msra.gmra.mxu1 %v2219_v16  ;;  %10285 = vmatprep.subr.mxu0 %v11209_v34 }
  0x76   :  { %10281 = vmatpush3.msra.mxu1 %v11454_v22  ;;  %10282 = vmatprep.mubr.msk.f32.mxu1 %vm11210_vm3, %v11209_v34 }
  0x77   :  { %10278 = vmatmul.mubr.f32.vlgmr.msra.gmra.mxu0 %v11573_v10  ;;  %10290 = vmatprep.subr.mxu1 %v11209_v34 }
  0x78   :  { %10286 = vmatpush3.msra.mxu0 %v11454_v22  ;;  %10287 = vmatprep.mubr.msk.f32.mxu0 %vm11210_vm3, %v11209_v34 }
  0x79   :  { %10283 = vmatmul.mubr.f32.vlgmr.msra.gmra.mxu1 %v11573_v10  ;;  %10295 = vmatprep.subr.mxu0 %v11209_v34 }
  0x7a   :  { %10291 = vmatpush3.msra.mxu1 %v11493_v43  ;;  %10292 = vmatprep.mubr.msk.f32.mxu1 %vm11210_vm3, %v11209_v34 }
  0x7b   :  { %10288 = vmatmul.mubr.f32.vlgmr.msra.gmra.mxu0 %v2675_v33  ;;  %10300 = vmatprep.subr.mxu1 %v11209_v34  ;;  %v11934_v33 = vld [vmem:[%s12690_s2 + $0x4] ss:$0 sm:$0xff] }
  0x7c   :  { %10296 = vmatpush3.msra.mxu0 %v11466_v29  ;;  %10297 = vmatprep.mubr.msk.f32.mxu0 %vm11210_vm3, %v11209_v34 }
  0x7d   :  { %10293 = vmatmul.mubr.f32.vlgmr.msra.gmra.mxu1 %v11611_v20  ;;  %10305 = vmatprep.subr.mxu0 %v11209_v34 }
  0x7e   :  { %10301 = vmatpush3.msra.mxu1 %v11454_v22  ;;  %10302 = vmatprep.mubr.msk.f32.mxu1 %vm11210_vm3, %v11209_v34 }
  0x7f   :  { %10298 = vmatmul.mubr.f32.vlgmr.msra.gmra.mxu0 %v2672_v26  ;;  %10310 = vmatprep.subr.mxu1 %v11209_v34 }
  0x80   :  { %10306 = vmatpush3.msra.mxu0 %v11473_v35  ;;  %10307 = vmatprep.mubr.msk.f32.mxu0 %vm11210_vm3, %v11209_v34 }
  0x81   :  { %10303 = vmatmul.mubr.f32.vlgmr.msra.gmra.mxu1 %v2673_v28  ;;  %10315 = vmatprep.subr.mxu0 %v11209_v34 }
  0x82   :  { %10311 = vmatpush3.msra.mxu1 %v11454_v22  ;;  %10312 = vmatprep.mubr.msk.f32.mxu1 %vm11210_vm3, %v11209_v34 }
  0x83   :  { %10308 = vmatmul.mubr.f32.vlgmr.msra.gmra.mxu0 %v11611_v20  ;;  %10320 = vmatprep.subr.mxu1 %v11209_v34 }
  0x84   :  { %10316 = vmatpush3.msra.mxu0 %v11454_v22  ;;  %10317 = vmatprep.mubr.msk.f32.mxu0 %vm11210_vm3, %v11209_v34 }
  0x85   :  { %10313 = vmatmul.mubr.f32.vlgmr.msra.gmra.mxu1 %v11611_v20  ;;  %10325 = vmatprep.subr.mxu0 %v11209_v34 }
  0x86   :  { %10321 = vmatpush3.msra.mxu1 %v11493_v43  ;;  %10322 = vmatprep.mubr.msk.f32.mxu1 %vm11210_vm3, %v11209_v34 }
  0x87   :  { %10318 = vmatmul.mubr.f32.vlgmr.msra.gmra.mxu0 %v3129_v40  ;;  %10330 = vmatprep.subr.mxu1 %v11209_v34 }
  0x88   :  { %10326 = vmatpush3.msra.mxu0 %v11466_v29  ;;  %10327 = vmatprep.mubr.msk.f32.mxu0 %vm11210_vm3, %v11209_v34 }
  0x89   :  { %10323 = vmatmul.mubr.f32.vlgmr.msra.gmra.mxu1 %v11646_v32  ;;  %10335 = vmatprep.subr.mxu0 %v11209_v34 }
  0x8a   :  { %10331 = vmatpush3.msra.mxu1 %v11454_v22  ;;  %10332 = vmatprep.mubr.msk.f32.mxu1 %vm11210_vm3, %v11209_v34 }
  0x8b   :  { %10328 = vmatmul.mubr.f32.vlgmr.msra.gmra.mxu0 %v3126_v36  ;;  %10340 = vmatprep.subr.mxu1 %v11209_v34 }
  0x8c   :  { %10336 = vmatpush3.msra.mxu0 %v11473_v35  ;;  %10337 = vmatprep.mubr.msk.f32.mxu0 %vm11210_vm3, %v11209_v34 }
  0x8d   :  { %10333 = vmatmul.mubr.f32.vlgmr.msra.gmra.mxu1 %v3127_v37  ;;  %10345 = vmatprep.subr.mxu0 %v11209_v34 }
  0x8e   :  { %10341 = vmatpush3.msra.mxu1 %v11454_v22  ;;  %10342 = vmatprep.mubr.msk.f32.mxu1 %vm11210_vm3, %v11209_v34 }
  0x8f   :  { %10338 = vmatmul.mubr.f32.vlgmr.msra.gmra.mxu0 %v11646_v32  ;;  %10350 = vmatprep.subr.mxu1 %v11209_v34 }
  0x90   :  { %10346 = vmatpush3.msra.mxu0 %v11454_v22  ;;  %10347 = vmatprep.mubr.msk.f32.mxu0 %vm11210_vm3, %v11209_v34 }
  0x91   :  { %10343 = vmatmul.mubr.f32.vlgmr.msra.gmra.mxu1 %v11646_v32  ;;  %10355 = vmatprep.subr.mxu0 %v11209_v34 }
  0x92   :  { %10351 = vmatpush3.msra.mxu1 %v11493_v43  ;;  %10352 = vmatprep.mubr.msk.f32.mxu1 %vm11210_vm3, %v11209_v34 }
  0x93   :  { %10348 = vmatmul.mubr.f32.vlgmr.msra.gmra.mxu0 %v3583_v46  ;;  %10360 = vmatprep.subr.mxu1 %v11209_v34 }
  0x94   :  { %10356 = vmatpush3.msra.mxu0 %v11466_v29  ;;  %10357 = vmatprep.mubr.msk.f32.mxu0 %vm11210_vm3, %v11209_v34 }
  0x95   :  { %10353 = vmatmul.mubr.f32.vlgmr.msra.gmra.mxu1 %v11677_v39  ;;  %10365 = vmatprep.subr.mxu0 %v11209_v34 }
  0x96   :  { %10361 = vmatpush3.msra.mxu1 %v11454_v22  ;;  %10362 = vmatprep.mubr.msk.f32.mxu1 %vm11210_vm3, %v11209_v34 }
  0x97   :  { %10358 = vmatmul.mubr.f32.vlgmr.msra.gmra.mxu0 %v3580_v41  ;;  %10370 = vmatprep.subr.mxu1 %v11209_v34 }
  0x98   :  { %10366 = vmatpush3.msra.mxu0 %v11473_v35  ;;  %10367 = vmatprep.mubr.msk.f32.mxu0 %vm11210_vm3, %v11209_v34 }
  0x99   :  { %10363 = vmatmul.mubr.f32.vlgmr.msra.gmra.mxu1 %v3581_v42  ;;  %10375 = vmatprep.subr.mxu0 %v11209_v34 }
  0x9a   :  { %10371 = vmatpush3.msra.mxu1 %v11454_v22  ;;  %10372 = vmatprep.mubr.msk.f32.mxu1 %vm11210_vm3, %v11209_v34 }
  0x9b   :  { %10368 = vmatmul.mubr.f32.vlgmr.msra.gmra.mxu0 %v11677_v39  ;;  %10380 = vmatprep.subr.mxu1 %v11209_v34 }
  0x9c   :  { %10376 = vmatpush3.msra.mxu0 %v11454_v22  ;;  %10377 = vmatprep.mubr.msk.f32.mxu0 %vm11210_vm3, %v11209_v34 }
  0x9d   :  { %10373 = vmatmul.mubr.f32.vlgmr.msra.gmra.mxu1 %v11677_v39  ;;  %10385 = vmatprep.subr.mxu0 %v11209_v34 }
  0x9e   :  { %10381 = vmatpush3.msra.mxu1 %v11493_v43  ;;  %10382 = vmatprep.mubr.msk.f32.mxu1 %vm11210_vm3, %v11209_v34  ;;  %v11801_v43 = vsub.f32 %v23_v55, %v11780_v60 }
  0x9f   :  { %10378 = vmatmul.mubr.f32.vlgmr.msra.gmra.mxu0 %v4037_v58  ;;  %10390 = vmatprep.subr.mxu1 %v11209_v34 }
  0xa0   :  { %10386 = vmatpush3.msra.mxu0 %v11466_v29  ;;  %10387 = vmatprep.mubr.msk.f32.mxu0 %vm11210_vm3, %v11209_v34  ;;  %v4524_v29 = vsub.f32 %v11768_v56, %v11788_v61  ;;  %v11821_v2 = vand.u32 4294901760, %v11801_v43 }
  0xa1   :  { %10383 = vmatmul.mubr.f32.vlgmr.msra.gmra.mxu1 %v11709_v45  ;;  %10395 = vmatprep.subr.mxu0 %v11209_v34 }
  0xa2   :  { %10391 = vmatpush3.msra.mxu1 %v11454_v22  ;;  %10392 = vmatprep.mubr.msk.f32.mxu1 %vm11210_vm3, %v11209_v34  ;;  %v11827_v3 = vand.u32 4294901760, %v4524_v29 }
  0xa3   :  { %10388 = vmatmul.mubr.f32.vlgmr.msra.gmra.mxu0 %v11722_v47  ;;  %10400 = vmatprep.subr.mxu1 %v11209_v34 }
  0xa4   :  { %10396 = vmatpush3.msra.mxu0 %v11473_v35  ;;  %10397 = vmatprep.mubr.msk.f32.mxu0 %vm11210_vm3, %v11209_v34  ;;  %v4538_v35 = vsub.f32 %v11791_v62, %v11811_v0 }
  0xa5   :  { %10393 = vmatmul.mubr.f32.vlgmr.msra.gmra.mxu1 %v4035_v48  ;;  %10405 = vmatprep.subr.mxu0 %v11209_v34 }
  0xa6   :  { %10401 = vmatpush3.msra.mxu1 %v11454_v22  ;;  %10402 = vmatprep.mubr.msk.f32.mxu1 %vm11210_vm3, %v11209_v34  ;;  %v4545_v22 = vsub.f32 %v11801_v43, %v11821_v2  ;;  %v11844_v5 = vand.u32 4294901760, %v4538_v35 }
  0xa7   :  { %10398 = vmatmul.mubr.f32.vlgmr.msra.gmra.mxu0 %v11709_v45  ;;  %10416 = vmatprep.subr.mxu1 %v11209_v34 }
  0xa8   :  { %10406 = vmatpush3.msra.mxu0 %v11748_v51  ;;  %10413 = vmatprep.mubr.msk.f32.mxu0 %vm11210_vm3, %v11209_v34  ;;  %v11850_v6 = vand.u32 4294901760, %v4545_v22 }
  0xa9   :  { %10403 = vmatmul.mubr.f32.vlgmr.msra.gmra.mxu1 %v11709_v45  ;;  %10407 = vmatprep.subr.mxu0 %v11209_v34 }
  0xaa   :  { %10417 = vmatpush3.msra.mxu1 %v11827_v3  ;;  %10408 = vmatpush3.msra.mxu0 %v11758_v54 }
  0xab   :  { %10418 = vmatprep.subr.mxu1 %v11209_v34  ;;  %10409 = vmatprep.subr.mxu0 %v11209_v34 }
  0xac   :  { %10419 = vmatpush3.msra.mxu1 %v11834_v4  ;;  %10410 = vmatpush3.msra.mxu0 %v11770_v57 }
  0xad   :  { %10420 = vmatprep.subr.mxu1 %v11209_v34  ;;  %10411 = vmatprep.subr.mxu0 %v11209_v34 }
  0xae   :  { %10421 = vmatpush3.msra.mxu1 %v11844_v5  ;;  %10412 = vmatpush3.msra.mxu0 %v11780_v60 }
  0xaf   :  { %10422 = vmatprep.subr.mxu1 %v11209_v34  ;;  %10414 = vmatmul.mubr.f32.vlgmr.msra.gmra.mxu0 %v11209_v34 }
  0xb0   :  { %10423 = vmatpush3.msra.mxu1 %v11850_v6  ;;  %10427 = vmatprep.subr.mxu0 %v11209_v34 }
  0xb1   :  { %10424 = vmatprep.mubr.msk.f32.mxu1 %vm11210_vm3, %v11209_v34  ;;  %10428 = vmatpush3.msra.mxu0 %v11768_v56 }
  0xb2   :  { %10438 = vmatprep.subr.mxu1 %v11209_v34  ;;  %10425 = vmatmul.mubr.f32.vlgmr.msra.gmra.mxu1 %v11209_v34 }
  0xb3   :  { %10429 = vmatprep.subr.mxu0 %v11209_v34  ;;  %10439 = vmatpush3.msra.mxu1 %v11748_v51 }
  0xb4   :  { %10430 = vmatpush3.msra.mxu0 %v11778_v59  ;;  %10440 = vmatprep.subr.mxu1 %v11209_v34 }
  0xb5   :  { %10431 = vmatprep.subr.mxu0 %v11209_v34  ;;  %10441 = vmatpush3.msra.mxu1 %v11758_v54 }
  0xb6   :  { %10432 = vmatpush3.msra.mxu0 %v11791_v62  ;;  %10442 = vmatprep.subr.mxu1 %v11209_v34 }
  0xb7   :  { %10433 = vmatprep.subr.mxu0 %v11209_v34  ;;  %10443 = vmatpush3.msra.mxu1 %v11770_v57 }
  0xb8   :  { %10434 = vmatpush3.msra.mxu0 %v11801_v43  ;;  %10435 = vmatprep.mubr.msk.f32.mxu0 %vm11210_vm3, %v11209_v34 }
  0xb9   :  { %10444 = vmatprep.subr.mxu1 %v11209_v34  ;;  %10436 = vmatmul.mubr.f32.vlgmr.msra.gmra.mxu0 %v11209_v34 }
  0xba   :  { %10445 = vmatpush3.msra.mxu1 %v11780_v60  ;;  %10449 = vmatprep.subr.mxu0 %v11209_v34 }
  0xbb   :  { %10446 = vmatprep.mubr.msk.f32.mxu1 %vm11210_vm3, %v11209_v34  ;;  %10450 = vmatpush3.msra.mxu0 %v11788_v61 }
  0xbc   :  { %10460 = vmatprep.subr.mxu1 %v11209_v34  ;;  %10447 = vmatmul.mubr.f32.vlgmr.msra.gmra.mxu1 %v11209_v34 }
  0xbd   :  { %10451 = vmatprep.subr.mxu0 %v11209_v34  ;;  %10461 = vmatpush3.msra.mxu1 %v11748_v51 }
  0xbe   :  { %10452 = vmatpush3.msra.mxu0 %v11798_v63  ;;  %10462 = vmatprep.subr.mxu1 %v11209_v34 }
  0xbf   :  { %10453 = vmatprep.subr.mxu0 %v11209_v34  ;;  %10463 = vmatpush3.msra.mxu1 %v11758_v54 }
  0xc0   :  { %10454 = vmatpush3.msra.mxu0 %v11811_v0  ;;  %10464 = vmatprep.subr.mxu1 %v11209_v34 }
  0xc1   :  { %10455 = vmatprep.subr.mxu0 %v11209_v34  ;;  %10465 = vmatpush3.msra.mxu1 %v11770_v57 }
  0xc2   :  { %10456 = vmatpush3.msra.mxu0 %v11821_v2  ;;  %10457 = vmatprep.mubr.msk.f32.mxu0 %vm11210_vm3, %v11209_v34 }
  0xc3   :  { %10466 = vmatprep.subr.mxu1 %v11209_v34  ;;  %10458 = vmatmul.mubr.f32.vlgmr.msra.gmra.mxu0 %v11209_v34 }
  0xc4   :  { %10467 = vmatpush3.msra.mxu1 %v11780_v60  ;;  %10468 = vmatprep.mubr.msk.f32.mxu1 %vm11210_vm3, %v11209_v34 }
  0xc5   :  { %10469 = vmatmul.mubr.f32.vlgmr.msra.gmra.mxu1 %v11209_v34  ;;  %10482 = vmatprep.subr.mxu1 %v11209_v34 }
  0xc6   :  { %10483 = vmatpush3.msra.mxu1 %v11827_v3  ;;  %10471 = vmatprep.subr.mxu0 %v11209_v34 }
  0xc7   :  { %10484 = vmatprep.subr.mxu1 %v11209_v34  ;;  %10490 = vmatprep.mubr.msk.f32.mxu1 %vm11210_vm3, %v11209_v34 }
  0xc8   :  { %10485 = vmatpush3.msra.mxu1 %v11834_v4  ;;  %10472 = vmatpush3.msra.mxu0 %v11748_v51 }
  0xc9   :  { %10486 = vmatprep.subr.mxu1 %v11209_v34  ;;  %10473 = vmatprep.subr.mxu0 %v11209_v34 }
  0xca   :  { %10487 = vmatpush3.msra.mxu1 %v11844_v5  ;;  %10474 = vmatpush3.msra.mxu0 %v11758_v54 }
  0xcb   :  { %10488 = vmatprep.subr.mxu1 %v11209_v34  ;;  %10475 = vmatprep.subr.mxu0 %v11209_v34 }
  0xcc   :  { %10489 = vmatpush3.msra.mxu1 %v11850_v6  ;;  %10476 = vmatpush3.msra.mxu0 %v11770_v57 }
  0xcd   :  { %10504 = vmatprep.subr.mxu1 %v11209_v34  ;;  %10477 = vmatprep.subr.mxu0 %v11209_v34 }
  0xce   :  { %10478 = vmatpush3.msra.mxu0 %v11780_v60  ;;  %10479 = vmatprep.mubr.msk.f32.mxu0 %vm11210_vm3, %v11209_v34 }
  0xcf   :  { %10493 = vmatprep.subr.mxu0 %v11209_v34 }
  0xe3   :  { %v9697_v7 = vpop.f32.mrf.mxu0 }
  0xe4   :  { %v9719_v8 = vpop.f32.mrf.mxu1 }
  0xe5   :  { %v9698_v10 = vpop.f32.mrf.mxu0 }
  0xe6   :  { %v9699_v11 = vadd.f32 %v9698_v10, %v9697_v7  ;;  %v9720_v12 = vpop.f32.mrf.mxu1 }
  0xe7   :  { %v9700_v13 = vpop.f32.mrf.mxu0  ;;  %v9721_v15 = vadd.f32 %v9720_v12, %v9719_v8 }
  0xe8   :  { %v645_v14 = vadd.f32 %v9699_v11, %v9605_v9  ;;  %v9722_v16 = vpop.f32.mrf.mxu1 }
  0xe9   :  { %v9701_v17 = vpop.f32.mrf.mxu0 }
  0xea   :  { %v685_v18 = vadd.f32 %v9721_v15, %v645_v14  ;;  %v9723_v19 = vpop.f32.mrf.mxu1 }
 0x103   :  { %v9741_v20 = vpop.f32.mrf.mxu0 }
 0x105   :  { %v9763_v21 = vpop.f32.mrf.mxu1  ;;  %v9742_v23 = vpop.f32.mrf.mxu0 }
 0x106   :  { %v9743_v25 = vadd.f32 %v9742_v23, %v9741_v20 }
 0x107   :  { %v9764_v26 = vpop.f32.mrf.mxu1  ;;  %v9744_v27 = vpop.f32.mrf.mxu0 }
 0x108   :  { %v725_v28 = vadd.f32 %v9743_v25, %v685_v18  ;;  %v9765_v30 = vadd.f32 %v9764_v26, %v9763_v21 }
 0x109   :  { %v9766_v31 = vpop.f32.mrf.mxu1  ;;  %v9745_v32 = vpop.f32.mrf.mxu0 }
 0x10a   :  { %v11936_v36 = vadd.f32 %v9765_v30, %v725_v28 }
 0x10b   :  { %v9767_v37 = vpop.f32.mrf.mxu1  ;;  %v861_v38 = vpop.f32.mrf.mxu0 }
 0x10c   :  { %v862_v39 = vadd.f32 %v11934_v33, %v861_v38 }
 0x10d   :  { %v937_v40 = vpop.f32.mrf.mxu1  ;;  %v10169_v41 = vpop.f32.mrf.mxu0 }
 0x10e   :  { %v938_v42 = vadd.f32 %v937_v40, %v862_v39 }
 0x10f   :  { %v10174_v44 = vpop.f32.mrf.mxu1  ;;  %v1011_v45 = vpop.f32.mrf.mxu0 }
 0x110   :  { %v1012_v46 = vadd.f32 %v1011_v45, %v938_v42 }
 0x111   :  { %v1085_v47 = vpop.f32.mrf.mxu1  ;;  %v10179_v48 = vpop.f32.mrf.mxu0 }
 0x112   :  { %v1086_v49 = vadd.f32 %v1085_v47, %v1012_v46 }
 0x113   :  { %v10184_v50 = vpop.f32.mrf.mxu1  ;;  %v1159_v52 = vpop.f32.mrf.mxu0 }
 0x114   :  { %v1160_v53 = vadd.f32 %v1159_v52, %v1086_v49 }
 0x115   :  { %v1231_v55 = vpop.f32.mrf.mxu1  ;;  %v10189_v58 = vpop.f32.mrf.mxu0 }
 0x116   :  { %v11939_v29 = vadd.f32 %v1231_v55, %v1160_v53 }
 0x117   :  { %v10194_v1 = vpop.f32.mrf.mxu1  ;;  %v1315_v35 = vpop.f32.mrf.mxu0 }
 0x118   :  { %v1316_v22 = vadd.f32 %v11934_v33, %v1315_v35 }
 0x119   :  { %v1391_v7 = vpop.f32.mrf.mxu1  ;;  %v10199_v8 = vpop.f32.mrf.mxu0 }
 0x11a   :  { %v1392_v9 = vadd.f32 %v1391_v7, %v1316_v22 }
 0x11b   :  { %v10204_v10 = vpop.f32.mrf.mxu1  ;;  %v1465_v11 = vpop.f32.mrf.mxu0 }
 0x11c   :  { %v1466_v12 = vadd.f32 %v1465_v11, %v1392_v9 }
 0x11d   :  { %v1539_v13 = vpop.f32.mrf.mxu1  ;;  %v10209_v14 = vpop.f32.mrf.mxu0 }
 0x11e   :  { %v1540_v15 = vadd.f32 %v1539_v13, %v1466_v12 }
 0x11f   :  { %v10214_v16 = vpop.f32.mrf.mxu1  ;;  %v1613_v17 = vpop.f32.mrf.mxu0 }
 0x120   :  { %v1614_v18 = vadd.f32 %v1613_v17, %v1540_v15 }
 0x121   :  { %v1685_v19 = vpop.f32.mrf.mxu1  ;;  %v10219_v20 = vpop.f32.mrf.mxu0 }
 0x122   :  { %v11942_v21 = vadd.f32 %v1685_v19, %v1614_v18 }
 0x123   :  { %v10224_v23 = vpop.f32.mrf.mxu1  ;;  %v1769_v25 = vpop.f32.mrf.mxu0 }
 0x124   :  { %v1770_v26 = vadd.f32 %v11934_v33, %v1769_v25 }
 0x125   :  { %v1845_v27 = vpop.f32.mrf.mxu1  ;;  %v10229_v28 = vpop.f32.mrf.mxu0 }
 0x126   :  { %v1846_v30 = vadd.f32 %v1845_v27, %v1770_v26 }
 0x127   :  { %v10234_v31 = vpop.f32.mrf.mxu1  ;;  %v1919_v32 = vpop.f32.mrf.mxu0 }
 0x128   :  { %v1920_v37 = vadd.f32 %v1919_v32, %v1846_v30 }
 0x129   :  { %v1993_v38 = vpop.f32.mrf.mxu1  ;;  %v10239_v39 = vpop.f32.mrf.mxu0 }
 0x12a   :  { %v1994_v40 = vadd.f32 %v1993_v38, %v1920_v37 }
 0x12b   :  { %v10244_v41 = vpop.f32.mrf.mxu1  ;;  %v2067_v42 = vpop.f32.mrf.mxu0 }
 0x12c   :  { %v2068_v44 = vadd.f32 %v2067_v42, %v1994_v40 }
 0x12d   :  { %v2139_v45 = vpop.f32.mrf.mxu1  ;;  %v10249_v46 = vpop.f32.mrf.mxu0 }
 0x12e   :  { %v11945_v47 = vadd.f32 %v2139_v45, %v2068_v44 }
 0x12f   :  { %v10254_v48 = vpop.f32.mrf.mxu1  ;;  %v2223_v49 = vpop.f32.mrf.mxu0 }
 0x130   :  { %v2224_v50 = vadd.f32 %v11934_v33, %v2223_v49 }
 0x131   :  { %v2299_v52 = vpop.f32.mrf.mxu1  ;;  %v10259_v53 = vpop.f32.mrf.mxu0 }
 0x132   :  { %v2300_v55 = vadd.f32 %v2299_v52, %v2224_v50 }
 0x133   :  { %v10264_v58 = vpop.f32.mrf.mxu1  ;;  %v2373_v1 = vpop.f32.mrf.mxu0 }
 0x134   :  { %v2374_v35 = vadd.f32 %v2373_v1, %v2300_v55 }
 0x135   :  { %v2447_v22 = vpop.f32.mrf.mxu1  ;;  %v10269_v7 = vpop.f32.mrf.mxu0 }
 0x136   :  { %v2448_v8 = vadd.f32 %v2447_v22, %v2374_v35 }
 0x137   :  { %v10274_v9 = vpop.f32.mrf.mxu1  ;;  %v2521_v10 = vpop.f32.mrf.mxu0 }
 0x138   :  { %v2522_v11 = vadd.f32 %v2521_v10, %v2448_v8 }
 0x139   :  { %v2593_v12 = vpop.f32.mrf.mxu1  ;;  %v10279_v13 = vpop.f32.mrf.mxu0 }
 0x13a   :  { %v11948_v14 = vadd.f32 %v2593_v12, %v2522_v11 }
 0x13b   :  { %v10284_v15 = vpop.f32.mrf.mxu1  ;;  %v2677_v16 = vpop.f32.mrf.mxu0 }
 0x13c   :  { %v2678_v17 = vadd.f32 %v11934_v33, %v2677_v16 }
 0x13d   :  { %v2753_v18 = vpop.f32.mrf.mxu1  ;;  %v10289_v19 = vpop.f32.mrf.mxu0 }
 0x13e   :  { %v2754_v20 = vadd.f32 %v2753_v18, %v2678_v17 }
 0x13f   :  { %v10294_v23 = vpop.f32.mrf.mxu1  ;;  %v2827_v25 = vpop.f32.mrf.mxu0 }
 0x140   :  { %v2828_v26 = vadd.f32 %v2827_v25, %v2754_v20 }
 0x141   :  { %v2901_v27 = vpop.f32.mrf.mxu1  ;;  %v10299_v28 = vpop.f32.mrf.mxu0 }
 0x142   :  { %v2902_v30 = vadd.f32 %v2901_v27, %v2828_v26 }
 0x143   :  { %v10304_v31 = vpop.f32.mrf.mxu1  ;;  %v2975_v32 = vpop.f32.mrf.mxu0 }
 0x144   :  { %v2976_v37 = vadd.f32 %v2975_v32, %v2902_v30 }
 0x145   :  { %v3047_v38 = vpop.f32.mrf.mxu1  ;;  %v10309_v39 = vpop.f32.mrf.mxu0 }
 0x146   :  { %v11951_v40 = vadd.f32 %v3047_v38, %v2976_v37 }
 0x147   :  { %v10314_v41 = vpop.f32.mrf.mxu1  ;;  %v3131_v42 = vpop.f32.mrf.mxu0 }
 0x148   :  { %v3132_v44 = vadd.f32 %v11934_v33, %v3131_v42 }
 0x149   :  { %v3207_v45 = vpop.f32.mrf.mxu1  ;;  %v10319_v46 = vpop.f32.mrf.mxu0 }
 0x14a   :  { %v3208_v48 = vadd.f32 %v3207_v45, %v3132_v44 }
 0x14b   :  { %v10324_v49 = vpop.f32.mrf.mxu1  ;;  %v3281_v50 = vpop.f32.mrf.mxu0 }
 0x14c   :  { %v3282_v52 = vadd.f32 %v3281_v50, %v3208_v48 }
 0x14d   :  { %v3355_v53 = vpop.f32.mrf.mxu1  ;;  %v10329_v55 = vpop.f32.mrf.mxu0 }
 0x14e   :  { %v3356_v58 = vadd.f32 %v3355_v53, %v3282_v52 }
 0x14f   :  { %v10334_v1 = vpop.f32.mrf.mxu1  ;;  %v3429_v35 = vpop.f32.mrf.mxu0 }
 0x150   :  { %v3430_v22 = vadd.f32 %v3429_v35, %v3356_v58 }
 0x151   :  { %v3501_v7 = vpop.f32.mrf.mxu1  ;;  %v10339_v8 = vpop.f32.mrf.mxu0 }
 0x152   :  { %v11954_v9 = vadd.f32 %v3501_v7, %v3430_v22 }
 0x153   :  { %v10344_v10 = vpop.f32.mrf.mxu1  ;;  %v3585_v11 = vpop.f32.mrf.mxu0 }
 0x154   :  { %v3586_v12 = vadd.f32 %v11934_v33, %v3585_v11 }
 0x155   :  { %v3661_v13 = vpop.f32.mrf.mxu1  ;;  %v10349_v15 = vpop.f32.mrf.mxu0 }
 0x156   :  { %v3662_v16 = vadd.f32 %v3661_v13, %v3586_v12 }
 0x157   :  { %v10354_v17 = vpop.f32.mrf.mxu1  ;;  %v3735_v18 = vpop.f32.mrf.mxu0 }
 0x158   :  { %v3736_v19 = vadd.f32 %v3735_v18, %v3662_v16 }
 0x159   :  { %v3809_v20 = vpop.f32.mrf.mxu1  ;;  %v10359_v23 = vpop.f32.mrf.mxu0 }
 0x15a   :  { %v3810_v25 = vadd.f32 %v3809_v20, %v3736_v19 }
 0x15b   :  { %v10364_v26 = vpop.f32.mrf.mxu1  ;;  %v3883_v27 = vpop.f32.mrf.mxu0 }
 0x15c   :  { %v3884_v28 = vadd.f32 %v3883_v27, %v3810_v25 }
 0x15d   :  { %v3955_v30 = vpop.f32.mrf.mxu1  ;;  %v10369_v31 = vpop.f32.mrf.mxu0 }
 0x15e   :  { %v11957_v32 = vadd.f32 %v3955_v30, %v3884_v28 }
 0x15f   :  { %v10374_v37 = vpop.f32.mrf.mxu1  ;;  %v4039_v38 = vpop.f32.mrf.mxu0 }
 0x160   :  { %v4040_v39 = vadd.f32 %v11934_v33, %v4039_v38 }
 0x161   :  { %v4115_v41 = vpop.f32.mrf.mxu1  ;;  %v10379_v42 = vpop.f32.mrf.mxu0 }
 0x162   :  { %v4116_v44 = vadd.f32 %v4115_v41, %v4040_v39 }
 0x163   :  { %v10384_v45 = vpop.f32.mrf.mxu1  ;;  %v4189_v46 = vpop.f32.mrf.mxu0 }
 0x164   :  { %v4190_v48 = vadd.f32 %v4189_v46, %v4116_v44 }
 0x165   :  { %v4263_v49 = vpop.f32.mrf.mxu1  ;;  %v10389_v50 = vpop.f32.mrf.mxu0 }
 0x166   :  { %v4264_v52 = vadd.f32 %v4263_v49, %v4190_v48 }
 0x167   :  { %v10394_v53 = vpop.f32.mrf.mxu1  ;;  %v4337_v55 = vpop.f32.mrf.mxu0 }
 0x168   :  { %v4338_v58 = vadd.f32 %v4337_v55, %v4264_v52 }
 0x169   :  { %v4409_v1 = vpop.f32.mrf.mxu1  ;;  %v10399_v35 = vpop.f32.mrf.mxu0 }
 0x16a   :  { %v11960_v22 = vadd.f32 %v4409_v1, %v4338_v58 }
 0x16b   :  { %v10404_v7 = vpop.f32.mrf.mxu1 }
 0x16f   :  { %v4492_v8 = vpop.f32.mrf.mxu0 }
 0x171   :  { %v10415_v10 = vpop.f32.mrf.mxu0 }
 0x172   :  { %v4583_v33 = vpop.f32.mrf.mxu1 }
 0x173   :  { %v4584_v15 = vadd.f32 %v4583_v33, %v4492_v8 }
 0x174   :  { %v10426_v11 = vpop.f32.mrf.mxu1 }
 0x179   :  { %v4663_v12 = vpop.f32.mrf.mxu0 }
 0x17a   :  { %v4664_v17 = vadd.f32 %v4663_v12, %v4584_v15 }
 0x17b   :  { %v10437_v13 = vpop.f32.mrf.mxu0 }
 0x17c   :  { %v4740_v16 = vpop.f32.mrf.mxu1 }
 0x17d   :  { %v4741_v19 = vadd.f32 %v4740_v16, %v4664_v17 }
 0x17e   :  { %v10448_v18 = vpop.f32.mrf.mxu1 }
 0x183   :  { %v4823_v20 = vpop.f32.mrf.mxu0 }
 0x184   :  { %v4824_v23 = vadd.f32 %v4823_v20, %v4741_v19 }
 0x185   :  { %v4898_v25 = vpop.f32.mrf.mxu1  ;;  %v10459_v26 = vpop.f32.mrf.mxu0 }
 0x186   :  { %v4899_v27 = vadd.f32 %v4898_v25, %v4824_v23 }
 0x187   :  { %v10470_v28 = vpop.f32.mrf.mxu1 }
 0x188   :  { %v4902_v30 = vadd.f32 %v4899_v27, %v11939_v29 }
 0x18a   :  { %11136 = vtanh.f32 %v4902_v30  ;;  %v9671_v37 = vmul.f32 -1.442695, %v4902_v30 }
 0x18c   :  { %11138 = vpow2.f32 %v9671_v37 }
 0x197   :  { %v11137_v31 = vpop.eup %11136 }
 0x198   :  { %4912 = vrot.lane.b32.xlu0 %v11137_v31, %s11211_s28 }
 0x199   :  { %v11139_v38 = vpop.eup %11138 }
 0x19a   :  { %v4906_v39 = vadd.f32 1.0, %v11139_v38 }
 0x19c   :  { %11140 = vrcp.f32 %v4906_v39 }
 0x1a9   :  { %v11141_v41 = vpop.eup %11140 }
 0x1aa   :  { %v4910_v45 = vmul.f32 0.0, %v11141_v41 }
 0x20a   :  { %v4913_v42 = vpop.permute.xlu0 %4912 }
 0x20b   :  { %v4915_v44 = vmul.f32 %v11141_v41, %v4913_v42 }
 0x20d   :  { %4917 = vrot.lane.b32.xlu0 %v4915_v44, %s11212_s29 }
 0x27f   :  { %v4918_v46 = vpop.permute.xlu0 %4917 }
 0x280   :  { %v11965_v48 = vadd.f32 %v4918_v46, %v4910_v45 }
 0x282   :  { %11142 = vtanh.f32 %v11965_v48 }
 0x28f   :  { %v11143_v29 = vpop.eup %11142 }
 0x290   :  { %4923 = vrot.lane.b32.xlu1 %v11143_v29, %s11211_s28 }
 0x302   :  { %v4924_v49 = vpop.permute.xlu1 %4923 }
 0x303   :  { %v4926_v50 = vmul.f32 %v11141_v41, %v4924_v49 }
 0x305   :  { %4928 = vrot.lane.b32.xlu1 %v4926_v50, %s11212_s29 }
 0x377   :  { %v4929_v52 = vpop.permute.xlu1 %4928 }
 0x378   :  { %v4930_v53 = vsel %vm4413_vm4, %v4929_v52, 0 }
 0x379   :  { %v5001_v55 = vand.u32 4294901760, %v4930_v53 }
 0x37b   :  { %v5002_v58 = vsub.f32 %v4930_v53, %v5001_v55  ;;  %10491 = vmatmul.mubr.f32.vlgmr.msra.gmra.mxu1 %v5001_v55 }
 0x37c   :  { %10505 = vmatpush3.msra.mxu1 %v11748_v51  ;;  %10512 = vmatprep.mubr.msk.f32.mxu1 %vm11210_vm3, %v11209_v34 }
 0x37d   :  { %v5003_v1 = vand.u32 4294901760, %v5002_v58  ;;  %10506 = vmatprep.subr.mxu1 %v11209_v34 }
 0x37e   :  { %10507 = vmatpush3.msra.mxu1 %v11758_v54 }
 0x37f   :  { %v5004_v35 = vsub.f32 %v5002_v58, %v5003_v1  ;;  %10508 = vmatprep.subr.mxu1 %v11209_v34 }
 0x380   :  { %10509 = vmatpush3.msra.mxu1 %v11770_v57 }
 0x381   :  { %v5005_v7 = vand.u32 4294901760, %v5004_v35  ;;  %10510 = vmatprep.subr.mxu1 %v11209_v34 }
 0x382   :  { %10511 = vmatpush3.msra.mxu1 %v11780_v60 }
 0x383   :  { %10513 = vmatmul.mubr.f32.vlgmr.msra.gmra.mxu1 %v5003_v1  ;;  %10526 = vmatprep.subr.mxu1 %v11209_v34 }
 0x384   :  { %10480 = vmatmul.mubr.f32.vlgmr.msra.gmra.mxu0 %v5005_v7  ;;  %10527 = vmatpush3.msra.mxu1 %v11748_v51 }
 0x385   :  { %10494 = vmatpush3.msra.mxu0 %v11768_v56  ;;  %10528 = vmatprep.subr.mxu1 %v11209_v34 }
 0x386   :  { %10495 = vmatprep.subr.mxu0 %v11209_v34  ;;  %10529 = vmatpush3.msra.mxu1 %v11758_v54 }
 0x387   :  { %10496 = vmatpush3.msra.mxu0 %v11778_v59  ;;  %10530 = vmatprep.subr.mxu1 %v11209_v34 }
 0x388   :  { %10497 = vmatprep.subr.mxu0 %v11209_v34  ;;  %10531 = vmatpush3.msra.mxu1 %v11770_v57 }
 0x389   :  { %10498 = vmatpush3.msra.mxu0 %v11791_v62  ;;  %10532 = vmatprep.subr.mxu1 %v11209_v34 }
 0x38a   :  { %10499 = vmatprep.subr.mxu0 %v11209_v34  ;;  %10501 = vmatprep.mubr.msk.f32.mxu0 %vm11210_vm3, %v11209_v34 }
 0x38b   :  { %10500 = vmatpush3.msra.mxu0 %v11801_v43  ;;  %10533 = vmatpush3.msra.mxu1 %v11780_v60 }
 0x38c   :  { %10534 = vmatprep.mubr.msk.f32.mxu1 %vm11210_vm3, %v11209_v34  ;;  %10502 = vmatmul.mubr.f32.vlgmr.msra.gmra.mxu0 %v5002_v58 }
 0x38d   :  { %10515 = vmatprep.subr.mxu0 %v11209_v34  ;;  %10535 = vmatmul.mubr.f32.vlgmr.msra.gmra.mxu1 %v5001_v55 }
 0x38e   :  { %10516 = vmatpush3.msra.mxu0 %v11788_v61  ;;  %10523 = vmatprep.mubr.msk.f32.mxu0 %vm11210_vm3, %v11209_v34 }
 0x38f   :  { %10517 = vmatprep.subr.mxu0 %v11209_v34  ;;  %10548 = vmatprep.subr.mxu1 %v11209_v34 }
 0x390   :  { %10518 = vmatpush3.msra.mxu0 %v11798_v63  ;;  %10549 = vmatpush3.msra.mxu1 %v11827_v3 }
 0x391   :  { %10519 = vmatprep.subr.mxu0 %v11209_v34  ;;  %10550 = vmatprep.subr.mxu1 %v11209_v34 }
 0x392   :  { %10520 = vmatpush3.msra.mxu0 %v11811_v0  ;;  %10551 = vmatpush3.msra.mxu1 %v11834_v4 }
 0x393   :  { %10521 = vmatprep.subr.mxu0 %v11209_v34  ;;  %10552 = vmatprep.subr.mxu1 %v11209_v34 }
 0x394   :  { %10522 = vmatpush3.msra.mxu0 %v11821_v2  ;;  %10553 = vmatpush3.msra.mxu1 %v11844_v5 }
 0x395   :  { %10524 = vmatmul.mubr.f32.vlgmr.msra.gmra.mxu0 %v5001_v55  ;;  %10554 = vmatprep.subr.mxu1 %v11209_v34 }
 0x396   :  { %10555 = vmatpush3.msra.mxu1 %v11850_v6  ;;  %10537 = vmatprep.subr.mxu0 %v11209_v34 }
 0x397   :  { %10556 = vmatprep.mubr.msk.f32.mxu1 %vm11210_vm3, %v11209_v34  ;;  %10570 = vmatprep.subr.mxu1 %v11209_v34 }
 0x398   :  { %10538 = vmatpush3.msra.mxu0 %v11748_v51  ;;  %10545 = vmatprep.mubr.msk.f32.mxu0 %vm11210_vm3, %v11209_v34 }
 0x399   :  { %10539 = vmatprep.subr.mxu0 %v11209_v34 }
 0x39a   :  { %10540 = vmatpush3.msra.mxu0 %v11758_v54 }
 0x39b   :  { %10541 = vmatprep.subr.mxu0 %v11209_v34 }
 0x39c   :  { %10542 = vmatpush3.msra.mxu0 %v11770_v57 }
 0x39d   :  { %10543 = vmatprep.subr.mxu0 %v11209_v34 }
 0x39e   :  { %10544 = vmatpush3.msra.mxu0 %v11780_v60 }
 0x39f   :  { %10559 = vmatprep.subr.mxu0 %v11209_v34 }
 0x43b   :  { %v5098_v8 = vpop.f32.mrf.mxu1 }
 0x43d   :  { %v10492_v10 = vpop.f32.mrf.mxu1 }
 0x443   :  { %v5255_v33 = vpop.f32.mrf.mxu1 }
 0x444   :  { %v5007_v11 = vpop.f32.mrf.mxu0 }
 0x445   :  { %v10514_v12 = vpop.f32.mrf.mxu1  ;;  %v5099_v17 = vadd.f32 %v5098_v8, %v5007_v11 }
 0x446   :  { %v10481_v13 = vpop.f32.mrf.mxu0 }
 0x44c   :  { %v5178_v15 = vpop.f32.mrf.mxu0 }
 0x44d   :  { %v5413_v16 = vpop.f32.mrf.mxu1  ;;  %v5179_v20 = vadd.f32 %v5178_v15, %v5099_v17 }
 0x44e   :  { %v10503_v18 = vpop.f32.mrf.mxu0 }
 0x44f   :  { %v10536_v19 = vpop.f32.mrf.mxu1  ;;  %v5256_v23 = vadd.f32 %v5255_v33, %v5179_v20 }
 0x455   :  { %v5338_v25 = vpop.f32.mrf.mxu0 }
 0x456   :  { %v5339_v26 = vadd.f32 %v5338_v25, %v5256_v23 }
 0x457   :  { %v10525_v27 = vpop.f32.mrf.mxu0 }
 0x458   :  { %v5414_v28 = vadd.f32 %v5413_v16, %v5339_v26 }
 0x45a   :  { %v5417_v30 = vadd.f32 %v5414_v28, %v11942_v21 }
 0x45c   :  { %11144 = vtanh.f32 %v5417_v30  ;;  %v9672_v37 = vmul.f32 -1.442695, %v5417_v30 }
 0x45e   :  { %11146 = vpow2.f32 %v9672_v37 }
 0x469   :  { %v11145_v31 = vpop.eup %11144 }
 0x46a   :  { %5427 = vrot.lane.b32.xlu0 %v11145_v31, %s11211_s28 }
 0x46b   :  { %v11147_v38 = vpop.eup %11146 }
 0x46c   :  { %v5421_v39 = vadd.f32 1.0, %v11147_v38 }
 0x46e   :  { %11148 = vrcp.f32 %v5421_v39 }
 0x47b   :  { %v11149_v41 = vpop.eup %11148 }
 0x47c   :  { %v5425_v45 = vmul.f32 %v11149_v41, %v11965_v48 }
 0x4dc   :  { %v5428_v42 = vpop.permute.xlu0 %5427 }
 0x4dd   :  { %v5430_v44 = vmul.f32 %v11149_v41, %v5428_v42 }
 0x4df   :  { %5432 = vrot.lane.b32.xlu1 %v5430_v44, %s11212_s29 }
 0x551   :  { %v5433_v46 = vpop.permute.xlu1 %5432 }
 0x552   :  { %v12035_v29 = vadd.f32 %v5433_v46, %v5425_v45 }
 0x554   :  { %11150 = vtanh.f32 %v12035_v29 }
 0x561   :  { %v11151_v21 = vpop.eup %11150 }
 0x562   :  { %5438 = vrot.lane.b32.xlu0 %v11151_v21, %s11211_s28 }
 0x5d4   :  { %v5439_v49 = vpop.permute.xlu0 %5438 }
 0x5d5   :  { %v5441_v50 = vmul.f32 %v11149_v41, %v5439_v49 }
 0x5d7   :  { %5443 = vrot.lane.b32.xlu1 %v5441_v50, %s11212_s29 }
 0x649   :  { %v5444_v52 = vpop.permute.xlu1 %5443 }
 0x64a   :  { %v5445_v53 = vsel %vm4413_vm4, %v5444_v52, 0 }
 0x64b   :  { %v5516_v55 = vand.u32 4294901760, %v5445_v53 }
 0x64d   :  { %v5517_v58 = vsub.f32 %v5445_v53, %v5516_v55  ;;  %10557 = vmatmul.mubr.f32.vlgmr.msra.gmra.mxu1 %v5516_v55 }
 0x64e   :  { %10571 = vmatpush3.msra.mxu1 %v11748_v51  ;;  %10578 = vmatprep.mubr.msk.f32.mxu1 %vm11210_vm3, %v11209_v34 }
 0x64f   :  { %v5518_v48 = vand.u32 4294901760, %v5517_v58  ;;  %10572 = vmatprep.subr.mxu1 %v11209_v34 }
 0x650   :  { %10573 = vmatpush3.msra.mxu1 %v11758_v54 }
 0x651   :  { %v5519_v1 = vsub.f32 %v5517_v58, %v5518_v48  ;;  %10574 = vmatprep.subr.mxu1 %v11209_v34 }
 0x652   :  { %10575 = vmatpush3.msra.mxu1 %v11770_v57 }
 0x653   :  { %v5520_v35 = vand.u32 4294901760, %v5519_v1  ;;  %10576 = vmatprep.subr.mxu1 %v11209_v34 }
 0x654   :  { %10577 = vmatpush3.msra.mxu1 %v11780_v60 }
 0x655   :  { %10579 = vmatmul.mubr.f32.vlgmr.msra.gmra.mxu1 %v5518_v48  ;;  %10592 = vmatprep.subr.mxu1 %v11209_v34 }
 0x656   :  { %10546 = vmatmul.mubr.f32.vlgmr.msra.gmra.mxu0 %v5520_v35  ;;  %10593 = vmatpush3.msra.mxu1 %v11748_v51 }
 0x657   :  { %10560 = vmatpush3.msra.mxu0 %v11768_v56  ;;  %10594 = vmatprep.subr.mxu1 %v11209_v34 }
 0x658   :  { %10561 = vmatprep.subr.mxu0 %v11209_v34  ;;  %10595 = vmatpush3.msra.mxu1 %v11758_v54 }
 0x659   :  { %10562 = vmatpush3.msra.mxu0 %v11778_v59  ;;  %10596 = vmatprep.subr.mxu1 %v11209_v34 }
 0x65a   :  { %10563 = vmatprep.subr.mxu0 %v11209_v34  ;;  %10597 = vmatpush3.msra.mxu1 %v11770_v57 }
 0x65b   :  { %10564 = vmatpush3.msra.mxu0 %v11791_v62  ;;  %10598 = vmatprep.subr.mxu1 %v11209_v34 }
 0x65c   :  { %10565 = vmatprep.subr.mxu0 %v11209_v34  ;;  %10567 = vmatprep.mubr.msk.f32.mxu0 %vm11210_vm3, %v11209_v34 }
 0x65d   :  { %10566 = vmatpush3.msra.mxu0 %v11801_v43  ;;  %10599 = vmatpush3.msra.mxu1 %v11780_v60 }
 0x65e   :  { %10600 = vmatprep.mubr.msk.f32.mxu1 %vm11210_vm3, %v11209_v34  ;;  %10568 = vmatmul.mubr.f32.vlgmr.msra.gmra.mxu0 %v5517_v58 }
 0x65f   :  { %10581 = vmatprep.subr.mxu0 %v11209_v34  ;;  %10601 = vmatmul.mubr.f32.vlgmr.msra.gmra.mxu1 %v5516_v55 }
 0x660   :  { %10582 = vmatpush3.msra.mxu0 %v11788_v61  ;;  %10589 = vmatprep.mubr.msk.f32.mxu0 %vm11210_vm3, %v11209_v34 }
 0x661   :  { %10583 = vmatprep.subr.mxu0 %v11209_v34  ;;  %10614 = vmatprep.subr.mxu1 %v11209_v34 }
 0x662   :  { %10584 = vmatpush3.msra.mxu0 %v11798_v63  ;;  %10615 = vmatpush3.msra.mxu1 %v11827_v3 }
 0x663   :  { %10585 = vmatprep.subr.mxu0 %v11209_v34  ;;  %10616 = vmatprep.subr.mxu1 %v11209_v34 }
 0x664   :  { %10586 = vmatpush3.msra.mxu0 %v11811_v0  ;;  %10617 = vmatpush3.msra.mxu1 %v11834_v4 }
 0x665   :  { %10587 = vmatprep.subr.mxu0 %v11209_v34  ;;  %10618 = vmatprep.subr.mxu1 %v11209_v34 }
 0x666   :  { %10588 = vmatpush3.msra.mxu0 %v11821_v2  ;;  %10619 = vmatpush3.msra.mxu1 %v11844_v5 }
 0x667   :  { %10590 = vmatmul.mubr.f32.vlgmr.msra.gmra.mxu0 %v5516_v55  ;;  %10620 = vmatprep.subr.mxu1 %v11209_v34 }
 0x668   :  { %10621 = vmatpush3.msra.mxu1 %v11850_v6  ;;  %10603 = vmatprep.subr.mxu0 %v11209_v34 }
 0x669   :  { %10622 = vmatprep.mubr.msk.f32.mxu1 %vm11210_vm3, %v11209_v34  ;;  %10636 = vmatprep.subr.mxu1 %v11209_v34 }
 0x66a   :  { %10604 = vmatpush3.msra.mxu0 %v11748_v51  ;;  %10611 = vmatprep.mubr.msk.f32.mxu0 %vm11210_vm3, %v11209_v34 }
 0x66b   :  { %10605 = vmatprep.subr.mxu0 %v11209_v34 }
 0x66c   :  { %10606 = vmatpush3.msra.mxu0 %v11758_v54 }
 0x66d   :  { %10607 = vmatprep.subr.mxu0 %v11209_v34 }
 0x66e   :  { %10608 = vmatpush3.msra.mxu0 %v11770_v57 }
 0x66f   :  { %10609 = vmatprep.subr.mxu0 %v11209_v34 }
 0x670   :  { %10610 = vmatpush3.msra.mxu0 %v11780_v60 }
 0x671   :  { %10625 = vmatprep.subr.mxu0 %v11209_v34 }
 0x70d   :  { %v5613_v7 = vpop.f32.mrf.mxu1 }
 0x70f   :  { %v10558_v8 = vpop.f32.mrf.mxu1 }
 0x715   :  { %v5770_v10 = vpop.f32.mrf.mxu1 }
 0x716   :  { %v5522_v33 = vpop.f32.mrf.mxu0 }
 0x717   :  { %v10580_v11 = vpop.f32.mrf.mxu1  ;;  %v5614_v16 = vadd.f32 %v5613_v7, %v5522_v33 }
 0x718   :  { %v10547_v12 = vpop.f32.mrf.mxu0 }
 0x71e   :  { %v5693_v13 = vpop.f32.mrf.mxu0 }
 0x71f   :  { %v5928_v15 = vpop.f32.mrf.mxu1  ;;  %v5694_v19 = vadd.f32 %v5693_v13, %v5614_v16 }
 0x720   :  { %v10569_v17 = vpop.f32.mrf.mxu0 }
 0x721   :  { %v10602_v18 = vpop.f32.mrf.mxu1  ;;  %v5771_v20 = vadd.f32 %v5770_v10, %v5694_v19 }
 0x727   :  { %v5853_v23 = vpop.f32.mrf.mxu0 }
 0x728   :  { %v5854_v25 = vadd.f32 %v5853_v23, %v5771_v20 }
 0x729   :  { %v10591_v26 = vpop.f32.mrf.mxu0 }
 0x72a   :  { %v5929_v27 = vadd.f32 %v5928_v15, %v5854_v25 }
 0x72c   :  { %v5932_v28 = vadd.f32 %v5929_v27, %v11945_v47 }
 0x72e   :  { %11152 = vtanh.f32 %v5932_v28  ;;  %v9673_v31 = vmul.f32 -1.442695, %v5932_v28 }
 0x730   :  { %11154 = vpow2.f32 %v9673_v31 }
 0x73b   :  { %v11153_v30 = vpop.eup %11152 }
 0x73c   :  { %5942 = vrot.lane.b32.xlu0 %v11153_v30, %s11211_s28 }
 0x73d   :  { %v11155_v37 = vpop.eup %11154 }
 0x73e   :  { %v5936_v38 = vadd.f32 1.0, %v11155_v37 }
 0x740   :  { %11156 = vrcp.f32 %v5936_v38 }
 0x74d   :  { %v11157_v39 = vpop.eup %11156 }
 0x74e   :  { %v5940_v44 = vmul.f32 %v11157_v39, %v12035_v29 }
 0x7ae   :  { %v5943_v41 = vpop.permute.xlu0 %5942 }
 0x7af   :  { %v5945_v42 = vmul.f32 %v11157_v39, %v5943_v41 }
 0x7b1   :  { %5947 = vrot.lane.b32.xlu1 %v5945_v42, %s11212_s29 }
 0x823   :  { %v5948_v45 = vpop.permute.xlu1 %5947 }
 0x824   :  { %v12105_v46 = vadd.f32 %v5948_v45, %v5940_v44 }
 0x826   :  { %11158 = vtanh.f32 %v12105_v46 }
 0x833   :  { %v11159_v47 = vpop.eup %11158 }
 0x834   :  { %5953 = vrot.lane.b32.xlu0 %v11159_v47, %s11211_s28 }
 0x8a6   :  { %v5954_v21 = vpop.permute.xlu0 %5953 }
 0x8a7   :  { %v5956_v49 = vmul.f32 %v11157_v39, %v5954_v21 }
 0x8a9   :  { %5958 = vrot.lane.b32.xlu1 %v5956_v49, %s11212_s29 }
 0x91b   :  { %v5959_v50 = vpop.permute.xlu1 %5958 }
 0x91c   :  { %v5960_v52 = vsel %vm4413_vm4, %v5959_v50, 0 }
 0x91d   :  { %v6031_v53 = vand.u32 4294901760, %v5960_v52 }
 0x91f   :  { %v6032_v55 = vsub.f32 %v5960_v52, %v6031_v53  ;;  %10623 = vmatmul.mubr.f32.vlgmr.msra.gmra.mxu1 %v6031_v53 }
 0x920   :  { %10637 = vmatpush3.msra.mxu1 %v11748_v51  ;;  %10644 = vmatprep.mubr.msk.f32.mxu1 %vm11210_vm3, %v11209_v34 }
 0x921   :  { %v6033_v29 = vand.u32 4294901760, %v6032_v55  ;;  %10638 = vmatprep.subr.mxu1 %v11209_v34 }
 0x922   :  { %10639 = vmatpush3.msra.mxu1 %v11758_v54 }
 0x923   :  { %v6034_v58 = vsub.f32 %v6032_v55, %v6033_v29  ;;  %10640 = vmatprep.subr.mxu1 %v11209_v34 }
 0x924   :  { %10641 = vmatpush3.msra.mxu1 %v11770_v57 }
 0x925   :  { %v6035_v48 = vand.u32 4294901760, %v6034_v58  ;;  %10642 = vmatprep.subr.mxu1 %v11209_v34 }
 0x926   :  { %10643 = vmatpush3.msra.mxu1 %v11780_v60 }
 0x927   :  { %10645 = vmatmul.mubr.f32.vlgmr.msra.gmra.mxu1 %v6033_v29  ;;  %10658 = vmatprep.subr.mxu1 %v11209_v34 }
 0x928   :  { %10612 = vmatmul.mubr.f32.vlgmr.msra.gmra.mxu0 %v6035_v48  ;;  %10659 = vmatpush3.msra.mxu1 %v11748_v51 }
 0x929   :  { %10626 = vmatpush3.msra.mxu0 %v11768_v56  ;;  %10660 = vmatprep.subr.mxu1 %v11209_v34 }
 0x92a   :  { %10627 = vmatprep.subr.mxu0 %v11209_v34  ;;  %10661 = vmatpush3.msra.mxu1 %v11758_v54 }
 0x92b   :  { %10628 = vmatpush3.msra.mxu0 %v11778_v59  ;;  %10662 = vmatprep.subr.mxu1 %v11209_v34 }
 0x92c   :  { %10629 = vmatprep.subr.mxu0 %v11209_v34  ;;  %10663 = vmatpush3.msra.mxu1 %v11770_v57 }
 0x92d   :  { %10630 = vmatpush3.msra.mxu0 %v11791_v62  ;;  %10664 = vmatprep.subr.mxu1 %v11209_v34 }
 0x92e   :  { %10631 = vmatprep.subr.mxu0 %v11209_v34  ;;  %10633 = vmatprep.mubr.msk.f32.mxu0 %vm11210_vm3, %v11209_v34 }
 0x92f   :  { %10632 = vmatpush3.msra.mxu0 %v11801_v43  ;;  %10665 = vmatpush3.msra.mxu1 %v11780_v60 }
 0x930   :  { %10666 = vmatprep.mubr.msk.f32.mxu1 %vm11210_vm3, %v11209_v34  ;;  %10634 = vmatmul.mubr.f32.vlgmr.msra.gmra.mxu0 %v6032_v55 }
 0x931   :  { %10647 = vmatprep.subr.mxu0 %v11209_v34  ;;  %10667 = vmatmul.mubr.f32.vlgmr.msra.gmra.mxu1 %v6031_v53 }
 0x932   :  { %10648 = vmatpush3.msra.mxu0 %v11788_v61  ;;  %10655 = vmatprep.mubr.msk.f32.mxu0 %vm11210_vm3, %v11209_v34 }
 0x933   :  { %10649 = vmatprep.subr.mxu0 %v11209_v34  ;;  %10680 = vmatprep.subr.mxu1 %v11209_v34 }
 0x934   :  { %10650 = vmatpush3.msra.mxu0 %v11798_v63  ;;  %10681 = vmatpush3.msra.mxu1 %v11827_v3 }
 0x935   :  { %10651 = vmatprep.subr.mxu0 %v11209_v34  ;;  %10682 = vmatprep.subr.mxu1 %v11209_v34 }
 0x936   :  { %10652 = vmatpush3.msra.mxu0 %v11811_v0  ;;  %10683 = vmatpush3.msra.mxu1 %v11834_v4 }
 0x937   :  { %10653 = vmatprep.subr.mxu0 %v11209_v34  ;;  %10684 = vmatprep.subr.mxu1 %v11209_v34 }
 0x938   :  { %10654 = vmatpush3.msra.mxu0 %v11821_v2  ;;  %10685 = vmatpush3.msra.mxu1 %v11844_v5 }
 0x939   :  { %10656 = vmatmul.mubr.f32.vlgmr.msra.gmra.mxu0 %v6031_v53  ;;  %10686 = vmatprep.subr.mxu1 %v11209_v34 }
 0x93a   :  { %10687 = vmatpush3.msra.mxu1 %v11850_v6  ;;  %10669 = vmatprep.subr.mxu0 %v11209_v34 }
 0x93b   :  { %10688 = vmatprep.mubr.msk.f32.mxu1 %vm11210_vm3, %v11209_v34  ;;  %10702 = vmatprep.subr.mxu1 %v11209_v34 }
 0x93c   :  { %10670 = vmatpush3.msra.mxu0 %v11748_v51  ;;  %10677 = vmatprep.mubr.msk.f32.mxu0 %vm11210_vm3, %v11209_v34 }
 0x93d   :  { %10671 = vmatprep.subr.mxu0 %v11209_v34 }
 0x93e   :  { %10672 = vmatpush3.msra.mxu0 %v11758_v54 }
 0x93f   :  { %10673 = vmatprep.subr.mxu0 %v11209_v34 }
 0x940   :  { %10674 = vmatpush3.msra.mxu0 %v11770_v57 }
 0x941   :  { %10675 = vmatprep.subr.mxu0 %v11209_v34 }
 0x942   :  { %10676 = vmatpush3.msra.mxu0 %v11780_v60 }
 0x943   :  { %10691 = vmatprep.subr.mxu0 %v11209_v34 }
 0x9df   :  { %v6128_v1 = vpop.f32.mrf.mxu1 }
 0x9e1   :  { %v10624_v35 = vpop.f32.mrf.mxu1 }
 0x9e7   :  { %v6285_v7 = vpop.f32.mrf.mxu1 }
 0x9e8   :  { %v6037_v8 = vpop.f32.mrf.mxu0 }
 0x9e9   :  { %v10646_v10 = vpop.f32.mrf.mxu1  ;;  %v6129_v13 = vadd.f32 %v6128_v1, %v6037_v8 }
 0x9ea   :  { %v10613_v33 = vpop.f32.mrf.mxu0 }
 0x9f0   :  { %v6208_v11 = vpop.f32.mrf.mxu0 }
 0x9f1   :  { %v6443_v12 = vpop.f32.mrf.mxu1  ;;  %v6209_v17 = vadd.f32 %v6208_v11, %v6129_v13 }
 0x9f2   :  { %v10635_v15 = vpop.f32.mrf.mxu0 }
 0x9f3   :  { %v10668_v16 = vpop.f32.mrf.mxu1  ;;  %v6286_v18 = vadd.f32 %v6285_v7, %v6209_v17 }
 0x9f9   :  { %v6368_v19 = vpop.f32.mrf.mxu0 }
 0x9fa   :  { %v6369_v20 = vadd.f32 %v6368_v19, %v6286_v18 }
 0x9fb   :  { %v10657_v23 = vpop.f32.mrf.mxu0 }
 0x9fc   :  { %v6444_v25 = vadd.f32 %v6443_v12, %v6369_v20 }
 0x9fe   :  { %v6447_v26 = vadd.f32 %v6444_v25, %v11948_v14 }
 0xa00   :  { %11160 = vtanh.f32 %v6447_v26  ;;  %v9674_v28 = vmul.f32 -1.442695, %v6447_v26 }
 0xa02   :  { %11162 = vpow2.f32 %v9674_v28 }
 0xa0d   :  { %v11161_v27 = vpop.eup %11160 }
 0xa0e   :  { %6457 = vrot.lane.b32.xlu0 %v11161_v27, %s11211_s28 }
 0xa0f   :  { %v11163_v30 = vpop.eup %11162 }
 0xa10   :  { %v6451_v31 = vadd.f32 1.0, %v11163_v30 }
 0xa12   :  { %11164 = vrcp.f32 %v6451_v31 }
 0xa1f   :  { %v11165_v37 = vpop.eup %11164 }
 0xa20   :  { %v6455_v41 = vmul.f32 %v11165_v37, %v12105_v46 }
 0xa80   :  { %v6458_v38 = vpop.permute.xlu0 %6457 }
 0xa81   :  { %v6460_v39 = vmul.f32 %v11165_v37, %v6458_v38 }
 0xa83   :  { %6462 = vrot.lane.b32.xlu1 %v6460_v39, %s11212_s29 }
 0xaf5   :  { %v6463_v42 = vpop.permute.xlu1 %6462 }
 0xaf6   :  { %v12175_v44 = vadd.f32 %v6463_v42, %v6455_v41 }
 0xaf8   :  { %11166 = vtanh.f32 %v12175_v44 }
 0xb05   :  { %v11167_v14 = vpop.eup %11166 }
 0xb06   :  { %6468 = vrot.lane.b32.xlu0 %v11167_v14, %s11211_s28 }
 0xb78   :  { %v6469_v45 = vpop.permute.xlu0 %6468 }
 0xb79   :  { %v6471_v47 = vmul.f32 %v11165_v37, %v6469_v45 }
 0xb7b   :  { %6473 = vrot.lane.b32.xlu1 %v6471_v47, %s11212_s29 }
 0xbed   :  { %v6474_v21 = vpop.permute.xlu1 %6473 }
 0xbee   :  { %v6475_v49 = vsel %vm4413_vm4, %v6474_v21, 0 }
 0xbef   :  { %v6546_v50 = vand.u32 4294901760, %v6475_v49 }
 0xbf1   :  { %v6547_v52 = vsub.f32 %v6475_v49, %v6546_v50  ;;  %10689 = vmatmul.mubr.f32.vlgmr.msra.gmra.mxu1 %v6546_v50 }
 0xbf2   :  { %10703 = vmatpush3.msra.mxu1 %v11748_v51  ;;  %10710 = vmatprep.mubr.msk.f32.mxu1 %vm11210_vm3, %v11209_v34 }
 0xbf3   :  { %v6548_v46 = vand.u32 4294901760, %v6547_v52  ;;  %10704 = vmatprep.subr.mxu1 %v11209_v34 }
 0xbf4   :  { %10705 = vmatpush3.msra.mxu1 %v11758_v54 }
 0xbf5   :  { %v6549_v53 = vsub.f32 %v6547_v52, %v6548_v46  ;;  %10706 = vmatprep.subr.mxu1 %v11209_v34 }
 0xbf6   :  { %10707 = vmatpush3.msra.mxu1 %v11770_v57 }
 0xbf7   :  { %v6550_v55 = vand.u32 4294901760, %v6549_v53  ;;  %10708 = vmatprep.subr.mxu1 %v11209_v34 }
 0xbf8   :  { %10709 = vmatpush3.msra.mxu1 %v11780_v60 }
 0xbf9   :  { %10711 = vmatmul.mubr.f32.vlgmr.msra.gmra.mxu1 %v6548_v46  ;;  %10724 = vmatprep.subr.mxu1 %v11209_v34 }
 0xbfa   :  { %10678 = vmatmul.mubr.f32.vlgmr.msra.gmra.mxu0 %v6550_v55  ;;  %10725 = vmatpush3.msra.mxu1 %v11748_v51 }
 0xbfb   :  { %10692 = vmatpush3.msra.mxu0 %v11768_v56  ;;  %10726 = vmatprep.subr.mxu1 %v11209_v34 }
 0xbfc   :  { %10693 = vmatprep.subr.mxu0 %v11209_v34  ;;  %10727 = vmatpush3.msra.mxu1 %v11758_v54 }
 0xbfd   :  { %10694 = vmatpush3.msra.mxu0 %v11778_v59  ;;  %10728 = vmatprep.subr.mxu1 %v11209_v34 }
 0xbfe   :  { %10695 = vmatprep.subr.mxu0 %v11209_v34  ;;  %10729 = vmatpush3.msra.mxu1 %v11770_v57 }
 0xbff   :  { %10696 = vmatpush3.msra.mxu0 %v11791_v62  ;;  %10730 = vmatprep.subr.mxu1 %v11209_v34 }
 0xc00   :  { %10697 = vmatprep.subr.mxu0 %v11209_v34  ;;  %10699 = vmatprep.mubr.msk.f32.mxu0 %vm11210_vm3, %v11209_v34 }
 0xc01   :  { %10698 = vmatpush3.msra.mxu0 %v11801_v43  ;;  %10731 = vmatpush3.msra.mxu1 %v11780_v60 }
 0xc02   :  { %10732 = vmatprep.mubr.msk.f32.mxu1 %vm11210_vm3, %v11209_v34  ;;  %10700 = vmatmul.mubr.f32.vlgmr.msra.gmra.mxu0 %v6547_v52 }
 0xc03   :  { %10713 = vmatprep.subr.mxu0 %v11209_v34  ;;  %10733 = vmatmul.mubr.f32.vlgmr.msra.gmra.mxu1 %v6546_v50 }
 0xc04   :  { %10714 = vmatpush3.msra.mxu0 %v11788_v61  ;;  %10721 = vmatprep.mubr.msk.f32.mxu0 %vm11210_vm3, %v11209_v34 }
 0xc05   :  { %10715 = vmatprep.subr.mxu0 %v11209_v34  ;;  %10746 = vmatprep.subr.mxu1 %v11209_v34 }
 0xc06   :  { %10716 = vmatpush3.msra.mxu0 %v11798_v63  ;;  %10747 = vmatpush3.msra.mxu1 %v11827_v3 }
 0xc07   :  { %10717 = vmatprep.subr.mxu0 %v11209_v34  ;;  %10748 = vmatprep.subr.mxu1 %v11209_v34 }
 0xc08   :  { %10718 = vmatpush3.msra.mxu0 %v11811_v0  ;;  %10749 = vmatpush3.msra.mxu1 %v11834_v4 }
 0xc09   :  { %10719 = vmatprep.subr.mxu0 %v11209_v34  ;;  %10750 = vmatprep.subr.mxu1 %v11209_v34 }
 0xc0a   :  { %10720 = vmatpush3.msra.mxu0 %v11821_v2  ;;  %10751 = vmatpush3.msra.mxu1 %v11844_v5 }
 0xc0b   :  { %10722 = vmatmul.mubr.f32.vlgmr.msra.gmra.mxu0 %v6546_v50  ;;  %10752 = vmatprep.subr.mxu1 %v11209_v34 }
 0xc0c   :  { %10753 = vmatpush3.msra.mxu1 %v11850_v6  ;;  %10735 = vmatprep.subr.mxu0 %v11209_v34 }
 0xc0d   :  { %10754 = vmatprep.mubr.msk.f32.mxu1 %vm11210_vm3, %v11209_v34  ;;  %10768 = vmatprep.subr.mxu1 %v11209_v34 }
 0xc0e   :  { %10736 = vmatpush3.msra.mxu0 %v11748_v51  ;;  %10743 = vmatprep.mubr.msk.f32.mxu0 %vm11210_vm3, %v11209_v34 }
 0xc0f   :  { %10737 = vmatprep.subr.mxu0 %v11209_v34 }
 0xc10   :  { %10738 = vmatpush3.msra.mxu0 %v11758_v54 }
 0xc11   :  { %10739 = vmatprep.subr.mxu0 %v11209_v34 }
 0xc12   :  { %10740 = vmatpush3.msra.mxu0 %v11770_v57 }
 0xc13   :  { %10741 = vmatprep.subr.mxu0 %v11209_v34 }
 0xc14   :  { %10742 = vmatpush3.msra.mxu0 %v11780_v60 }
 0xc15   :  { %10757 = vmatprep.subr.mxu0 %v11209_v34 }
 0xcb1   :  { %v6643_v29 = vpop.f32.mrf.mxu1 }
 0xcb3   :  { %v10690_v58 = vpop.f32.mrf.mxu1 }
 0xcb9   :  { %v6800_v48 = vpop.f32.mrf.mxu1 }
 0xcba   :  { %v6552_v1 = vpop.f32.mrf.mxu0 }
 0xcbb   :  { %v10712_v35 = vpop.f32.mrf.mxu1  ;;  %v6644_v33 = vadd.f32 %v6643_v29, %v6552_v1 }
 0xcbc   :  { %v10679_v7 = vpop.f32.mrf.mxu0 }
 0xcc2   :  { %v6723_v8 = vpop.f32.mrf.mxu0 }
 0xcc3   :  { %v6958_v10 = vpop.f32.mrf.mxu1  ;;  %v6724_v13 = vadd.f32 %v6723_v8, %v6644_v33 }
 0xcc4   :  { %v10701_v11 = vpop.f32.mrf.mxu0 }
 0xcc5   :  { %v10734_v12 = vpop.f32.mrf.mxu1  ;;  %v6801_v15 = vadd.f32 %v6800_v48, %v6724_v13 }
 0xccb   :  { %v6883_v16 = vpop.f32.mrf.mxu0 }
 0xccc   :  { %v6884_v17 = vadd.f32 %v6883_v16, %v6801_v15 }
 0xccd   :  { %v10723_v18 = vpop.f32.mrf.mxu0 }
 0xcce   :  { %v6959_v19 = vadd.f32 %v6958_v10, %v6884_v17 }
 0xcd0   :  { %v6962_v20 = vadd.f32 %v6959_v19, %v11951_v40 }
 0xcd2   :  { %11168 = vtanh.f32 %v6962_v20  ;;  %v9675_v25 = vmul.f32 -1.442695, %v6962_v20 }
 0xcd4   :  { %11170 = vpow2.f32 %v9675_v25 }
 0xcdf   :  { %v11169_v23 = vpop.eup %11168 }
 0xce0   :  { %6972 = vrot.lane.b32.xlu0 %v11169_v23, %s11211_s28 }
 0xce1   :  { %v11171_v26 = vpop.eup %11170 }
 0xce2   :  { %v6966_v27 = vadd.f32 1.0, %v11171_v26 }
 0xce4   :  { %11172 = vrcp.f32 %v6966_v27 }
 0xcf1   :  { %v11173_v28 = vpop.eup %11172 }
 0xcf2   :  { %v6970_v37 = vmul.f32 %v11173_v28, %v12175_v44 }
 0xd52   :  { %v6973_v30 = vpop.permute.xlu0 %6972 }
 0xd53   :  { %v6975_v31 = vmul.f32 %v11173_v28, %v6973_v30 }
 0xd55   :  { %6977 = vrot.lane.b32.xlu1 %v6975_v31, %s11212_s29 }
 0xdc7   :  { %v6978_v38 = vpop.permute.xlu1 %6977 }
 0xdc8   :  { %v12245_v39 = vadd.f32 %v6978_v38, %v6970_v37 }
 0xdca   :  { %11174 = vtanh.f32 %v12245_v39 }
 0xdd7   :  { %v11175_v40 = vpop.eup %11174 }
 0xdd8   :  { %6983 = vrot.lane.b32.xlu0 %v11175_v40, %s11211_s28 }
 0xe4a   :  { %v6984_v41 = vpop.permute.xlu0 %6983 }
 0xe4b   :  { %v6986_v42 = vmul.f32 %v11173_v28, %v6984_v41 }
 0xe4d   :  { %6988 = vrot.lane.b32.xlu1 %v6986_v42, %s11212_s29 }
 0xebf   :  { %v6989_v14 = vpop.permute.xlu1 %6988 }
 0xec0   :  { %v6990_v45 = vsel %vm4413_vm4, %v6989_v14, 0 }
 0xec1   :  { %v7061_v47 = vand.u32 4294901760, %v6990_v45 }
 0xec3   :  { %v7062_v21 = vsub.f32 %v6990_v45, %v7061_v47  ;;  %10755 = vmatmul.mubr.f32.vlgmr.msra.gmra.mxu1 %v7061_v47 }
 0xec4   :  { %10769 = vmatpush3.msra.mxu1 %v11748_v51  ;;  %10776 = vmatprep.mubr.msk.f32.mxu1 %vm11210_vm3, %v11209_v34 }
 0xec5   :  { %v7063_v44 = vand.u32 4294901760, %v7062_v21  ;;  %10770 = vmatprep.subr.mxu1 %v11209_v34 }
 0xec6   :  { %10771 = vmatpush3.msra.mxu1 %v11758_v54 }
 0xec7   :  { %v7064_v49 = vsub.f32 %v7062_v21, %v7063_v44  ;;  %10772 = vmatprep.subr.mxu1 %v11209_v34 }
 0xec8   :  { %10773 = vmatpush3.msra.mxu1 %v11770_v57 }
 0xec9   :  { %v7065_v50 = vand.u32 4294901760, %v7064_v49  ;;  %10774 = vmatprep.subr.mxu1 %v11209_v34 }
 0xeca   :  { %10775 = vmatpush3.msra.mxu1 %v11780_v60 }
 0xecb   :  { %10777 = vmatmul.mubr.f32.vlgmr.msra.gmra.mxu1 %v7063_v44  ;;  %10790 = vmatprep.subr.mxu1 %v11209_v34 }
 0xecc   :  { %10744 = vmatmul.mubr.f32.vlgmr.msra.gmra.mxu0 %v7065_v50  ;;  %10791 = vmatpush3.msra.mxu1 %v11748_v51 }
 0xecd   :  { %10758 = vmatpush3.msra.mxu0 %v11768_v56  ;;  %10792 = vmatprep.subr.mxu1 %v11209_v34 }
 0xece   :  { %10759 = vmatprep.subr.mxu0 %v11209_v34  ;;  %10793 = vmatpush3.msra.mxu1 %v11758_v54 }
 0xecf   :  { %10760 = vmatpush3.msra.mxu0 %v11778_v59  ;;  %10794 = vmatprep.subr.mxu1 %v11209_v34 }
 0xed0   :  { %10761 = vmatprep.subr.mxu0 %v11209_v34  ;;  %10795 = vmatpush3.msra.mxu1 %v11770_v57 }
 0xed1   :  { %10762 = vmatpush3.msra.mxu0 %v11791_v62  ;;  %10796 = vmatprep.subr.mxu1 %v11209_v34 }
 0xed2   :  { %10763 = vmatprep.subr.mxu0 %v11209_v34  ;;  %10765 = vmatprep.mubr.msk.f32.mxu0 %vm11210_vm3, %v11209_v34 }
 0xed3   :  { %10764 = vmatpush3.msra.mxu0 %v11801_v43  ;;  %10797 = vmatpush3.msra.mxu1 %v11780_v60 }
 0xed4   :  { %10798 = vmatprep.mubr.msk.f32.mxu1 %vm11210_vm3, %v11209_v34  ;;  %10766 = vmatmul.mubr.f32.vlgmr.msra.gmra.mxu0 %v7062_v21 }
 0xed5   :  { %10779 = vmatprep.subr.mxu0 %v11209_v34  ;;  %10799 = vmatmul.mubr.f32.vlgmr.msra.gmra.mxu1 %v7061_v47 }
 0xed6   :  { %10780 = vmatpush3.msra.mxu0 %v11788_v61  ;;  %10787 = vmatprep.mubr.msk.f32.mxu0 %vm11210_vm3, %v11209_v34 }
 0xed7   :  { %10781 = vmatprep.subr.mxu0 %v11209_v34  ;;  %10812 = vmatprep.subr.mxu1 %v11209_v34 }
 0xed8   :  { %10782 = vmatpush3.msra.mxu0 %v11798_v63  ;;  %10813 = vmatpush3.msra.mxu1 %v11827_v3 }
 0xed9   :  { %10783 = vmatprep.subr.mxu0 %v11209_v34  ;;  %10814 = vmatprep.subr.mxu1 %v11209_v34 }
 0xeda   :  { %10784 = vmatpush3.msra.mxu0 %v11811_v0  ;;  %10815 = vmatpush3.msra.mxu1 %v11834_v4 }
 0xedb   :  { %10785 = vmatprep.subr.mxu0 %v11209_v34  ;;  %10816 = vmatprep.subr.mxu1 %v11209_v34 }
 0xedc   :  { %10786 = vmatpush3.msra.mxu0 %v11821_v2  ;;  %10817 = vmatpush3.msra.mxu1 %v11844_v5 }
 0xedd   :  { %10788 = vmatmul.mubr.f32.vlgmr.msra.gmra.mxu0 %v7061_v47  ;;  %10818 = vmatprep.subr.mxu1 %v11209_v34 }
 0xede   :  { %10819 = vmatpush3.msra.mxu1 %v11850_v6  ;;  %10801 = vmatprep.subr.mxu0 %v11209_v34 }
 0xedf   :  { %10820 = vmatprep.mubr.msk.f32.mxu1 %vm11210_vm3, %v11209_v34  ;;  %10834 = vmatprep.subr.mxu1 %v11209_v34 }
 0xee0   :  { %10802 = vmatpush3.msra.mxu0 %v11748_v51  ;;  %10809 = vmatprep.mubr.msk.f32.mxu0 %vm11210_vm3, %v11209_v34 }
 0xee1   :  { %10803 = vmatprep.subr.mxu0 %v11209_v34 }
 0xee2   :  { %10804 = vmatpush3.msra.mxu0 %v11758_v54 }
 0xee3   :  { %10805 = vmatprep.subr.mxu0 %v11209_v34 }
 0xee4   :  { %10806 = vmatpush3.msra.mxu0 %v11770_v57 }
 0xee5   :  { %10807 = vmatprep.subr.mxu0 %v11209_v34 }
 0xee6   :  { %10808 = vmatpush3.msra.mxu0 %v11780_v60 }
 0xee7   :  { %10823 = vmatprep.subr.mxu0 %v11209_v34 }
 0xf83   :  { %v7158_v52 = vpop.f32.mrf.mxu1 }
 0xf85   :  { %v10756_v46 = vpop.f32.mrf.mxu1 }
 0xf8b   :  { %v7315_v53 = vpop.f32.mrf.mxu1 }
 0xf8c   :  { %v7067_v55 = vpop.f32.mrf.mxu0 }
 0xf8d   :  { %v10778_v29 = vpop.f32.mrf.mxu1  ;;  %v7159_v35 = vadd.f32 %v7158_v52, %v7067_v55 }
 0xf8e   :  { %v10745_v58 = vpop.f32.mrf.mxu0 }
 0xf94   :  { %v7238_v48 = vpop.f32.mrf.mxu0 }
 0xf95   :  { %v7473_v1 = vpop.f32.mrf.mxu1  ;;  %v7239_v10 = vadd.f32 %v7238_v48, %v7159_v35 }
 0xf96   :  { %v10767_v7 = vpop.f32.mrf.mxu0 }
 0xf97   :  { %v10800_v8 = vpop.f32.mrf.mxu1  ;;  %v7316_v33 = vadd.f32 %v7315_v53, %v7239_v10 }
 0xf9d   :  { %v7398_v11 = vpop.f32.mrf.mxu0 }
 0xf9e   :  { %v7399_v12 = vadd.f32 %v7398_v11, %v7316_v33 }
 0xf9f   :  { %v10789_v13 = vpop.f32.mrf.mxu0 }
 0xfa0   :  { %v7474_v15 = vadd.f32 %v7473_v1, %v7399_v12 }
 0xfa2   :  { %v7477_v16 = vadd.f32 %v7474_v15, %v11954_v9 }
 0xfa4   :  { %11176 = vtanh.f32 %v7477_v16  ;;  %v9676_v18 = vmul.f32 -1.442695, %v7477_v16 }
 0xfa6   :  { %11178 = vpow2.f32 %v9676_v18 }
 0xfb1   :  { %v11177_v17 = vpop.eup %11176 }
 0xfb2   :  { %7487 = vrot.lane.b32.xlu0 %v11177_v17, %s11211_s28 }
 0xfb3   :  { %v11179_v19 = vpop.eup %11178 }
 0xfb4   :  { %v7481_v20 = vadd.f32 1.0, %v11179_v19 }
 0xfb6   :  { %11180 = vrcp.f32 %v7481_v20 }
 0xfc3   :  { %v11181_v23 = vpop.eup %11180 }
 0xfc4   :  { %v7485_v27 = vmul.f32 %v11181_v23, %v12245_v39 }
0x1024   :  { %v7488_v25 = vpop.permute.xlu0 %7487 }
0x1025   :  { %v7490_v26 = vmul.f32 %v11181_v23, %v7488_v25 }
0x1027   :  { %7492 = vrot.lane.b32.xlu1 %v7490_v26, %s11212_s29 }
0x1099   :  { %v7493_v28 = vpop.permute.xlu1 %7492 }
0x109a   :  { %v12315_v30 = vadd.f32 %v7493_v28, %v7485_v27 }
0x109c   :  { %11182 = vtanh.f32 %v12315_v30 }
0x10a9   :  { %v11183_v9 = vpop.eup %11182 }
0x10aa   :  { %7498 = vrot.lane.b32.xlu0 %v11183_v9, %s11211_s28 }
0x111c   :  { %v7499_v31 = vpop.permute.xlu0 %7498 }
0x111d   :  { %v7501_v37 = vmul.f32 %v11181_v23, %v7499_v31 }
0x111f   :  { %7503 = vrot.lane.b32.xlu1 %v7501_v37, %s11212_s29 }
0x1191   :  { %v7504_v38 = vpop.permute.xlu1 %7503 }
0x1192   :  { %v7505_v40 = vsel %vm4413_vm4, %v7504_v38, 0 }
0x1193   :  { %v7576_v41 = vand.u32 4294901760, %v7505_v40 }
0x1195   :  { %v7577_v42 = vsub.f32 %v7505_v40, %v7576_v41  ;;  %10821 = vmatmul.mubr.f32.vlgmr.msra.gmra.mxu1 %v7576_v41 }
0x1196   :  { %10835 = vmatpush3.msra.mxu1 %v11748_v51  ;;  %10842 = vmatprep.mubr.msk.f32.mxu1 %vm11210_vm3, %v11209_v34 }
0x1197   :  { %v7578_v39 = vand.u32 4294901760, %v7577_v42  ;;  %10836 = vmatprep.subr.mxu1 %v11209_v34 }
0x1198   :  { %10837 = vmatpush3.msra.mxu1 %v11758_v54 }
0x1199   :  { %v7579_v14 = vsub.f32 %v7577_v42, %v7578_v39  ;;  %10838 = vmatprep.subr.mxu1 %v11209_v34 }
0x119a   :  { %10839 = vmatpush3.msra.mxu1 %v11770_v57 }
0x119b   :  { %v7580_v45 = vand.u32 4294901760, %v7579_v14  ;;  %10840 = vmatprep.subr.mxu1 %v11209_v34 }
0x119c   :  { %10841 = vmatpush3.msra.mxu1 %v11780_v60 }
0x119d   :  { %10843 = vmatmul.mubr.f32.vlgmr.msra.gmra.mxu1 %v7578_v39  ;;  %10856 = vmatprep.subr.mxu1 %v11209_v34 }
0x119e   :  { %10810 = vmatmul.mubr.f32.vlgmr.msra.gmra.mxu0 %v7580_v45  ;;  %10857 = vmatpush3.msra.mxu1 %v11748_v51 }
0x119f   :  { %10824 = vmatpush3.msra.mxu0 %v11768_v56  ;;  %10858 = vmatprep.subr.mxu1 %v11209_v34 }
0x11a0   :  { %10825 = vmatprep.subr.mxu0 %v11209_v34  ;;  %10859 = vmatpush3.msra.mxu1 %v11758_v54 }
0x11a1   :  { %10826 = vmatpush3.msra.mxu0 %v11778_v59  ;;  %10860 = vmatprep.subr.mxu1 %v11209_v34 }
0x11a2   :  { %10827 = vmatprep.subr.mxu0 %v11209_v34  ;;  %10861 = vmatpush3.msra.mxu1 %v11770_v57 }
0x11a3   :  { %10828 = vmatpush3.msra.mxu0 %v11791_v62  ;;  %10862 = vmatprep.subr.mxu1 %v11209_v34 }
0x11a4   :  { %10829 = vmatprep.subr.mxu0 %v11209_v34  ;;  %10831 = vmatprep.mubr.msk.f32.mxu0 %vm11210_vm3, %v11209_v34 }
0x11a5   :  { %10830 = vmatpush3.msra.mxu0 %v11801_v43  ;;  %10863 = vmatpush3.msra.mxu1 %v11780_v60 }
0x11a6   :  { %10864 = vmatprep.mubr.msk.f32.mxu1 %vm11210_vm3, %v11209_v34  ;;  %10832 = vmatmul.mubr.f32.vlgmr.msra.gmra.mxu0 %v7577_v42 }
0x11a7   :  { %10845 = vmatprep.subr.mxu0 %v11209_v34  ;;  %10865 = vmatmul.mubr.f32.vlgmr.msra.gmra.mxu1 %v7576_v41 }
0x11a8   :  { %10846 = vmatpush3.msra.mxu0 %v11788_v61  ;;  %10853 = vmatprep.mubr.msk.f32.mxu0 %vm11210_vm3, %v11209_v34 }
0x11a9   :  { %10847 = vmatprep.subr.mxu0 %v11209_v34  ;;  %10878 = vmatprep.subr.mxu1 %v11209_v34 }
0x11aa   :  { %10848 = vmatpush3.msra.mxu0 %v11798_v63  ;;  %10879 = vmatpush3.msra.mxu1 %v11827_v3 }
0x11ab   :  { %10849 = vmatprep.subr.mxu0 %v11209_v34  ;;  %10880 = vmatprep.subr.mxu1 %v11209_v34 }
0x11ac   :  { %10850 = vmatpush3.msra.mxu0 %v11811_v0  ;;  %10881 = vmatpush3.msra.mxu1 %v11834_v4 }
0x11ad   :  { %10851 = vmatprep.subr.mxu0 %v11209_v34  ;;  %10882 = vmatprep.subr.mxu1 %v11209_v34 }
0x11ae   :  { %10852 = vmatpush3.msra.mxu0 %v11821_v2  ;;  %10883 = vmatpush3.msra.mxu1 %v11844_v5 }
0x11af   :  { %10854 = vmatmul.mubr.f32.vlgmr.msra.gmra.mxu0 %v7576_v41  ;;  %10884 = vmatprep.subr.mxu1 %v11209_v34 }
0x11b0   :  { %10885 = vmatpush3.msra.mxu1 %v11850_v6  ;;  %10867 = vmatprep.subr.mxu0 %v11209_v34 }
0x11b1   :  { %10886 = vmatprep.mubr.msk.f32.mxu1 %vm11210_vm3, %v11209_v34  ;;  %10900 = vmatprep.subr.mxu1 %v11209_v34 }
0x11b2   :  { %10868 = vmatpush3.msra.mxu0 %v11748_v51  ;;  %10875 = vmatprep.mubr.msk.f32.mxu0 %vm11210_vm3, %v11209_v34 }
0x11b3   :  { %10869 = vmatprep.subr.mxu0 %v11209_v34 }
0x11b4   :  { %10870 = vmatpush3.msra.mxu0 %v11758_v54 }
0x11b5   :  { %10871 = vmatprep.subr.mxu0 %v11209_v34 }
0x11b6   :  { %10872 = vmatpush3.msra.mxu0 %v11770_v57 }
0x11b7   :  { %10873 = vmatprep.subr.mxu0 %v11209_v34 }
0x11b8   :  { %10874 = vmatpush3.msra.mxu0 %v11780_v60 }
0x11b9   :  { %10889 = vmatprep.subr.mxu0 %v11209_v34 }
0x1255   :  { %v7673_v3 = vpop.f32.mrf.mxu1 }
0x1257   :  { %v10822_v4 = vpop.f32.mrf.mxu1 }
0x125d   :  { %v7830_v5 = vpop.f32.mrf.mxu1 }
0x125e   :  { %v7582_v6 = vpop.f32.mrf.mxu0 }
0x125f   :  { %v10844_v47 = vpop.f32.mrf.mxu1  ;;  %v7674_v50 = vadd.f32 %v7673_v3, %v7582_v6  ;;  %v34_v6 = vld [vmem:[%s12690_s2 + $0x60] sm:$0xff] }
0x1260   :  { %v10811_v21 = vpop.f32.mrf.mxu0  ;;  %v12447_v47 = vand.u32 4294901760, %v34_v6 }
0x1261   :  { %v33_v21 = vld [vmem:[%s12690_s2 + $0x58] sm:$0xff] }
0x1266   :  { %v7753_v44 = vpop.f32.mrf.mxu0 }
0x1267   :  { %v7988_v49 = vpop.f32.mrf.mxu1  ;;  %v7754_v53 = vadd.f32 %v7753_v44, %v7674_v50  ;;  %v12453_v44 = vsub.f32 %v34_v6, %v12447_v47  ;;  %v32_v50 = vld [vmem:[%s12690_s2 + $0x50] sm:$0xff] }
0x1268   :  { %v10833_v52 = vpop.f32.mrf.mxu0 }
0x1269   :  { %v10866_v46 = vpop.f32.mrf.mxu1  ;;  %v7831_v55 = vadd.f32 %v7830_v5, %v7754_v53 }
0x126a   :  { %v8701_v46 = vand.u32 4294901760, %v12453_v44 }
0x126f   :  { %v7913_v29 = vpop.f32.mrf.mxu0 }
0x1270   :  { %v7914_v58 = vadd.f32 %v7913_v29, %v7831_v55  ;;  %v12468_v55 = vand.u32 4294901760, %v32_v50 }
0x1271   :  { %v10855_v48 = vpop.f32.mrf.mxu0 }
0x1272   :  { %v7989_v1 = vadd.f32 %v7988_v49, %v7914_v58  ;;  %v12455_v49 = vand.u32 4294901760, %v33_v21  ;;  %v31_v58 = vld [vmem:[%s12690_s2 + $0x48] sm:$0xff] }
0x1274   :  { %v7992_v35 = vadd.f32 %v7989_v1, %v11957_v32  ;;  %v12466_v53 = vsub.f32 %v33_v21, %v12455_v49  ;;  %v8702_v1 = vsub.f32 %v12453_v44, %v8701_v46  ;;  %v30_v21 = vld [vmem:[%s12690_s2 + $0x40] sm:$0xff] }
0x1276   :  { %11184 = vtanh.f32 %v7992_v35  ;;  %v9677_v8 = vmul.f32 -1.442695, %v7992_v35  ;;  %v8708_v35 = vand.u32 4294901760, %v12466_v53 }
0x1278   :  { %11186 = vpow2.f32 %v9677_v8  ;;  %v12483_v8 = vand.u32 4294901760, %v31_v58 }
0x1283   :  { %v11185_v7 = vpop.eup %11184 }
0x1284   :  { %8002 = vrot.lane.b32.xlu0 %v11185_v7, %s11211_s28  ;;  %v12480_v7 = vsub.f32 %v32_v50, %v12468_v55 }
0x1285   :  { %v11187_v10 = vpop.eup %11186 }
0x1286   :  { %v7996_v33 = vadd.f32 1.0, %v11187_v10  ;;  %v8703_v10 = vand.u32 4294901760, %v8702_v1 }
0x1288   :  { %11188 = vrcp.f32 %v7996_v33  ;;  %v8709_v33 = vsub.f32 %v12466_v53, %v8708_v35 }
0x1295   :  { %v11189_v11 = vpop.eup %11188 }
0x1296   :  { %v8000_v15 = vmul.f32 %v11189_v11, %v12315_v30 }
0x12f6   :  { %v8003_v12 = vpop.permute.xlu0 %8002 }
0x12f7   :  { %v8005_v13 = vmul.f32 %v11189_v11, %v8003_v12  ;;  %v12491_v12 = vsub.f32 %v31_v58, %v12483_v8 }
0x12f9   :  { %8007 = vrot.lane.b32.xlu1 %v8005_v13, %s11212_s29  ;;  %v8710_v13 = vand.u32 4294901760, %v8709_v33 }
0x136b   :  { %v8008_v16 = vpop.permute.xlu1 %8007 }
0x136c   :  { %v12385_v17 = vadd.f32 %v8008_v16, %v8000_v15  ;;  %v8722_v16 = vand.u32 4294901760, %v12491_v12 }
0x136e   :  { %11190 = vtanh.f32 %v12385_v17 }
0x137b   :  { %v11191_v32 = vpop.eup %11190 }
0x137c   :  { %8013 = vrot.lane.b32.xlu0 %v11191_v32, %s11211_s28  ;;  %v8723_v32 = vsub.f32 %v12491_v12, %v8722_v16 }
0x13ee   :  { %v8014_v18 = vpop.permute.xlu0 %8013 }
0x13ef   :  { %v8016_v19 = vmul.f32 %v11189_v11, %v8014_v18  ;;  %v8715_v11 = vand.u32 4294901760, %v12480_v7  ;;  %v8724_v18 = vand.u32 4294901760, %v8723_v32 }
0x13f1   :  { %8018 = vrot.lane.b32.xlu1 %v8016_v19, %s11212_s29  ;;  %v8716_v15 = vsub.f32 %v12480_v7, %v8715_v11 }
0x1463   :  { %v8019_v20 = vpop.permute.xlu1 %8018 }
0x1464   :  { %v8020_v23 = vsel %vm4413_vm4, %v8019_v20, 0  ;;  %v12509_v20 = vmax.f32 %v11936_v36, 0.0 }
0x1465   :  { %v8091_v25 = vand.u32 4294901760, %v8020_v23 }
0x1467   :  { %v8092_v26 = vsub.f32 %v8020_v23, %v8091_v25  ;;  %10887 = vmatmul.mubr.f32.vlgmr.msra.gmra.mxu1 %v8091_v25  ;;  %v8569_v23 = vsel %vm8568_vm5, %v12509_v20, 0.0 }
0x1468   :  { %10901 = vmatpush3.msra.mxu1 %v11748_v51  ;;  %10908 = vmatprep.mubr.msk.f32.mxu1 %vm11210_vm3, %v11209_v34 }
0x1469   :  { %v8093_v27 = vand.u32 4294901760, %v8092_v26  ;;  %10902 = vmatprep.subr.mxu1 %v11209_v34 }
0x146a   :  { %10903 = vmatpush3.msra.mxu1 %v11758_v54 }
0x146b   :  { %v8094_v28 = vsub.f32 %v8092_v26, %v8093_v27  ;;  %10904 = vmatprep.subr.mxu1 %v11209_v34 }
0x146c   :  { %10905 = vmatpush3.msra.mxu1 %v11770_v57 }
0x146d   :  { %v8095_v30 = vand.u32 4294901760, %v8094_v28  ;;  %10906 = vmatprep.subr.mxu1 %v11209_v34 }
0x146e   :  { %10907 = vmatpush3.msra.mxu1 %v11780_v60 }
0x146f   :  { %10909 = vmatmul.mubr.f32.vlgmr.msra.gmra.mxu1 %v8093_v27  ;;  %10922 = vmatprep.subr.mxu1 %v11209_v34 }
0x1470   :  { %10876 = vmatmul.mubr.f32.vlgmr.msra.gmra.mxu0 %v8095_v30  ;;  %10923 = vmatpush3.msra.mxu1 %v11748_v51 }
0x1471   :  { %10890 = vmatpush3.msra.mxu0 %v11768_v56  ;;  %10924 = vmatprep.subr.mxu1 %v11209_v34 }
0x1472   :  { %10891 = vmatprep.subr.mxu0 %v11209_v34  ;;  %10925 = vmatpush3.msra.mxu1 %v11758_v54 }
0x1473   :  { %10892 = vmatpush3.msra.mxu0 %v11778_v59  ;;  %10926 = vmatprep.subr.mxu1 %v11209_v34 }
0x1474   :  { %10893 = vmatprep.subr.mxu0 %v11209_v34  ;;  %10927 = vmatpush3.msra.mxu1 %v11770_v57 }
0x1475   :  { %10894 = vmatpush3.msra.mxu0 %v11791_v62  ;;  %10928 = vmatprep.subr.mxu1 %v11209_v34 }
0x1476   :  { %10895 = vmatprep.subr.mxu0 %v11209_v34  ;;  %10897 = vmatprep.mubr.msk.f32.mxu0 %vm11210_vm3, %v11209_v34 }
0x1477   :  { %10896 = vmatpush3.msra.mxu0 %v11801_v43  ;;  %10929 = vmatpush3.msra.mxu1 %v11780_v60 }
0x1478   :  { %10930 = vmatprep.mubr.msk.f32.mxu1 %vm11210_vm3, %v11209_v34  ;;  %10898 = vmatmul.mubr.f32.vlgmr.msra.gmra.mxu0 %v8092_v26 }
0x1479   :  { %10911 = vmatprep.subr.mxu0 %v11209_v34  ;;  %10931 = vmatmul.mubr.f32.vlgmr.msra.gmra.mxu1 %v8091_v25 }
0x147a   :  { %10912 = vmatpush3.msra.mxu0 %v11788_v61  ;;  %10919 = vmatprep.mubr.msk.f32.mxu0 %vm11210_vm3, %v11209_v34 }
0x147b   :  { %10913 = vmatprep.subr.mxu0 %v11209_v34  ;;  %10944 = vmatprep.subr.mxu1 %v11209_v34 }
0x147c   :  { %10914 = vmatpush3.msra.mxu0 %v11798_v63  ;;  %10952 = vmatprep.mubr.msk.f32.mxu1 %vm11210_vm3, %v11209_v34 }
0x147d   :  { %10915 = vmatprep.subr.mxu0 %v11209_v34  ;;  %10945 = vmatpush3.msra.mxu1 %v8703_v10 }
0x147e   :  { %10916 = vmatpush3.msra.mxu0 %v11811_v0  ;;  %10946 = vmatprep.subr.mxu1 %v11209_v34 }
0x147f   :  { %10917 = vmatprep.subr.mxu0 %v11209_v34  ;;  %10947 = vmatpush3.msra.mxu1 %v8710_v13 }
0x1480   :  { %10918 = vmatpush3.msra.mxu0 %v11821_v2  ;;  %10948 = vmatprep.subr.mxu1 %v11209_v34 }
0x1481   :  { %10920 = vmatmul.mubr.f32.vlgmr.msra.gmra.mxu0 %v8091_v25  ;;  %10933 = vmatprep.subr.mxu0 %v11209_v34  ;;  %v8570_v25 = vrot.slane %v8569_v23, 4 }
0x1482   :  { %10941 = vmatprep.mubr.msk.f32.mxu0 %vm11210_vm3, %v11209_v34  ;;  %10934 = vmatpush3.msra.mxu0 %v12447_v47 }
0x1483   :  { %10935 = vmatprep.subr.mxu0 %v11209_v34  ;;  %v8571_v26 = vadd.f32 %v8570_v25, %v8569_v23 }
0x1484   :  { %10936 = vmatpush3.msra.mxu0 %v12455_v49 }
0x1485   :  { %10937 = vmatprep.subr.mxu0 %v11209_v34  ;;  %v8572_v27 = vrot.slane %v8571_v26, 2 }
0x1486   :  { %10938 = vmatpush3.msra.mxu0 %v12468_v55 }
0x1487   :  { %10939 = vmatprep.subr.mxu0 %v11209_v34  ;;  %v8573_v28 = vadd.f32 %v8572_v27, %v8571_v26 }
0x1488   :  { %10940 = vmatpush3.msra.mxu0 %v12483_v8 }
0x1489   :  { %10955 = vmatprep.subr.mxu0 %v11209_v34  ;;  %v8574_v30 = vrot.slane %v8573_v28, 1 }
0x1527   :  { %v8188_v51 = vpop.f32.mrf.mxu1 }
0x1529   :  { %v10888_v54 = vpop.f32.mrf.mxu1 }
0x152f   :  { %v8345_v56 = vpop.f32.mrf.mxu1 }
0x1530   :  { %v8097_v57 = vpop.f32.mrf.mxu0 }
0x1531   :  { %v10910_v59 = vpop.f32.mrf.mxu1  ;;  %v8189_v63 = vadd.f32 %v8188_v51, %v8097_v57  ;;  %v8575_v51 = vadd.f32 %v8574_v30, %v8573_v28 }
0x1532   :  { %v10877_v60 = vpop.f32.mrf.mxu0 }
0x1533   :  { %v8576_v54 = vmul.f32 0.5, %v8575_v51 }
0x1538   :  { %v8268_v61 = vpop.f32.mrf.mxu0 }
0x1539   :  { %v8503_v62 = vpop.f32.mrf.mxu1  ;;  %v8269_v9 = vadd.f32 %v8268_v61, %v8189_v63 }
0x153a   :  { %v10899_v43 = vpop.f32.mrf.mxu0 }
0x153b   :  { %v10932_v0 = vpop.f32.mrf.mxu1  ;;  %v8346_v31 = vadd.f32 %v8345_v56, %v8269_v9  ;;  %v8577_v56 = vsub.f32 %v12509_v20, %v8576_v54 }
0x153d   :  { %v8578_v57 = vmul.f32 %v8577_v56, %v8577_v56 }
0x153f   :  { %v8579_v59 = vsel %vm8568_vm5, %v8578_v57, 0.0 }
0x1540   :  { %v8580_v60 = vrot.slane %v8579_v59, 4 }
0x1541   :  { %v8428_v2 = vpop.f32.mrf.mxu0 }
0x1542   :  { %v8429_v37 = vadd.f32 %v8428_v2, %v8346_v31  ;;  %v8581_v61 = vadd.f32 %v8580_v60, %v8579_v59 }
0x1543   :  { %v10921_v38 = vpop.f32.mrf.mxu0 }
0x1544   :  { %v8504_v40 = vadd.f32 %v8503_v62, %v8429_v37  ;;  %v8582_v62 = vrot.slane %v8581_v61, 2 }
0x1546   :  { %v8507_v41 = vadd.f32 %v8504_v40, %v11960_v22  ;;  %v9679_v22 = vld [vmem:[%s12690_s2 + $0x5] ss:$0 sm:$0xff]  ;;  %v8583_v63 = vadd.f32 %v8582_v62, %v8581_v61 }
0x1548   :  { %11192 = vtanh.f32 %v8507_v41  ;;  %v9678_v39 = vmul.f32 -1.442695, %v8507_v41  ;;  %v8584_v36 = vrot.slane %v8583_v63, 1 }
0x154a   :  { %11194 = vpow2.f32 %v9678_v39  ;;  %v8585_v43 = vadd.f32 %v8584_v36, %v8583_v63 }
0x154c   :  { %v8586_v0 = vmul.f32 0.5, %v8585_v43 }
0x154e   :  { %v8587_v9 = vadd.f32 1e-05, %v8586_v0 }
0x1555   :  { %v11193_v42 = vpop.eup %11192 }
0x1556   :  { %8517 = vrot.lane.b32.xlu0 %v11193_v42, %s11211_s28 }
0x1557   :  { %v11195_v14 = vpop.eup %11194 }
0x1558   :  { %v8511_v45 = vadd.f32 1.0, %v11195_v14 }
0x155a   :  { %11196 = vrcp.f32 %v8511_v45 }
0x1567   :  { %v12437_v3 = vpop.eup %11196 }
0x1568   :  { %v8515_v52 = vmul.f32 %v12437_v3, %v12385_v17  ;;  %v8717_v17 = vand.u32 4294901760, %v8716_v15 }
0x156a   :  { %10949 = vmatpush3.msra.mxu1 %v8717_v17 }
0x156b   :  { %10950 = vmatprep.subr.mxu1 %v11209_v34 }
0x156c   :  { %10951 = vmatpush3.msra.mxu1 %v8724_v18 }
0x156d   :  { %10966 = vmatprep.subr.mxu1 %v11209_v34 }
0x15c8   :  { %v8518_v4 = vpop.permute.xlu0 %8517 }
0x15c9   :  { %v8520_v5 = vmul.f32 %v12437_v3, %v8518_v4 }
0x15cb   :  { %8522 = vrot.lane.b32.xlu1 %v8520_v5, %s11212_s29 }
0x15cf   :  { %8560 = vrot.lane.b32.xlu1 %v9679_v22, %s11213_s6 }
0x163d   :  { %v8523_v29 = vpop.permute.xlu1 %8522 }
0x163e   :  { %v8525_v48 = vadd.f32 %v8523_v29, %v8515_v52  ;;  %v29_v52 = vld [vmem:[%s12690_s2 + $0x38] sm:$0xff]  ;;  %v12535_v29 = vand.u32 4294901760, %v30_v21 }
0x163f   :  { %v12539_v1 = vand.u32 4294901760, %v29_v52 }
0x1640   :  { %11198 = vtanh.f32 %v8525_v48  ;;  %v12544_v13 = vsub.f32 %v30_v21, %v12535_v29 }
0x1641   :  { %11200 = vrsqrt.f32 %v8587_v9  ;;  %v12513_v2 = vpop.permute.xlu1 %8560  ;;  %v12549_v32 = vsub.f32 %v29_v52, %v12539_v1 }
0x1643   :  { %v9198_v25 = vand.u32 4294901760, %v12549_v32 }
0x1645   :  { %v9199_v28 = vsub.f32 %v12549_v32, %v9198_v25 }
0x1647   :  { %v9200_v54 = vand.u32 4294901760, %v9199_v28  ;;  %v9576_v28 = vand.u32 127, %v173_v24 }
0x1649   :  { %vm9577_vm7 = vcmp.ge.s32.totalorder %v9576_v28, 48  ;;  %vm9578_vm8 = vcmp.lt.s32.totalorder %v9576_v28, 51 }
0x164a   :  { %vm12672_vm9 = vmand %vm9577_vm7, %vm9578_vm8 }
0x164d   :  { %v11199_v19 = vpop.eup %11198 }
0x164e   :  { %8528 = vrot.lane.b32.xlu0 %v11199_v19, %s11211_s28  ;;  %v11201_v31 = vpop.eup %11200  ;;  %v9191_v19 = vand.u32 4294901760, %v12544_v13 }
0x164f   :  { %v8589_v38 = vmul.f32 %v11201_v31, %v8577_v56 }
0x1650   :  { %v9192_v27 = vsub.f32 %v12544_v13, %v9191_v19 }
0x1651   :  { %v8590_v41 = vmul.f32 %v8589_v38, %v12513_v2 }
0x1652   :  { %8564 = vrot.lane.b32.xlu0 %v9679_v22, %s11212_s29  ;;  %v9193_v30 = vand.u32 4294901760, %v9192_v27 }
0x16c0   :  { %v8529_v37 = vpop.permute.xlu0 %8528 }
0x16c1   :  { %v8531_v40 = vmul.f32 %v12437_v3, %v8529_v37 }
0x16c3   :  { %v8533_v42 = vsel %vm8532_vm6, %v8531_v40, 0.0 }
0x16c4   :  { %v8534_v39 = vrot.slane %v8533_v42, 4  ;;  %v12518_v14 = vpop.permute.xlu0 %8564 }
0x16c5   :  { %v8591_v45 = vadd.f32 %v8590_v41, %v12518_v14 }
0x16c6   :  { %v8535_v4 = vadd.f32 %v8534_v39, %v8533_v42 }
0x16c7   :  { %v8593_v5 = vsel %vm4413_vm4, %v8591_v45, 0 }
0x16c8   :  { %v8536_v22 = vrot.slane %v8535_v4, 2  ;;  %v12522_v6 = vand.u32 4294901760, %v8593_v5 }
0x16ca   :  { %v8537_v3 = vadd.f32 %v8536_v22, %v8535_v4  ;;  %v8665_v50 = vsub.f32 %v8593_v5, %v12522_v6  ;;  %10953 = vmatmul.mubr.f32.vlgmr.msra.gmra.mxu1 %v12522_v6 }
0x16cb   :  { %10967 = vmatpush3.msra.mxu1 %v12447_v47  ;;  %10974 = vmatprep.mubr.msk.f32.mxu1 %vm11210_vm3, %v11209_v34 }
0x16cc   :  { %v8538_v58 = vrot.slane %v8537_v3, 1  ;;  %10968 = vmatprep.subr.mxu1 %v11209_v34  ;;  %v8666_v48 = vand.u32 4294901760, %v8665_v50 }
0x16cd   :  { %10969 = vmatpush3.msra.mxu1 %v12455_v49 }
0x16ce   :  { %v8539_v10 = vadd.f32 %v8538_v58, %v8537_v3  ;;  %10970 = vmatprep.subr.mxu1 %v11209_v34  ;;  %v8667_v33 = vsub.f32 %v8665_v50, %v8666_v48 }
0x16cf   :  { %10971 = vmatpush3.msra.mxu1 %v12468_v55 }
0x16d0   :  { %v8541_v15 = vmul.f32 0.5, %v8539_v10  ;;  %10972 = vmatprep.subr.mxu1 %v11209_v34  ;;  %v8668_v17 = vand.u32 4294901760, %v8667_v33 }
0x16d1   :  { %10973 = vmatpush3.msra.mxu1 %v12483_v8 }
0x16d2   :  { %v12551_v18 = vsub.f32 %v8531_v40, %v8541_v15  ;;  %10975 = vmatmul.mubr.f32.vlgmr.msra.gmra.mxu1 %v8666_v48  ;;  %10988 = vmatprep.subr.mxu1 %v11209_v34 }
0x16d3   :  { %10942 = vmatmul.mubr.f32.vlgmr.msra.gmra.mxu0 %v8668_v17  ;;  %10989 = vmatpush3.msra.mxu1 %v12447_v47 }
0x16d4   :  { %v8543_v23 = vmul.f32 %v12551_v18, %v12551_v18  ;;  %10956 = vmatpush3.msra.mxu0 %v12453_v44  ;;  %10990 = vmatprep.subr.mxu1 %v11209_v34 }
0x16d5   :  { %10957 = vmatprep.subr.mxu0 %v11209_v34  ;;  %10991 = vmatpush3.msra.mxu1 %v12455_v49 }
0x16d6   :  { %v8544_v26 = vsel %vm8532_vm6, %v8543_v23, 0.0  ;;  %10958 = vmatpush3.msra.mxu0 %v12466_v53  ;;  %10992 = vmatprep.subr.mxu1 %v11209_v34  ;;  %v28_v53 = vld [vmem:[%s12690_s2 + $0x30] sm:$0xff] }
0x16d7   :  { %v8545_v47 = vrot.slane %v8544_v26, 4  ;;  %10959 = vmatprep.subr.mxu0 %v11209_v34  ;;  %10993 = vmatpush3.msra.mxu1 %v12468_v55 }
0x16d8   :  { %10960 = vmatpush3.msra.mxu0 %v12480_v7  ;;  %10994 = vmatprep.subr.mxu1 %v11209_v34  ;;  %v27_v7 = vld [vmem:[%s12690_s2 + $0x28] sm:$0xff] }
0x16d9   :  { %v8546_v49 = vadd.f32 %v8545_v47, %v8544_v26  ;;  %10961 = vmatprep.subr.mxu0 %v11209_v34  ;;  %10963 = vmatprep.mubr.msk.f32.mxu0 %vm11210_vm3, %v11209_v34 }
0x16da   :  { %10962 = vmatpush3.msra.mxu0 %v12491_v12  ;;  %10995 = vmatpush3.msra.mxu1 %v12483_v8  ;;  %v9119_v12 = vand.u32 4294901760, %v27_v7 }
0x16db   :  { %v8547_v55 = vrot.slane %v8546_v49, 2  ;;  %10996 = vmatprep.mubr.msk.f32.mxu1 %vm11210_vm3, %v11209_v34  ;;  %10964 = vmatmul.mubr.f32.vlgmr.msra.gmra.mxu0 %v8665_v50 }
0x16dc   :  { %10977 = vmatprep.subr.mxu0 %v11209_v34  ;;  %10997 = vmatmul.mubr.f32.vlgmr.msra.gmra.mxu1 %v12522_v6  ;;  %v12620_v57 = vsub.f32 %v27_v7, %v9119_v12 }
0x16dd   :  { %v8548_v51 = vadd.f32 %v8547_v55, %v8546_v49  ;;  %10978 = vmatpush3.msra.mxu0 %v8701_v46  ;;  %10985 = vmatprep.mubr.msk.f32.mxu0 %vm11210_vm3, %v11209_v34 }
0x16de   :  { %10979 = vmatprep.subr.mxu0 %v11209_v34  ;;  %11010 = vmatprep.subr.mxu1 %v11209_v34  ;;  %v9212_v60 = vand.u32 4294901760, %v12620_v57 }
0x16df   :  { %v8549_v8 = vrot.slane %v8548_v51, 1  ;;  %10980 = vmatpush3.msra.mxu0 %v8708_v35  ;;  %11011 = vmatpush3.msra.mxu1 %v9193_v30  ;;  %v9116_v35 = vand.u32 4294901760, %v28_v53 }
0x16e0   :  { %10981 = vmatprep.subr.mxu0 %v11209_v34  ;;  %11012 = vmatprep.subr.mxu1 %v11209_v34  ;;  %v9213_v62 = vsub.f32 %v12620_v57, %v9212_v60 }
0x16e1   :  { %v8550_v56 = vadd.f32 %v8549_v8, %v8548_v51  ;;  %10982 = vmatpush3.msra.mxu0 %v8715_v11  ;;  %11013 = vmatpush3.msra.mxu1 %v9200_v54  ;;  %v12616_v11 = vsub.f32 %v28_v53, %v9116_v35  ;;  %v9680_v8 = vld [vmem:[%s12690_s2 + $0x7] ss:$0 sm:$0xff] }
0x16e2   :  { %10983 = vmatprep.subr.mxu0 %v11209_v34  ;;  %11014 = vmatprep.subr.mxu1 %v11209_v34  ;;  %v9214_v63 = vand.u32 4294901760, %v9213_v62 }
0x16e3   :  { %v8551_v44 = vmul.f32 0.5, %v8550_v56  ;;  %10984 = vmatpush3.msra.mxu0 %v8722_v16  ;;  %11018 = vmatprep.mubr.msk.f32.mxu1 %vm11210_vm3, %v11209_v34  ;;  %v9205_v16 = vand.u32 4294901760, %v12616_v11 }
0x16e4   :  { %10986 = vmatmul.mubr.f32.vlgmr.msra.gmra.mxu0 %v12522_v6  ;;  %10999 = vmatprep.subr.mxu0 %v11209_v34 }
0x16e5   :  { %v8552_v46 = vadd.f32 1e-05, %v8551_v44  ;;  %11000 = vmatpush3.msra.mxu0 %v12535_v29  ;;  %11007 = vmatprep.mubr.msk.f32.mxu0 %vm11210_vm3, %v11209_v34  ;;  %v9206_v59 = vsub.f32 %v12616_v11, %v9205_v16 }
0x16e6   :  { %11001 = vmatprep.subr.mxu0 %v11209_v34 }
0x16e7   :  { %11202 = vrsqrt.f32 %v8552_v46  ;;  %11002 = vmatpush3.msra.mxu0 %v12539_v1  ;;  %v9207_v61 = vand.u32 4294901760, %v9206_v59 }
0x16e8   :  { %11003 = vmatprep.subr.mxu0 %v11209_v34 }
0x16e9   :  { %11004 = vmatpush3.msra.mxu0 %v9116_v35  ;;  %11015 = vmatpush3.msra.mxu1 %v9207_v61 }
0x16ea   :  { %11005 = vmatprep.subr.mxu0 %v11209_v34  ;;  %11016 = vmatprep.subr.mxu1 %v11209_v34 }
0x16eb   :  { %11006 = vmatpush3.msra.mxu0 %v9119_v12  ;;  %11017 = vmatpush3.msra.mxu1 %v9214_v63 }
0x16ec   :  { %11021 = vmatprep.subr.mxu0 %v11209_v34  ;;  %11032 = vmatprep.subr.mxu1 %v11209_v34 }
0x16f4   :  { %v11203_v36 = vpop.eup %11202 }
0x16f5   :  { %v8554_v43 = vmul.f32 %v11203_v36, %v12551_v18 }
0x16f7   :  { %v8563_v0 = vmul.f32 %v12513_v2, %v8554_v43 }
0x16f9   :  { %v8567_v9 = vadd.f32 %v12518_v14, %v8563_v0 }
0x16fb   :  { %9081 = vrot.lane.b32.xlu1 %v8567_v9, %s11212_s29 }
0x176d   :  { %v9082_v31 = vpop.permute.xlu1 %9081 }
0x176e   :  { %v9083_v37 = vsel %vm4413_vm4, %v9082_v31, 0 }
0x176f   :  { %v9154_v38 = vand.u32 4294901760, %v9083_v37 }
0x1771   :  { %v9155_v40 = vsub.f32 %v9083_v37, %v9154_v38  ;;  %11019 = vmatmul.mubr.f32.vlgmr.msra.gmra.mxu1 %v9154_v38 }
0x1772   :  { %11033 = vmatpush3.msra.mxu1 %v12535_v29  ;;  %11040 = vmatprep.mubr.msk.f32.mxu1 %vm11210_vm3, %v11209_v34 }
0x1773   :  { %v9156_v41 = vand.u32 4294901760, %v9155_v40  ;;  %11034 = vmatprep.subr.mxu1 %v11209_v34 }
0x1774   :  { %11035 = vmatpush3.msra.mxu1 %v12539_v1 }
0x1775   :  { %v9157_v2 = vsub.f32 %v9155_v40, %v9156_v41  ;;  %11036 = vmatprep.subr.mxu1 %v11209_v34 }
0x1776   :  { %11037 = vmatpush3.msra.mxu1 %v9116_v35 }
0x1777   :  { %v9158_v42 = vand.u32 4294901760, %v9157_v2  ;;  %11038 = vmatprep.subr.mxu1 %v11209_v34 }
0x1778   :  { %11039 = vmatpush3.msra.mxu1 %v9119_v12 }
0x1779   :  { %11041 = vmatmul.mubr.f32.vlgmr.msra.gmra.mxu1 %v9156_v41  ;;  %11054 = vmatprep.subr.mxu1 %v11209_v34 }
0x177a   :  { %11008 = vmatmul.mubr.f32.vlgmr.msra.gmra.mxu0 %v9158_v42  ;;  %11055 = vmatpush3.msra.mxu1 %v12535_v29 }
0x177b   :  { %11022 = vmatpush3.msra.mxu0 %v12544_v13  ;;  %11056 = vmatprep.subr.mxu1 %v11209_v34 }
0x177c   :  { %11023 = vmatprep.subr.mxu0 %v11209_v34  ;;  %11057 = vmatpush3.msra.mxu1 %v12539_v1 }
0x177d   :  { %11024 = vmatpush3.msra.mxu0 %v12549_v32  ;;  %11058 = vmatprep.subr.mxu1 %v11209_v34 }
0x177e   :  { %11025 = vmatprep.subr.mxu0 %v11209_v34  ;;  %11059 = vmatpush3.msra.mxu1 %v9116_v35 }
0x177f   :  { %11026 = vmatpush3.msra.mxu0 %v12616_v11  ;;  %11060 = vmatprep.subr.mxu1 %v11209_v34 }
0x1780   :  { %11027 = vmatprep.subr.mxu0 %v11209_v34  ;;  %11029 = vmatprep.mubr.msk.f32.mxu0 %vm11210_vm3, %v11209_v34 }
0x1781   :  { %11028 = vmatpush3.msra.mxu0 %v12620_v57  ;;  %11061 = vmatpush3.msra.mxu1 %v9119_v12 }
0x1782   :  { %11062 = vmatprep.mubr.msk.f32.mxu1 %vm11210_vm3, %v11209_v34  ;;  %11030 = vmatmul.mubr.f32.vlgmr.msra.gmra.mxu0 %v9155_v40 }
0x1783   :  { %11043 = vmatprep.subr.mxu0 %v11209_v34  ;;  %11063 = vmatmul.mubr.f32.vlgmr.msra.gmra.mxu1 %v9154_v38 }
0x1784   :  { %11044 = vmatpush3.msra.mxu0 %v9191_v19  ;;  %11051 = vmatprep.mubr.msk.f32.mxu0 %vm11210_vm3, %v11209_v34 }
0x1785   :  { %11045 = vmatprep.subr.mxu0 %v11209_v34 }
0x1786   :  { %11046 = vmatpush3.msra.mxu0 %v9198_v25 }
0x1787   :  { %11047 = vmatprep.subr.mxu0 %v11209_v34 }
0x1788   :  { %11048 = vmatpush3.msra.mxu0 %v9205_v16 }
0x1789   :  { %11049 = vmatprep.subr.mxu0 %v11209_v34 }
0x178a   :  { %11050 = vmatpush3.msra.mxu0 %v9212_v60  ;;  %v8761_v39 = vpop.f32.mrf.mxu1 }
0x178b   :  { %11052 = vmatmul.mubr.f32.vlgmr.msra.gmra.mxu0 %v9154_v38 }
0x178c   :  { %v10954_v14 = vpop.f32.mrf.mxu1 }
0x1792   :  { %v8918_v45 = vpop.f32.mrf.mxu1 }
0x1793   :  { %v8670_v4 = vpop.f32.mrf.mxu0 }
0x1794   :  { %v8762_v5 = vadd.f32 %v8761_v39, %v8670_v4  ;;  %v10976_v22 = vpop.f32.mrf.mxu1 }
0x1795   :  { %v10943_v6 = vpop.f32.mrf.mxu0 }
0x179b   :  { %v8841_v21 = vpop.f32.mrf.mxu0 }
0x179c   :  { %v8842_v3 = vadd.f32 %v8841_v21, %v8762_v5  ;;  %v9076_v50 = vpop.f32.mrf.mxu1 }
0x179d   :  { %v10965_v52 = vpop.f32.mrf.mxu0 }
0x179e   :  { %v10998_v29 = vpop.f32.mrf.mxu1  ;;  %v8919_v58 = vadd.f32 %v8918_v45, %v8842_v3 }
0x17a4   :  { %v9001_v48 = vpop.f32.mrf.mxu0 }
0x17a5   :  { %v9002_v1 = vadd.f32 %v9001_v48, %v8919_v58 }
0x17a6   :  { %v10987_v10 = vpop.f32.mrf.mxu0 }
0x17a7   :  { %v9077_v33 = vadd.f32 %v9076_v50, %v9002_v1 }
0x1831   :  { %v9251_v34 = vpop.f32.mrf.mxu1 }
0x1833   :  { %v11020_v13 = vpop.f32.mrf.mxu1 }
0x1839   :  { %v9408_v15 = vpop.f32.mrf.mxu1 }
0x183a   :  { %v9160_v17 = vpop.f32.mrf.mxu0 }
0x183b   :  { %v11042_v32 = vpop.f32.mrf.mxu1  ;;  %v9161_v19 = vadd.f32 %v9160_v17, %v9077_v33 }
0x183c   :  { %v11009_v18 = vpop.f32.mrf.mxu0 }
0x183d   :  { %v9252_v26 = vadd.f32 %v9251_v34, %v9161_v19 }
0x1842   :  { %v9331_v23 = vpop.f32.mrf.mxu0 }
0x1843   :  { %v9566_v25 = vpop.f32.mrf.mxu1  ;;  %v9332_v49 = vadd.f32 %v9331_v23, %v9252_v26 }
0x1844   :  { %v11031_v47 = vpop.f32.mrf.mxu0 }
0x1845   :  { %v11064_v27 = vpop.f32.mrf.mxu1  ;;  %v9409_v55 = vadd.f32 %v9408_v15, %v9332_v49 }
0x184b   :  { %v9491_v30 = vpop.f32.mrf.mxu0 }
0x184c   :  { %v9492_v51 = vadd.f32 %v9491_v30, %v9409_v55 }
0x184d   :  { %v11053_v54 = vpop.f32.mrf.mxu0 }
0x184e   :  { %v9567_v56 = vadd.f32 %v9566_v25, %v9492_v51 }
0x1850   :  { %v9574_v46 = vadd.f32 %v9680_v8, %v9567_v56 }
0x1852   :  { %v9580_v24 = vsel %vm12672_vm9, %v9574_v46, -1e+30 }
0x1853   :  { %v9582_v53 = vsel %vm9581_vm10, %v9580_v24, -inf }
0x1854   :  { %9583 = vmax.xlane.f32.xlu0 %v9582_v53 }
0x186a   :  { %9596 = vrot.lane.b32.xlu0 %v12509_v20, %s11211_s28 }
0x18dd   :  { %v9584_v35 = vpop.xlane.xlu0 %9583 }
0x18de   :  { %v9585_v7 = vsub.f32 %v9580_v24, %v9584_v35 }
0x18e0   :  { %v9586_v11 = vmul.f32 1.442695, %v9585_v7 }
0x18e1   :  { %v9597_v62 = vpop.permute.xlu0 %9596 }
0x18e2   :  { %11204 = vpow2.f32 %v9586_v11 }
0x18ef   :  { %v11205_v12 = vpop.eup %11204 }
0x18f0   :  { %v9588_v16 = vsel %vm9581_vm10, %v11205_v12, 0.0 }
0x18f1   :  { %9589 = vadd.xlane.f32.xlu1 %v9588_v16 }
0x197a   :  { %v9590_v57 = vpop.xlane.xlu1 %9589 }
0x197b   :  { %11206 = vrcp.f32 %v9590_v57 }
0x1988   :  { %v11207_v59 = vpop.eup %11206 }
0x1989   :  { %v9592_v60 = vmul.f32 %v11207_v59, %v11205_v12 }
0x198b   :  { %v9593_v61 = vsel %vm12672_vm9, %v9592_v60, %v9574_v46 }
0x198c   :  { %9594 = vst [vmem:[%s12692_s4] sm:$0x3] %v9593_v61 }
0x198d   :  { %9600 = vst.msk [vmem:[%s12692_s4] sm:$0x3] %vm9599_vm11, %v9597_v62 }

</bundles_post_ra>
